<compile_context>
chip_gen: v5e
topology: v5e:2x2
jax: 0.10.0
libtpu: 0.0.40
codegen_flags: <defaults>
</compile_context>

<pallas_src>
import functools
import math

import jax
import jax.numpy as jnp
from jax.experimental import pallas as pl
from jax.experimental.pallas import tpu as pltpu


OUT_DIM = 24      # final Linear output features (per the PyTorch module)
OUT_PAD = 128     # lane-dense padded output width; sliced back to OUT_DIM outside

ATTN_FIELDS = ("q_w", "q_b", "k_w", "k_b", "v_w", "v_b", "out_w", "out_b")

ENC_FIELDS = ATTN_FIELDS + (
    "ln1_g", "ln1_b",
    "ff1_w", "ff1_b", "ff2_w", "ff2_b",
    "ln2_g", "ln2_b",
)  # 16 tensors

DEC_FIELDS = (
    tuple("sa_" + f for f in ATTN_FIELDS) + ("ln1_g", "ln1_b")
    + tuple("ca_" + f for f in ATTN_FIELDS) + ("ln2_g", "ln2_b")
    + ("ff1_w", "ff1_b", "ff2_w", "ff2_b", "ln3_g", "ln3_b")
)  # 26 tensors


# ------------------------------ fused kernel -------------------------------

def make_fused_kernel(num_heads, eps=1e-5):
    def kernel(*refs):
        # ---- unpack refs (3 + 16 + 26 + 2 inputs, 1 output) ----
        x_ref, emb_w_ref, emb_b_ref = refs[0], refs[1], refs[2]
        off = 3
        enc = {name: refs[off + i] for i, name in enumerate(ENC_FIELDS)}
        off += len(ENC_FIELDS)
        dec = {name: refs[off + i] for i, name in enumerate(DEC_FIELDS)}
        off += len(DEC_FIELDS)
        fc_w_ref, fc_b_ref, out_ref = refs[off], refs[off + 1], refs[off + 2]

        # ---------------- helpers (traced inline, all 2D/VMEM) -------------
        def layernorm(x, g, b):                        # x: (N, E) f32
            mu = jnp.mean(x, axis=-1, keepdims=True)
            xc = x - mu
            var = jnp.mean(xc * xc, axis=-1, keepdims=True)
            return xc * jax.lax.rsqrt(var + eps) * g + b

        def ffn(x, w1, b1, w2, b2):                    # x: (N, E) f32
            h = jnp.dot(x.astype(jnp.bfloat16), w1,
                        preferred_element_type=jnp.float32) + b1
            h = jnp.maximum(h, 0.0)                    # ReLU (PyTorch default)
            return jnp.dot(h.astype(jnp.bfloat16), w2,
                           preferred_element_type=jnp.float32) + b2

        def mha(q_in, kv_in, p, B, Sq, Sk):
            # q_in: (B*Sq, E) f32, kv_in: (B*Sk, E) f32
            E = q_in.shape[-1]
            Dh = E // num_heads
            scale = 1.0 / math.sqrt(Dh)
            qb = q_in.astype(jnp.bfloat16)
            kb = kv_in.astype(jnp.bfloat16)

            o_acc = None
            for h in range(num_heads):                 # unrolled (tiny H)
                # per-head weights are a free leading-axis index (no lane slicing)
                qh = jnp.dot(qb, p["q_w"][h],
                             preferred_element_type=jnp.float32) + p["q_b"][h]
                kh = jnp.dot(kb, p["k_w"][h],
                             preferred_element_type=jnp.float32) + p["k_b"][h]
                vh = jnp.dot(kb, p["v_w"][h],
                             preferred_element_type=jnp.float32) + p["v_b"][h]

                q3 = (qh * scale).astype(jnp.bfloat16).reshape(B, Sq, Dh)
                k3 = kh.astype(jnp.bfloat16).reshape(B, Sk, Dh)
                v3 = vh.astype(jnp.bfloat16).reshape(B, Sk, Dh)

                s = jnp.einsum("bqd,bkd->bqk", q3, k3,
                               preferred_element_type=jnp.float32)
                s = s - jnp.max(s, axis=-1, keepdims=True)
                e = jnp.exp(s)
                pr = e / jnp.sum(e, axis=-1, keepdims=True)   # exact divide (f32)
                oh = jnp.einsum("bqk,bkd->bqd", pr.astype(jnp.bfloat16), v3,
                                preferred_element_type=jnp.float32)

                # sum_h o_h @ W_out[h]  ==  concat(heads) @ W_out
                contrib = jnp.dot(oh.reshape(B * Sq, Dh).astype(jnp.bfloat16),
                                  p["out_w"][h],
                                  preferred_element_type=jnp.float32)
                o_acc = contrib if o_acc is None else o_acc + contrib
            return o_acc + p["out_b"]

        # ------------------------------ body -------------------------------
        x = x_ref[...]                                 # (B, S, F_pad) f32
        B, S, Fp = x.shape
        x2d = x.reshape(B * S, Fp).astype(jnp.bfloat16)

        h = jnp.dot(x2d, emb_w_ref[...],
                    preferred_element_type=jnp.float32) + emb_b_ref[...]  # (B*S, E)

        # encoder stack (post-norm, PyTorch defaults)
        n_enc = enc["q_w"].shape[0]
        mem = h
        for i in range(n_enc):
            p = {f: enc[f][i] for f in ATTN_FIELDS}
            a = mha(mem, mem, p, B, S, S)
            mem = layernorm(mem + a, enc["ln1_g"][i], enc["ln1_b"][i])
            f = ffn(mem, enc["ff1_w"][i], enc["ff1_b"][i],
                    enc["ff2_w"][i], enc["ff2_b"][i])
            mem = layernorm(mem + f, enc["ln2_g"][i], enc["ln2_b"][i])

        # decoder stack (tgt = embedded x, memory = encoder output; no masks)
        n_dec = dec["sa_q_w"].shape[0]
        y = h
        for i in range(n_dec):
            p_sa = {f: dec["sa_" + f][i] for f in ATTN_FIELDS}
            a = mha(y, y, p_sa, B, S, S)
            y = layernorm(y + a, dec["ln1_g"][i], dec["ln1_b"][i])
            p_ca = {f: dec["ca_" + f][i] for f in ATTN_FIELDS}
            a = mha(y, mem, p_ca, B, S, S)
            y = layernorm(y + a, dec["ln2_g"][i], dec["ln2_b"][i])
            f = ffn(y, dec["ff1_w"][i], dec["ff1_b"][i],
                    dec["ff2_w"][i], dec["ff2_b"][i])
            y = layernorm(y + f, dec["ln3_g"][i], dec["ln3_b"][i])

        # head: mean over seq commutes with the final Linear -> pool first
        E = y.shape[-1]
        pooled = jnp.mean(y.reshape(B, S, E), axis=1)            # (B, E) f32
        out_ref[...] = jnp.dot(pooled.astype(jnp.bfloat16), fc_w_ref[...],
                               preferred_element_type=jnp.float32) + fc_b_ref[...]

    return kernel


# ------------------------------ forward wrapper -----------------------------

def transformer_forward(x, params, num_heads):
    """x: (B, S, n_features) -> (B, 24). Single fused pallas_call."""
    B, S, F = x.shape
    f_pad = params["emb_w"].shape[0]
    if F != f_pad:                                   # zero-pad features 4 -> 8
        x = jnp.pad(x, ((0, 0), (0, 0), (0, f_pad - F)))

    flat_inputs = [x, params["emb_w"], params["emb_b"]]
    flat_inputs += [params["enc"][k] for k in ENC_FIELDS]
    flat_inputs += [params["dec"][k] for k in DEC_FIELDS]
    flat_inputs += [params["fc_w"], params["fc_b"]]

    E = params["emb_w"].shape[1]
    out_pad = params["fc_w"].shape[1]
    n_enc = params["enc"]["q_w"].shape[0]
    n_dec = params["dec"]["sa_q_w"].shape[0]
    enc_ff = params["enc"]["ff1_w"].shape[-1]
    dec_ff = params["dec"]["ff1_w"].shape[-1]

    # advisory cost estimate so XLA schedules sensibly around the custom call
    bs = B * S
    attn_flops = 8 * bs * E * E + 4 * B * S * S * E
    flops = (2 * bs * f_pad * E
             + n_enc * (attn_flops + 4 * bs * E * enc_ff)
             + n_dec * (2 * attn_flops + 4 * bs * E * dec_ff)
             + 2 * B * E * out_pad)
    transcendentals = (n_enc + 2 * n_dec) * B * num_heads * S * S
    bytes_accessed = (sum(int(a.size) * a.dtype.itemsize for a in flat_inputs)
                      + B * out_pad * 4)

    kern = make_fused_kernel(num_heads)
    vmem_spec = pl.BlockSpec(memory_space=pltpu.MemorySpace.VMEM)
    out_padded = pl.pallas_call(
        kern,
        out_shape=jax.ShapeDtypeStruct((B, out_pad), jnp.float32),
        in_specs=[vmem_spec] * len(flat_inputs),
        out_specs=vmem_spec,
        compiler_params=pltpu.CompilerParams(vmem_limit_bytes=32 * 1024 * 1024),
        cost_estimate=pl.CostEstimate(flops=int(flops),
                                      transcendentals=int(transcendentals),
                                      bytes_accessed=int(bytes_accessed)),
    )(*flat_inputs)
    return out_padded[:, :OUT_DIM]                   # free wrapper-side slice


# ------------------------------ parameter init ------------------------------
# Matmul weights stored pre-transposed (in_dim, out_dim) in bf16; biases (1, N)
# f32; per-head attention weights stacked on a LEADING head axis; per-layer
# weights stacked on a leading layer axis.

def _w(key, shape, scale=0.02):
    return (scale * jax.random.normal(key, shape, jnp.float32)).astype(jnp.bfloat16)


def _b(key, shape, scale=0.02):
    return scale * jax.random.normal(key, shape, dtype=jnp.float32)


def _ln(e):
    return jnp.ones((1, e), jnp.float32), jnp.zeros((1, e), jnp.float32)


def _init_attn(key, e, nh):
    dh = e // nh
    ks = jax.random.split(key, 8)
    return {
        "q_w": _w(ks[0], (nh, e, dh)), "q_b": _b(ks[1], (nh, 1, dh)),
        "k_w": _w(ks[2], (nh, e, dh)), "k_b": _b(ks[3], (nh, 1, dh)),
        "v_w": _w(ks[4], (nh, e, dh)), "v_b": _b(ks[5], (nh, 1, dh)),
        "out_w": _w(ks[6], (nh, dh, e)), "out_b": _b(ks[7], (1, e)),
    }


def _init_enc_layer(key, e, ff, nh):
    ka, k1, k2, k3, k4 = jax.random.split(key, 5)
    d = _init_attn(ka, e, nh)
    g1, b1 = _ln(e)
    g2, b2 = _ln(e)
    d.update({"ln1_g": g1, "ln1_b": b1,
              "ff1_w": _w(k1, (e, ff)), "ff1_b": _b(k2, (1, ff)),
              "ff2_w": _w(k3, (ff, e)), "ff2_b": _b(k4, (1, e)),
              "ln2_g": g2, "ln2_b": b2})
    return d


def _init_dec_layer(key, e, ff, nh):
    ka, kb, k1, k2, k3, k4 = jax.random.split(key, 6)
    d = {"sa_" + k: v for k, v in _init_attn(ka, e, nh).items()}
    d.update({"ca_" + k: v for k, v in _init_attn(kb, e, nh).items()})
    g1, b1 = _ln(e)
    g2, b2 = _ln(e)
    g3, b3 = _ln(e)
    d.update({"ln1_g": g1, "ln1_b": b1, "ln2_g": g2, "ln2_b": b2,
              "ff1_w": _w(k1, (e, ff)), "ff1_b": _b(k2, (1, ff)),
              "ff2_w": _w(k3, (ff, e)), "ff2_b": _b(k4, (1, e)),
              "ln3_g": g3, "ln3_b": b3})
    return d


def init_params(key, n_features, hidden_dim, n_enc, n_dec, enc_dim, dec_dim, num_heads):
    keys = jax.random.split(key, 4 + n_enc + n_dec)

    f_pad = max(8, -(-n_features // 8) * 8)          # sublane-multiple feature dim
    emb_w = jnp.pad(_w(keys[0], (n_features, hidden_dim)),
                    ((0, f_pad - n_features), (0, 0)))
    emb_b = _b(keys[1], (1, hidden_dim))

    fc_w = jnp.pad(_w(keys[2], (hidden_dim, OUT_DIM)),
                   ((0, 0), (0, OUT_PAD - OUT_DIM)))
    fc_b = jnp.pad(_b(keys[3], (1, OUT_DIM)), ((0, 0), (0, OUT_PAD - OUT_DIM)))

    enc_layers = [_init_enc_layer(keys[4 + i], hidden_dim, enc_dim, num_heads)
                  for i in range(n_enc)]
    dec_layers = [_init_dec_layer(keys[4 + n_enc + i], hidden_dim, dec_dim, num_heads)
                  for i in range(n_dec)]
    enc = {name: jnp.stack([l[name] for l in enc_layers]) for name in ENC_FIELDS}
    dec = {name: jnp.stack([l[name] for l in dec_layers]) for name in DEC_FIELDS}

    return {"emb_w": emb_w, "emb_b": emb_b, "fc_w": fc_w, "fc_b": fc_b,
            "enc": enc, "dec": dec}


# ----------------------------------- main ------------------------------------

if __name__ == "__main__":
    B, S, N_FEAT = 2, 8, 4
    HIDDEN = 32
    N_HEADS = 2
    ENC_DIM = 64
    DEC_DIM = 64
    N_ENC_LAYERS = 2
    N_DEC_LAYERS = 2
    assert HIDDEN % N_HEADS == 0

    key = jax.random.PRNGKey(0)
    key, xk = jax.random.split(key)
    x = jax.random.normal(xk, (B, S, N_FEAT), dtype=jnp.float32)
    params = init_params(key, N_FEAT, HIDDEN, N_ENC_LAYERS, N_DEC_LAYERS,
                         ENC_DIM, DEC_DIM, N_HEADS)

    fwd = jax.jit(functools.partial(transformer_forward, num_heads=N_HEADS))
    out = jax.block_until_ready(fwd(x, params))
    assert out.shape == (B, OUT_DIM), out.shape
    assert bool(jnp.all(jnp.isfinite(out)))
    # TODO(synk): dropout is identity (eval-mode); train-mode dropout masks not implemented.
    print("KERNEL_OK")
</pallas_src>

<mosaic_0001>
module attributes {stable_mosaic.version = 11 : i64} {
  func.func @kernel(%arg0: memref<2x8x8xf32, #tpu.memory_space<vmem>>, %arg1: memref<8x32xbf16, #tpu.memory_space<vmem>>, %arg2: memref<1x32xf32, #tpu.memory_space<vmem>>, %arg3: memref<2x2x32x16xbf16, #tpu.memory_space<vmem>>, %arg4: memref<2x2x1x16xf32, #tpu.memory_space<vmem>>, %arg5: memref<2x2x32x16xbf16, #tpu.memory_space<vmem>>, %arg6: memref<2x2x1x16xf32, #tpu.memory_space<vmem>>, %arg7: memref<2x2x32x16xbf16, #tpu.memory_space<vmem>>, %arg8: memref<2x2x1x16xf32, #tpu.memory_space<vmem>>, %arg9: memref<2x2x16x32xbf16, #tpu.memory_space<vmem>>, %arg10: memref<2x1x32xf32, #tpu.memory_space<vmem>>, %arg11: memref<2x1x32xf32, #tpu.memory_space<vmem>>, %arg12: memref<2x1x32xf32, #tpu.memory_space<vmem>>, %arg13: memref<2x32x64xbf16, #tpu.memory_space<vmem>>, %arg14: memref<2x1x64xf32, #tpu.memory_space<vmem>>, %arg15: memref<2x64x32xbf16, #tpu.memory_space<vmem>>, %arg16: memref<2x1x32xf32, #tpu.memory_space<vmem>>, %arg17: memref<2x1x32xf32, #tpu.memory_space<vmem>>, %arg18: memref<2x1x32xf32, #tpu.memory_space<vmem>>, %arg19: memref<2x2x32x16xbf16, #tpu.memory_space<vmem>>, %arg20: memref<2x2x1x16xf32, #tpu.memory_space<vmem>>, %arg21: memref<2x2x32x16xbf16, #tpu.memory_space<vmem>>, %arg22: memref<2x2x1x16xf32, #tpu.memory_space<vmem>>, %arg23: memref<2x2x32x16xbf16, #tpu.memory_space<vmem>>, %arg24: memref<2x2x1x16xf32, #tpu.memory_space<vmem>>, %arg25: memref<2x2x16x32xbf16, #tpu.memory_space<vmem>>, %arg26: memref<2x1x32xf32, #tpu.memory_space<vmem>>, %arg27: memref<2x1x32xf32, #tpu.memory_space<vmem>>, %arg28: memref<2x1x32xf32, #tpu.memory_space<vmem>>, %arg29: memref<2x2x32x16xbf16, #tpu.memory_space<vmem>>, %arg30: memref<2x2x1x16xf32, #tpu.memory_space<vmem>>, %arg31: memref<2x2x32x16xbf16, #tpu.memory_space<vmem>>, %arg32: memref<2x2x1x16xf32, #tpu.memory_space<vmem>>, %arg33: memref<2x2x32x16xbf16, #tpu.memory_space<vmem>>, %arg34: memref<2x2x1x16xf32, #tpu.memory_space<vmem>>, %arg35: memref<2x2x16x32xbf16, #tpu.memory_space<vmem>>, %arg36: memref<2x1x32xf32, #tpu.memory_space<vmem>>, %arg37: memref<2x1x32xf32, #tpu.memory_space<vmem>>, %arg38: memref<2x1x32xf32, #tpu.memory_space<vmem>>, %arg39: memref<2x32x64xbf16, #tpu.memory_space<vmem>>, %arg40: memref<2x1x64xf32, #tpu.memory_space<vmem>>, %arg41: memref<2x64x32xbf16, #tpu.memory_space<vmem>>, %arg42: memref<2x1x32xf32, #tpu.memory_space<vmem>>, %arg43: memref<2x1x32xf32, #tpu.memory_space<vmem>>, %arg44: memref<2x1x32xf32, #tpu.memory_space<vmem>>, %arg45: memref<32x128xbf16, #tpu.memory_space<vmem>>, %arg46: memref<1x128xf32, #tpu.memory_space<vmem>>, %arg47: memref<2x128xf32, #tpu.memory_space<vmem>>) attributes {dimension_semantics = [], scalar_prefetch = 0 : i64, scratch_operands = 0 : i64, tpu.core_type = #tpu.core_type<tc>} {
    %c0 = arith.constant 0 : index
    %c0_0 = arith.constant 0 : index
    %c0_1 = arith.constant 0 : index
    %0 = vector.load %arg0[%c0, %c0_0, %c0_1] : memref<2x8x8xf32, #tpu.memory_space<vmem>>, vector<2x8x8xf32>
    %1 = vector.shape_cast %0 : vector<2x8x8xf32> to vector<16x8xf32>
    %2 = arith.truncf %1 : vector<16x8xf32> to vector<16x8xbf16>
    %c0_2 = arith.constant 0 : index
    %c0_3 = arith.constant 0 : index
    %3 = vector.load %arg1[%c0_2, %c0_3] : memref<8x32xbf16, #tpu.memory_space<vmem>>, vector<8x32xbf16>
    %cst = arith.constant dense<0.000000e+00> : vector<16x32xf32>
    %4 = tpu.matmul %2, %3, %cst {dimension_numbers = #tpu.dot_dimension_numbers<[1], [0], [0], [1], [0, 0, 1, 1], [], []>} : vector<16x8xbf16>, vector<8x32xbf16>, vector<16x32xf32> -> vector<16x32xf32>
    %c0_4 = arith.constant 0 : index
    %c0_5 = arith.constant 0 : index
    %5 = vector.load %arg2[%c0_4, %c0_5] : memref<1x32xf32, #tpu.memory_space<vmem>>, vector<1x32xf32>
    %6 = vector.broadcast %5 : vector<1x32xf32> to vector<16x32xf32>
    %7 = arith.addf %4, %6 : vector<16x32xf32>
    %c0_6 = arith.constant 0 : index
    %c0_7 = arith.constant 0 : index
    %c0_8 = arith.constant 0 : index
    %c0_9 = arith.constant 0 : index
    %8 = vector.load %arg3[%c0_6, %c0_7, %c0_8, %c0_9] : memref<2x2x32x16xbf16, #tpu.memory_space<vmem>>, vector<1x2x32x16xbf16>
    %9 = vector.shape_cast %8 : vector<1x2x32x16xbf16> to vector<2x32x16xbf16>
    %c0_10 = arith.constant 0 : index
    %c0_11 = arith.constant 0 : index
    %c0_12 = arith.constant 0 : index
    %c0_13 = arith.constant 0 : index
    %10 = vector.load %arg4[%c0_10, %c0_11, %c0_12, %c0_13] : memref<2x2x1x16xf32, #tpu.memory_space<vmem>>, vector<1x2x1x16xf32>
    %11 = vector.shape_cast %10 : vector<1x2x1x16xf32> to vector<2x1x16xf32>
    %c0_14 = arith.constant 0 : index
    %c0_15 = arith.constant 0 : index
    %c0_16 = arith.constant 0 : index
    %c0_17 = arith.constant 0 : index
    %12 = vector.load %arg5[%c0_14, %c0_15, %c0_16, %c0_17] : memref<2x2x32x16xbf16, #tpu.memory_space<vmem>>, vector<1x2x32x16xbf16>
    %13 = vector.shape_cast %12 : vector<1x2x32x16xbf16> to vector<2x32x16xbf16>
    %c0_18 = arith.constant 0 : index
    %c0_19 = arith.constant 0 : index
    %c0_20 = arith.constant 0 : index
    %c0_21 = arith.constant 0 : index
    %14 = vector.load %arg6[%c0_18, %c0_19, %c0_20, %c0_21] : memref<2x2x1x16xf32, #tpu.memory_space<vmem>>, vector<1x2x1x16xf32>
    %15 = vector.shape_cast %14 : vector<1x2x1x16xf32> to vector<2x1x16xf32>
    %c0_22 = arith.constant 0 : index
    %c0_23 = arith.constant 0 : index
    %c0_24 = arith.constant 0 : index
    %c0_25 = arith.constant 0 : index
    %16 = vector.load %arg7[%c0_22, %c0_23, %c0_24, %c0_25] : memref<2x2x32x16xbf16, #tpu.memory_space<vmem>>, vector<1x2x32x16xbf16>
    %17 = vector.shape_cast %16 : vector<1x2x32x16xbf16> to vector<2x32x16xbf16>
    %c0_26 = arith.constant 0 : index
    %c0_27 = arith.constant 0 : index
    %c0_28 = arith.constant 0 : index
    %c0_29 = arith.constant 0 : index
    %18 = vector.load %arg8[%c0_26, %c0_27, %c0_28, %c0_29] : memref<2x2x1x16xf32, #tpu.memory_space<vmem>>, vector<1x2x1x16xf32>
    %19 = vector.shape_cast %18 : vector<1x2x1x16xf32> to vector<2x1x16xf32>
    %c0_30 = arith.constant 0 : index
    %c0_31 = arith.constant 0 : index
    %c0_32 = arith.constant 0 : index
    %c0_33 = arith.constant 0 : index
    %20 = vector.load %arg9[%c0_30, %c0_31, %c0_32, %c0_33] : memref<2x2x16x32xbf16, #tpu.memory_space<vmem>>, vector<1x2x16x32xbf16>
    %21 = vector.shape_cast %20 : vector<1x2x16x32xbf16> to vector<2x16x32xbf16>
    %c0_34 = arith.constant 0 : index
    %c0_35 = arith.constant 0 : index
    %c0_36 = arith.constant 0 : index
    %22 = vector.load %arg10[%c0_34, %c0_35, %c0_36] : memref<2x1x32xf32, #tpu.memory_space<vmem>>, vector<1x1x32xf32>
    %23 = vector.shape_cast %22 : vector<1x1x32xf32> to vector<1x32xf32>
    %24 = arith.truncf %7 : vector<16x32xf32> to vector<16x32xbf16>
    %25 = arith.truncf %7 : vector<16x32xf32> to vector<16x32xbf16>
    %26 = vector.extract_strided_slice %9 {offsets = [0, 0, 0], sizes = [1, 32, 16], strides = [1, 1, 1]} : vector<2x32x16xbf16> to vector<1x32x16xbf16>
    %27 = vector.shape_cast %26 : vector<1x32x16xbf16> to vector<32x16xbf16>
    %cst_37 = arith.constant dense<0.000000e+00> : vector<16x16xf32>
    %28 = tpu.matmul %24, %27, %cst_37 {dimension_numbers = #tpu.dot_dimension_numbers<[1], [0], [0], [1], [0, 0, 1, 1], [], []>} : vector<16x32xbf16>, vector<32x16xbf16>, vector<16x16xf32> -> vector<16x16xf32>
    %29 = vector.extract_strided_slice %11 {offsets = [0, 0, 0], sizes = [1, 1, 16], strides = [1, 1, 1]} : vector<2x1x16xf32> to vector<1x1x16xf32>
    %30 = vector.shape_cast %29 : vector<1x1x16xf32> to vector<1x16xf32>
    %31 = vector.broadcast %30 : vector<1x16xf32> to vector<16x16xf32>
    %32 = arith.addf %28, %31 : vector<16x16xf32>
    %33 = vector.extract_strided_slice %13 {offsets = [0, 0, 0], sizes = [1, 32, 16], strides = [1, 1, 1]} : vector<2x32x16xbf16> to vector<1x32x16xbf16>
    %34 = vector.shape_cast %33 : vector<1x32x16xbf16> to vector<32x16xbf16>
    %cst_38 = arith.constant dense<0.000000e+00> : vector<16x16xf32>
    %35 = tpu.matmul %25, %34, %cst_38 {dimension_numbers = #tpu.dot_dimension_numbers<[1], [0], [0], [1], [0, 0, 1, 1], [], []>} : vector<16x32xbf16>, vector<32x16xbf16>, vector<16x16xf32> -> vector<16x16xf32>
    %36 = vector.extract_strided_slice %15 {offsets = [0, 0, 0], sizes = [1, 1, 16], strides = [1, 1, 1]} : vector<2x1x16xf32> to vector<1x1x16xf32>
    %37 = vector.shape_cast %36 : vector<1x1x16xf32> to vector<1x16xf32>
    %38 = vector.broadcast %37 : vector<1x16xf32> to vector<16x16xf32>
    %39 = arith.addf %35, %38 : vector<16x16xf32>
    %40 = vector.extract_strided_slice %17 {offsets = [0, 0, 0], sizes = [1, 32, 16], strides = [1, 1, 1]} : vector<2x32x16xbf16> to vector<1x32x16xbf16>
    %41 = vector.shape_cast %40 : vector<1x32x16xbf16> to vector<32x16xbf16>
    %cst_39 = arith.constant dense<0.000000e+00> : vector<16x16xf32>
    %42 = tpu.matmul %25, %41, %cst_39 {dimension_numbers = #tpu.dot_dimension_numbers<[1], [0], [0], [1], [0, 0, 1, 1], [], []>} : vector<16x32xbf16>, vector<32x16xbf16>, vector<16x16xf32> -> vector<16x16xf32>
    %43 = vector.extract_strided_slice %19 {offsets = [0, 0, 0], sizes = [1, 1, 16], strides = [1, 1, 1]} : vector<2x1x16xf32> to vector<1x1x16xf32>
    %44 = vector.shape_cast %43 : vector<1x1x16xf32> to vector<1x16xf32>
    %45 = vector.broadcast %44 : vector<1x16xf32> to vector<16x16xf32>
    %46 = arith.addf %42, %45 : vector<16x16xf32>
    %cst_40 = arith.constant 2.500000e-01 : f32
    %47 = vector.broadcast %cst_40 : f32 to vector<16x16xf32>
    %48 = arith.mulf %32, %47 : vector<16x16xf32>
    %49 = arith.truncf %48 : vector<16x16xf32> to vector<16x16xbf16>
    %50 = vector.shape_cast %49 : vector<16x16xbf16> to vector<2x8x16xbf16>
    %51 = arith.truncf %39 : vector<16x16xf32> to vector<16x16xbf16>
    %52 = vector.shape_cast %51 : vector<16x16xbf16> to vector<2x8x16xbf16>
    %53 = arith.truncf %46 : vector<16x16xf32> to vector<16x16xbf16>
    %54 = vector.shape_cast %53 : vector<16x16xbf16> to vector<2x8x16xbf16>
    "tpu.trace_start"() <{level = 10 : i32, message = "bqd,bkd->bqk"}> : () -> ()
    %cst_41 = arith.constant dense<0.000000e+00> : vector<2x8x8xf32>
    %55 = tpu.matmul %50, %52, %cst_41 {dimension_numbers = #tpu.dot_dimension_numbers<[2], [2], [1], [1], [0, 0, 0, 1, 1, 1], [0], [0]>} : vector<2x8x16xbf16>, vector<2x8x16xbf16>, vector<2x8x8xf32> -> vector<2x8x8xf32>
    "tpu.trace_stop"() : () -> ()
    %cst_42 = arith.constant dense<0xFF800000> : vector<2x8xf32>
    %56 = vector.multi_reduction <maximumf>, %55, %cst_42 [2] : vector<2x8x8xf32> to vector<2x8xf32>
    %57 = vector.shape_cast %56 : vector<2x8xf32> to vector<2x8x1xf32>
    %58 = vector.broadcast %57 : vector<2x8x1xf32> to vector<2x8x8xf32>
    %59 = arith.subf %55, %58 : vector<2x8x8xf32>
    %60 = math.exp %59 : vector<2x8x8xf32>
    %cst_43 = arith.constant dense<0.000000e+00> : vector<2x8xf32>
    %61 = vector.multi_reduction <add>, %60, %cst_43 [2] : vector<2x8x8xf32> to vector<2x8xf32>
    %62 = vector.shape_cast %61 : vector<2x8xf32> to vector<2x8x1xf32>
    %63 = vector.broadcast %62 : vector<2x8x1xf32> to vector<2x8x8xf32>
    %64 = arith.divf %60, %63 : vector<2x8x8xf32>
    %65 = arith.truncf %64 : vector<2x8x8xf32> to vector<2x8x8xbf16>
    "tpu.trace_start"() <{level = 10 : i32, message = "bqk,bkd->bqd"}> : () -> ()
    %cst_44 = arith.constant dense<0.000000e+00> : vector<2x8x16xf32>
    %66 = tpu.matmul %65, %54, %cst_44 {dimension_numbers = #tpu.dot_dimension_numbers<[2], [1], [1], [2], [0, 0, 0, 1, 1, 2], [0], [0]>} : vector<2x8x8xbf16>, vector<2x8x16xbf16>, vector<2x8x16xf32> -> vector<2x8x16xf32>
    "tpu.trace_stop"() : () -> ()
    %67 = vector.shape_cast %66 : vector<2x8x16xf32> to vector<16x16xf32>
    %68 = arith.truncf %67 : vector<16x16xf32> to vector<16x16xbf16>
    %69 = vector.extract_strided_slice %21 {offsets = [0, 0, 0], sizes = [1, 16, 32], strides = [1, 1, 1]} : vector<2x16x32xbf16> to vector<1x16x32xbf16>
    %70 = vector.shape_cast %69 : vector<1x16x32xbf16> to vector<16x32xbf16>
    %cst_45 = arith.constant dense<0.000000e+00> : vector<16x32xf32>
    %71 = tpu.matmul %68, %70, %cst_45 {dimension_numbers = #tpu.dot_dimension_numbers<[1], [0], [0], [1], [0, 0, 1, 1], [], []>} : vector<16x16xbf16>, vector<16x32xbf16>, vector<16x32xf32> -> vector<16x32xf32>
    %72 = vector.extract_strided_slice %9 {offsets = [1, 0, 0], sizes = [1, 32, 16], strides = [1, 1, 1]} : vector<2x32x16xbf16> to vector<1x32x16xbf16>
    %73 = vector.shape_cast %72 : vector<1x32x16xbf16> to vector<32x16xbf16>
    %cst_46 = arith.constant dense<0.000000e+00> : vector<16x16xf32>
    %74 = tpu.matmul %24, %73, %cst_46 {dimension_numbers = #tpu.dot_dimension_numbers<[1], [0], [0], [1], [0, 0, 1, 1], [], []>} : vector<16x32xbf16>, vector<32x16xbf16>, vector<16x16xf32> -> vector<16x16xf32>
    %75 = vector.extract_strided_slice %11 {offsets = [1, 0, 0], sizes = [1, 1, 16], strides = [1, 1, 1]} : vector<2x1x16xf32> to vector<1x1x16xf32>
    %76 = vector.shape_cast %75 : vector<1x1x16xf32> to vector<1x16xf32>
    %77 = vector.broadcast %76 : vector<1x16xf32> to vector<16x16xf32>
    %78 = arith.addf %74, %77 : vector<16x16xf32>
    %79 = vector.extract_strided_slice %13 {offsets = [1, 0, 0], sizes = [1, 32, 16], strides = [1, 1, 1]} : vector<2x32x16xbf16> to vector<1x32x16xbf16>
    %80 = vector.shape_cast %79 : vector<1x32x16xbf16> to vector<32x16xbf16>
    %cst_47 = arith.constant dense<0.000000e+00> : vector<16x16xf32>
    %81 = tpu.matmul %25, %80, %cst_47 {dimension_numbers = #tpu.dot_dimension_numbers<[1], [0], [0], [1], [0, 0, 1, 1], [], []>} : vector<16x32xbf16>, vector<32x16xbf16>, vector<16x16xf32> -> vector<16x16xf32>
    %82 = vector.extract_strided_slice %15 {offsets = [1, 0, 0], sizes = [1, 1, 16], strides = [1, 1, 1]} : vector<2x1x16xf32> to vector<1x1x16xf32>
    %83 = vector.shape_cast %82 : vector<1x1x16xf32> to vector<1x16xf32>
    %84 = vector.broadcast %83 : vector<1x16xf32> to vector<16x16xf32>
    %85 = arith.addf %81, %84 : vector<16x16xf32>
    %86 = vector.extract_strided_slice %17 {offsets = [1, 0, 0], sizes = [1, 32, 16], strides = [1, 1, 1]} : vector<2x32x16xbf16> to vector<1x32x16xbf16>
    %87 = vector.shape_cast %86 : vector<1x32x16xbf16> to vector<32x16xbf16>
    %cst_48 = arith.constant dense<0.000000e+00> : vector<16x16xf32>
    %88 = tpu.matmul %25, %87, %cst_48 {dimension_numbers = #tpu.dot_dimension_numbers<[1], [0], [0], [1], [0, 0, 1, 1], [], []>} : vector<16x32xbf16>, vector<32x16xbf16>, vector<16x16xf32> -> vector<16x16xf32>
    %89 = vector.extract_strided_slice %19 {offsets = [1, 0, 0], sizes = [1, 1, 16], strides = [1, 1, 1]} : vector<2x1x16xf32> to vector<1x1x16xf32>
    %90 = vector.shape_cast %89 : vector<1x1x16xf32> to vector<1x16xf32>
    %91 = vector.broadcast %90 : vector<1x16xf32> to vector<16x16xf32>
    %92 = arith.addf %88, %91 : vector<16x16xf32>
    %cst_49 = arith.constant 2.500000e-01 : f32
    %93 = vector.broadcast %cst_49 : f32 to vector<16x16xf32>
    %94 = arith.mulf %78, %93 : vector<16x16xf32>
    %95 = arith.truncf %94 : vector<16x16xf32> to vector<16x16xbf16>
    %96 = vector.shape_cast %95 : vector<16x16xbf16> to vector<2x8x16xbf16>
    %97 = arith.truncf %85 : vector<16x16xf32> to vector<16x16xbf16>
    %98 = vector.shape_cast %97 : vector<16x16xbf16> to vector<2x8x16xbf16>
    %99 = arith.truncf %92 : vector<16x16xf32> to vector<16x16xbf16>
    %100 = vector.shape_cast %99 : vector<16x16xbf16> to vector<2x8x16xbf16>
    "tpu.trace_start"() <{level = 10 : i32, message = "bqd,bkd->bqk"}> : () -> ()
    %cst_50 = arith.constant dense<0.000000e+00> : vector<2x8x8xf32>
    %101 = tpu.matmul %96, %98, %cst_50 {dimension_numbers = #tpu.dot_dimension_numbers<[2], [2], [1], [1], [0, 0, 0, 1, 1, 1], [0], [0]>} : vector<2x8x16xbf16>, vector<2x8x16xbf16>, vector<2x8x8xf32> -> vector<2x8x8xf32>
    "tpu.trace_stop"() : () -> ()
    %cst_51 = arith.constant dense<0xFF800000> : vector<2x8xf32>
    %102 = vector.multi_reduction <maximumf>, %101, %cst_51 [2] : vector<2x8x8xf32> to vector<2x8xf32>
    %103 = vector.shape_cast %102 : vector<2x8xf32> to vector<2x8x1xf32>
    %104 = vector.broadcast %103 : vector<2x8x1xf32> to vector<2x8x8xf32>
    %105 = arith.subf %101, %104 : vector<2x8x8xf32>
    %106 = math.exp %105 : vector<2x8x8xf32>
    %cst_52 = arith.constant dense<0.000000e+00> : vector<2x8xf32>
    %107 = vector.multi_reduction <add>, %106, %cst_52 [2] : vector<2x8x8xf32> to vector<2x8xf32>
    %108 = vector.shape_cast %107 : vector<2x8xf32> to vector<2x8x1xf32>
    %109 = vector.broadcast %108 : vector<2x8x1xf32> to vector<2x8x8xf32>
    %110 = arith.divf %106, %109 : vector<2x8x8xf32>
    %111 = arith.truncf %110 : vector<2x8x8xf32> to vector<2x8x8xbf16>
    "tpu.trace_start"() <{level = 10 : i32, message = "bqk,bkd->bqd"}> : () -> ()
    %cst_53 = arith.constant dense<0.000000e+00> : vector<2x8x16xf32>
    %112 = tpu.matmul %111, %100, %cst_53 {dimension_numbers = #tpu.dot_dimension_numbers<[2], [1], [1], [2], [0, 0, 0, 1, 1, 2], [0], [0]>} : vector<2x8x8xbf16>, vector<2x8x16xbf16>, vector<2x8x16xf32> -> vector<2x8x16xf32>
    "tpu.trace_stop"() : () -> ()
    %113 = vector.shape_cast %112 : vector<2x8x16xf32> to vector<16x16xf32>
    %114 = arith.truncf %113 : vector<16x16xf32> to vector<16x16xbf16>
    %115 = vector.extract_strided_slice %21 {offsets = [1, 0, 0], sizes = [1, 16, 32], strides = [1, 1, 1]} : vector<2x16x32xbf16> to vector<1x16x32xbf16>
    %116 = vector.shape_cast %115 : vector<1x16x32xbf16> to vector<16x32xbf16>
    %cst_54 = arith.constant dense<0.000000e+00> : vector<16x32xf32>
    %117 = tpu.matmul %114, %116, %cst_54 {dimension_numbers = #tpu.dot_dimension_numbers<[1], [0], [0], [1], [0, 0, 1, 1], [], []>} : vector<16x16xbf16>, vector<16x32xbf16>, vector<16x32xf32> -> vector<16x32xf32>
    %118 = arith.addf %71, %117 : vector<16x32xf32>
    %119 = vector.broadcast %23 : vector<1x32xf32> to vector<16x32xf32>
    %120 = arith.addf %118, %119 : vector<16x32xf32>
    %121 = arith.addf %7, %120 : vector<16x32xf32>
    %c0_55 = arith.constant 0 : index
    %c0_56 = arith.constant 0 : index
    %c0_57 = arith.constant 0 : index
    %122 = vector.load %arg11[%c0_55, %c0_56, %c0_57] : memref<2x1x32xf32, #tpu.memory_space<vmem>>, vector<1x1x32xf32>
    %123 = vector.shape_cast %122 : vector<1x1x32xf32> to vector<1x32xf32>
    %c0_58 = arith.constant 0 : index
    %c0_59 = arith.constant 0 : index
    %c0_60 = arith.constant 0 : index
    %124 = vector.load %arg12[%c0_58, %c0_59, %c0_60] : memref<2x1x32xf32, #tpu.memory_space<vmem>>, vector<1x1x32xf32>
    %125 = vector.shape_cast %124 : vector<1x1x32xf32> to vector<1x32xf32>
    %cst_61 = arith.constant dense<0.000000e+00> : vector<16xf32>
    %126 = vector.multi_reduction <add>, %121, %cst_61 [1] : vector<16x32xf32> to vector<16xf32>
    %127 = vector.shape_cast %126 : vector<16xf32> to vector<16x1xf32>
    %cst_62 = arith.constant 3.200000e+01 : f32
    %128 = vector.broadcast %cst_62 : f32 to vector<16x1xf32>
    %129 = arith.divf %127, %128 : vector<16x1xf32>
    %130 = vector.broadcast %129 : vector<16x1xf32> to vector<16x32xf32>
    %131 = arith.subf %121, %130 : vector<16x32xf32>
    %132 = arith.mulf %131, %131 : vector<16x32xf32>
    %cst_63 = arith.constant dense<0.000000e+00> : vector<16xf32>
    %133 = vector.multi_reduction <add>, %132, %cst_63 [1] : vector<16x32xf32> to vector<16xf32>
    %134 = vector.shape_cast %133 : vector<16xf32> to vector<16x1xf32>
    %cst_64 = arith.constant 3.200000e+01 : f32
    %135 = vector.broadcast %cst_64 : f32 to vector<16x1xf32>
    %136 = arith.divf %134, %135 : vector<16x1xf32>
    %cst_65 = arith.constant 9.99999974E-6 : f32
    %137 = vector.broadcast %cst_65 : f32 to vector<16x1xf32>
    %138 = arith.addf %136, %137 : vector<16x1xf32>
    %139 = math.rsqrt %138 : vector<16x1xf32>
    %140 = vector.broadcast %139 : vector<16x1xf32> to vector<16x32xf32>
    %141 = arith.mulf %131, %140 : vector<16x32xf32>
    %142 = vector.broadcast %123 : vector<1x32xf32> to vector<16x32xf32>
    %143 = arith.mulf %141, %142 : vector<16x32xf32>
    %144 = vector.broadcast %125 : vector<1x32xf32> to vector<16x32xf32>
    %145 = arith.addf %143, %144 : vector<16x32xf32>
    %c0_66 = arith.constant 0 : index
    %c0_67 = arith.constant 0 : index
    %c0_68 = arith.constant 0 : index
    %146 = vector.load %arg13[%c0_66, %c0_67, %c0_68] : memref<2x32x64xbf16, #tpu.memory_space<vmem>>, vector<1x32x64xbf16>
    %147 = vector.shape_cast %146 : vector<1x32x64xbf16> to vector<32x64xbf16>
    %c0_69 = arith.constant 0 : index
    %c0_70 = arith.constant 0 : index
    %c0_71 = arith.constant 0 : index
    %148 = vector.load %arg14[%c0_69, %c0_70, %c0_71] : memref<2x1x64xf32, #tpu.memory_space<vmem>>, vector<1x1x64xf32>
    %149 = vector.shape_cast %148 : vector<1x1x64xf32> to vector<1x64xf32>
    %c0_72 = arith.constant 0 : index
    %c0_73 = arith.constant 0 : index
    %c0_74 = arith.constant 0 : index
    %150 = vector.load %arg15[%c0_72, %c0_73, %c0_74] : memref<2x64x32xbf16, #tpu.memory_space<vmem>>, vector<1x64x32xbf16>
    %151 = vector.shape_cast %150 : vector<1x64x32xbf16> to vector<64x32xbf16>
    %c0_75 = arith.constant 0 : index
    %c0_76 = arith.constant 0 : index
    %c0_77 = arith.constant 0 : index
    %152 = vector.load %arg16[%c0_75, %c0_76, %c0_77] : memref<2x1x32xf32, #tpu.memory_space<vmem>>, vector<1x1x32xf32>
    %153 = vector.shape_cast %152 : vector<1x1x32xf32> to vector<1x32xf32>
    %154 = arith.truncf %145 : vector<16x32xf32> to vector<16x32xbf16>
    %cst_78 = arith.constant dense<0.000000e+00> : vector<16x64xf32>
    %155 = tpu.matmul %154, %147, %cst_78 {dimension_numbers = #tpu.dot_dimension_numbers<[1], [0], [0], [1], [0, 0, 1, 1], [], []>} : vector<16x32xbf16>, vector<32x64xbf16>, vector<16x64xf32> -> vector<16x64xf32>
    %156 = vector.broadcast %149 : vector<1x64xf32> to vector<16x64xf32>
    %157 = arith.addf %155, %156 : vector<16x64xf32>
    %cst_79 = arith.constant 0.000000e+00 : f32
    %158 = vector.broadcast %cst_79 : f32 to vector<16x64xf32>
    %159 = arith.maximumf %157, %158 : vector<16x64xf32>
    %160 = arith.truncf %159 : vector<16x64xf32> to vector<16x64xbf16>
    %cst_80 = arith.constant dense<0.000000e+00> : vector<16x32xf32>
    %161 = tpu.matmul %160, %151, %cst_80 {dimension_numbers = #tpu.dot_dimension_numbers<[1], [0], [0], [1], [0, 0, 1, 1], [], []>} : vector<16x64xbf16>, vector<64x32xbf16>, vector<16x32xf32> -> vector<16x32xf32>
    %162 = vector.broadcast %153 : vector<1x32xf32> to vector<16x32xf32>
    %163 = arith.addf %161, %162 : vector<16x32xf32>
    %164 = arith.addf %145, %163 : vector<16x32xf32>
    %c0_81 = arith.constant 0 : index
    %c0_82 = arith.constant 0 : index
    %c0_83 = arith.constant 0 : index
    %165 = vector.load %arg17[%c0_81, %c0_82, %c0_83] : memref<2x1x32xf32, #tpu.memory_space<vmem>>, vector<1x1x32xf32>
    %166 = vector.shape_cast %165 : vector<1x1x32xf32> to vector<1x32xf32>
    %c0_84 = arith.constant 0 : index
    %c0_85 = arith.constant 0 : index
    %c0_86 = arith.constant 0 : index
    %167 = vector.load %arg18[%c0_84, %c0_85, %c0_86] : memref<2x1x32xf32, #tpu.memory_space<vmem>>, vector<1x1x32xf32>
    %168 = vector.shape_cast %167 : vector<1x1x32xf32> to vector<1x32xf32>
    %cst_87 = arith.constant dense<0.000000e+00> : vector<16xf32>
    %169 = vector.multi_reduction <add>, %164, %cst_87 [1] : vector<16x32xf32> to vector<16xf32>
    %170 = vector.shape_cast %169 : vector<16xf32> to vector<16x1xf32>
    %cst_88 = arith.constant 3.200000e+01 : f32
    %171 = vector.broadcast %cst_88 : f32 to vector<16x1xf32>
    %172 = arith.divf %170, %171 : vector<16x1xf32>
    %173 = vector.broadcast %172 : vector<16x1xf32> to vector<16x32xf32>
    %174 = arith.subf %164, %173 : vector<16x32xf32>
    %175 = arith.mulf %174, %174 : vector<16x32xf32>
    %cst_89 = arith.constant dense<0.000000e+00> : vector<16xf32>
    %176 = vector.multi_reduction <add>, %175, %cst_89 [1] : vector<16x32xf32> to vector<16xf32>
    %177 = vector.shape_cast %176 : vector<16xf32> to vector<16x1xf32>
    %cst_90 = arith.constant 3.200000e+01 : f32
    %178 = vector.broadcast %cst_90 : f32 to vector<16x1xf32>
    %179 = arith.divf %177, %178 : vector<16x1xf32>
    %cst_91 = arith.constant 9.99999974E-6 : f32
    %180 = vector.broadcast %cst_91 : f32 to vector<16x1xf32>
    %181 = arith.addf %179, %180 : vector<16x1xf32>
    %182 = math.rsqrt %181 : vector<16x1xf32>
    %183 = vector.broadcast %182 : vector<16x1xf32> to vector<16x32xf32>
    %184 = arith.mulf %174, %183 : vector<16x32xf32>
    %185 = vector.broadcast %166 : vector<1x32xf32> to vector<16x32xf32>
    %186 = arith.mulf %184, %185 : vector<16x32xf32>
    %187 = vector.broadcast %168 : vector<1x32xf32> to vector<16x32xf32>
    %188 = arith.addf %186, %187 : vector<16x32xf32>
    %c1 = arith.constant 1 : index
    %c0_92 = arith.constant 0 : index
    %c0_93 = arith.constant 0 : index
    %c0_94 = arith.constant 0 : index
    %189 = vector.load %arg3[%c1, %c0_92, %c0_93, %c0_94] : memref<2x2x32x16xbf16, #tpu.memory_space<vmem>>, vector<1x2x32x16xbf16>
    %190 = vector.shape_cast %189 : vector<1x2x32x16xbf16> to vector<2x32x16xbf16>
    %c1_95 = arith.constant 1 : index
    %c0_96 = arith.constant 0 : index
    %c0_97 = arith.constant 0 : index
    %c0_98 = arith.constant 0 : index
    %191 = vector.load %arg4[%c1_95, %c0_96, %c0_97, %c0_98] : memref<2x2x1x16xf32, #tpu.memory_space<vmem>>, vector<1x2x1x16xf32>
    %192 = vector.shape_cast %191 : vector<1x2x1x16xf32> to vector<2x1x16xf32>
    %c1_99 = arith.constant 1 : index
    %c0_100 = arith.constant 0 : index
    %c0_101 = arith.constant 0 : index
    %c0_102 = arith.constant 0 : index
    %193 = vector.load %arg5[%c1_99, %c0_100, %c0_101, %c0_102] : memref<2x2x32x16xbf16, #tpu.memory_space<vmem>>, vector<1x2x32x16xbf16>
    %194 = vector.shape_cast %193 : vector<1x2x32x16xbf16> to vector<2x32x16xbf16>
    %c1_103 = arith.constant 1 : index
    %c0_104 = arith.constant 0 : index
    %c0_105 = arith.constant 0 : index
    %c0_106 = arith.constant 0 : index
    %195 = vector.load %arg6[%c1_103, %c0_104, %c0_105, %c0_106] : memref<2x2x1x16xf32, #tpu.memory_space<vmem>>, vector<1x2x1x16xf32>
    %196 = vector.shape_cast %195 : vector<1x2x1x16xf32> to vector<2x1x16xf32>
    %c1_107 = arith.constant 1 : index
    %c0_108 = arith.constant 0 : index
    %c0_109 = arith.constant 0 : index
    %c0_110 = arith.constant 0 : index
    %197 = vector.load %arg7[%c1_107, %c0_108, %c0_109, %c0_110] : memref<2x2x32x16xbf16, #tpu.memory_space<vmem>>, vector<1x2x32x16xbf16>
    %198 = vector.shape_cast %197 : vector<1x2x32x16xbf16> to vector<2x32x16xbf16>
    %c1_111 = arith.constant 1 : index
    %c0_112 = arith.constant 0 : index
    %c0_113 = arith.constant 0 : index
    %c0_114 = arith.constant 0 : index
    %199 = vector.load %arg8[%c1_111, %c0_112, %c0_113, %c0_114] : memref<2x2x1x16xf32, #tpu.memory_space<vmem>>, vector<1x2x1x16xf32>
    %200 = vector.shape_cast %199 : vector<1x2x1x16xf32> to vector<2x1x16xf32>
    %c1_115 = arith.constant 1 : index
    %c0_116 = arith.constant 0 : index
    %c0_117 = arith.constant 0 : index
    %c0_118 = arith.constant 0 : index
    %201 = vector.load %arg9[%c1_115, %c0_116, %c0_117, %c0_118] : memref<2x2x16x32xbf16, #tpu.memory_space<vmem>>, vector<1x2x16x32xbf16>
    %202 = vector.shape_cast %201 : vector<1x2x16x32xbf16> to vector<2x16x32xbf16>
    %c1_119 = arith.constant 1 : index
    %c0_120 = arith.constant 0 : index
    %c0_121 = arith.constant 0 : index
    %203 = vector.load %arg10[%c1_119, %c0_120, %c0_121] : memref<2x1x32xf32, #tpu.memory_space<vmem>>, vector<1x1x32xf32>
    %204 = vector.shape_cast %203 : vector<1x1x32xf32> to vector<1x32xf32>
    %205 = arith.truncf %188 : vector<16x32xf32> to vector<16x32xbf16>
    %206 = arith.truncf %188 : vector<16x32xf32> to vector<16x32xbf16>
    %207 = vector.extract_strided_slice %190 {offsets = [0, 0, 0], sizes = [1, 32, 16], strides = [1, 1, 1]} : vector<2x32x16xbf16> to vector<1x32x16xbf16>
    %208 = vector.shape_cast %207 : vector<1x32x16xbf16> to vector<32x16xbf16>
    %cst_122 = arith.constant dense<0.000000e+00> : vector<16x16xf32>
    %209 = tpu.matmul %205, %208, %cst_122 {dimension_numbers = #tpu.dot_dimension_numbers<[1], [0], [0], [1], [0, 0, 1, 1], [], []>} : vector<16x32xbf16>, vector<32x16xbf16>, vector<16x16xf32> -> vector<16x16xf32>
    %210 = vector.extract_strided_slice %192 {offsets = [0, 0, 0], sizes = [1, 1, 16], strides = [1, 1, 1]} : vector<2x1x16xf32> to vector<1x1x16xf32>
    %211 = vector.shape_cast %210 : vector<1x1x16xf32> to vector<1x16xf32>
    %212 = vector.broadcast %211 : vector<1x16xf32> to vector<16x16xf32>
    %213 = arith.addf %209, %212 : vector<16x16xf32>
    %214 = vector.extract_strided_slice %194 {offsets = [0, 0, 0], sizes = [1, 32, 16], strides = [1, 1, 1]} : vector<2x32x16xbf16> to vector<1x32x16xbf16>
    %215 = vector.shape_cast %214 : vector<1x32x16xbf16> to vector<32x16xbf16>
    %cst_123 = arith.constant dense<0.000000e+00> : vector<16x16xf32>
    %216 = tpu.matmul %206, %215, %cst_123 {dimension_numbers = #tpu.dot_dimension_numbers<[1], [0], [0], [1], [0, 0, 1, 1], [], []>} : vector<16x32xbf16>, vector<32x16xbf16>, vector<16x16xf32> -> vector<16x16xf32>
    %217 = vector.extract_strided_slice %196 {offsets = [0, 0, 0], sizes = [1, 1, 16], strides = [1, 1, 1]} : vector<2x1x16xf32> to vector<1x1x16xf32>
    %218 = vector.shape_cast %217 : vector<1x1x16xf32> to vector<1x16xf32>
    %219 = vector.broadcast %218 : vector<1x16xf32> to vector<16x16xf32>
    %220 = arith.addf %216, %219 : vector<16x16xf32>
    %221 = vector.extract_strided_slice %198 {offsets = [0, 0, 0], sizes = [1, 32, 16], strides = [1, 1, 1]} : vector<2x32x16xbf16> to vector<1x32x16xbf16>
    %222 = vector.shape_cast %221 : vector<1x32x16xbf16> to vector<32x16xbf16>
    %cst_124 = arith.constant dense<0.000000e+00> : vector<16x16xf32>
    %223 = tpu.matmul %206, %222, %cst_124 {dimension_numbers = #tpu.dot_dimension_numbers<[1], [0], [0], [1], [0, 0, 1, 1], [], []>} : vector<16x32xbf16>, vector<32x16xbf16>, vector<16x16xf32> -> vector<16x16xf32>
    %224 = vector.extract_strided_slice %200 {offsets = [0, 0, 0], sizes = [1, 1, 16], strides = [1, 1, 1]} : vector<2x1x16xf32> to vector<1x1x16xf32>
    %225 = vector.shape_cast %224 : vector<1x1x16xf32> to vector<1x16xf32>
    %226 = vector.broadcast %225 : vector<1x16xf32> to vector<16x16xf32>
    %227 = arith.addf %223, %226 : vector<16x16xf32>
    %cst_125 = arith.constant 2.500000e-01 : f32
    %228 = vector.broadcast %cst_125 : f32 to vector<16x16xf32>
    %229 = arith.mulf %213, %228 : vector<16x16xf32>
    %230 = arith.truncf %229 : vector<16x16xf32> to vector<16x16xbf16>
    %231 = vector.shape_cast %230 : vector<16x16xbf16> to vector<2x8x16xbf16>
    %232 = arith.truncf %220 : vector<16x16xf32> to vector<16x16xbf16>
    %233 = vector.shape_cast %232 : vector<16x16xbf16> to vector<2x8x16xbf16>
    %234 = arith.truncf %227 : vector<16x16xf32> to vector<16x16xbf16>
    %235 = vector.shape_cast %234 : vector<16x16xbf16> to vector<2x8x16xbf16>
    "tpu.trace_start"() <{level = 10 : i32, message = "bqd,bkd->bqk"}> : () -> ()
    %cst_126 = arith.constant dense<0.000000e+00> : vector<2x8x8xf32>
    %236 = tpu.matmul %231, %233, %cst_126 {dimension_numbers = #tpu.dot_dimension_numbers<[2], [2], [1], [1], [0, 0, 0, 1, 1, 1], [0], [0]>} : vector<2x8x16xbf16>, vector<2x8x16xbf16>, vector<2x8x8xf32> -> vector<2x8x8xf32>
    "tpu.trace_stop"() : () -> ()
    %cst_127 = arith.constant dense<0xFF800000> : vector<2x8xf32>
    %237 = vector.multi_reduction <maximumf>, %236, %cst_127 [2] : vector<2x8x8xf32> to vector<2x8xf32>
    %238 = vector.shape_cast %237 : vector<2x8xf32> to vector<2x8x1xf32>
    %239 = vector.broadcast %238 : vector<2x8x1xf32> to vector<2x8x8xf32>
    %240 = arith.subf %236, %239 : vector<2x8x8xf32>
    %241 = math.exp %240 : vector<2x8x8xf32>
    %cst_128 = arith.constant dense<0.000000e+00> : vector<2x8xf32>
    %242 = vector.multi_reduction <add>, %241, %cst_128 [2] : vector<2x8x8xf32> to vector<2x8xf32>
    %243 = vector.shape_cast %242 : vector<2x8xf32> to vector<2x8x1xf32>
    %244 = vector.broadcast %243 : vector<2x8x1xf32> to vector<2x8x8xf32>
    %245 = arith.divf %241, %244 : vector<2x8x8xf32>
    %246 = arith.truncf %245 : vector<2x8x8xf32> to vector<2x8x8xbf16>
    "tpu.trace_start"() <{level = 10 : i32, message = "bqk,bkd->bqd"}> : () -> ()
    %cst_129 = arith.constant dense<0.000000e+00> : vector<2x8x16xf32>
    %247 = tpu.matmul %246, %235, %cst_129 {dimension_numbers = #tpu.dot_dimension_numbers<[2], [1], [1], [2], [0, 0, 0, 1, 1, 2], [0], [0]>} : vector<2x8x8xbf16>, vector<2x8x16xbf16>, vector<2x8x16xf32> -> vector<2x8x16xf32>
    "tpu.trace_stop"() : () -> ()
    %248 = vector.shape_cast %247 : vector<2x8x16xf32> to vector<16x16xf32>
    %249 = arith.truncf %248 : vector<16x16xf32> to vector<16x16xbf16>
    %250 = vector.extract_strided_slice %202 {offsets = [0, 0, 0], sizes = [1, 16, 32], strides = [1, 1, 1]} : vector<2x16x32xbf16> to vector<1x16x32xbf16>
    %251 = vector.shape_cast %250 : vector<1x16x32xbf16> to vector<16x32xbf16>
    %cst_130 = arith.constant dense<0.000000e+00> : vector<16x32xf32>
    %252 = tpu.matmul %249, %251, %cst_130 {dimension_numbers = #tpu.dot_dimension_numbers<[1], [0], [0], [1], [0, 0, 1, 1], [], []>} : vector<16x16xbf16>, vector<16x32xbf16>, vector<16x32xf32> -> vector<16x32xf32>
    %253 = vector.extract_strided_slice %190 {offsets = [1, 0, 0], sizes = [1, 32, 16], strides = [1, 1, 1]} : vector<2x32x16xbf16> to vector<1x32x16xbf16>
    %254 = vector.shape_cast %253 : vector<1x32x16xbf16> to vector<32x16xbf16>
    %cst_131 = arith.constant dense<0.000000e+00> : vector<16x16xf32>
    %255 = tpu.matmul %205, %254, %cst_131 {dimension_numbers = #tpu.dot_dimension_numbers<[1], [0], [0], [1], [0, 0, 1, 1], [], []>} : vector<16x32xbf16>, vector<32x16xbf16>, vector<16x16xf32> -> vector<16x16xf32>
    %256 = vector.extract_strided_slice %192 {offsets = [1, 0, 0], sizes = [1, 1, 16], strides = [1, 1, 1]} : vector<2x1x16xf32> to vector<1x1x16xf32>
    %257 = vector.shape_cast %256 : vector<1x1x16xf32> to vector<1x16xf32>
    %258 = vector.broadcast %257 : vector<1x16xf32> to vector<16x16xf32>
    %259 = arith.addf %255, %258 : vector<16x16xf32>
    %260 = vector.extract_strided_slice %194 {offsets = [1, 0, 0], sizes = [1, 32, 16], strides = [1, 1, 1]} : vector<2x32x16xbf16> to vector<1x32x16xbf16>
    %261 = vector.shape_cast %260 : vector<1x32x16xbf16> to vector<32x16xbf16>
    %cst_132 = arith.constant dense<0.000000e+00> : vector<16x16xf32>
    %262 = tpu.matmul %206, %261, %cst_132 {dimension_numbers = #tpu.dot_dimension_numbers<[1], [0], [0], [1], [0, 0, 1, 1], [], []>} : vector<16x32xbf16>, vector<32x16xbf16>, vector<16x16xf32> -> vector<16x16xf32>
    %263 = vector.extract_strided_slice %196 {offsets = [1, 0, 0], sizes = [1, 1, 16], strides = [1, 1, 1]} : vector<2x1x16xf32> to vector<1x1x16xf32>
    %264 = vector.shape_cast %263 : vector<1x1x16xf32> to vector<1x16xf32>
    %265 = vector.broadcast %264 : vector<1x16xf32> to vector<16x16xf32>
    %266 = arith.addf %262, %265 : vector<16x16xf32>
    %267 = vector.extract_strided_slice %198 {offsets = [1, 0, 0], sizes = [1, 32, 16], strides = [1, 1, 1]} : vector<2x32x16xbf16> to vector<1x32x16xbf16>
    %268 = vector.shape_cast %267 : vector<1x32x16xbf16> to vector<32x16xbf16>
    %cst_133 = arith.constant dense<0.000000e+00> : vector<16x16xf32>
    %269 = tpu.matmul %206, %268, %cst_133 {dimension_numbers = #tpu.dot_dimension_numbers<[1], [0], [0], [1], [0, 0, 1, 1], [], []>} : vector<16x32xbf16>, vector<32x16xbf16>, vector<16x16xf32> -> vector<16x16xf32>
    %270 = vector.extract_strided_slice %200 {offsets = [1, 0, 0], sizes = [1, 1, 16], strides = [1, 1, 1]} : vector<2x1x16xf32> to vector<1x1x16xf32>
    %271 = vector.shape_cast %270 : vector<1x1x16xf32> to vector<1x16xf32>
    %272 = vector.broadcast %271 : vector<1x16xf32> to vector<16x16xf32>
    %273 = arith.addf %269, %272 : vector<16x16xf32>
    %cst_134 = arith.constant 2.500000e-01 : f32
    %274 = vector.broadcast %cst_134 : f32 to vector<16x16xf32>
    %275 = arith.mulf %259, %274 : vector<16x16xf32>
    %276 = arith.truncf %275 : vector<16x16xf32> to vector<16x16xbf16>
    %277 = vector.shape_cast %276 : vector<16x16xbf16> to vector<2x8x16xbf16>
    %278 = arith.truncf %266 : vector<16x16xf32> to vector<16x16xbf16>
    %279 = vector.shape_cast %278 : vector<16x16xbf16> to vector<2x8x16xbf16>
    %280 = arith.truncf %273 : vector<16x16xf32> to vector<16x16xbf16>
    %281 = vector.shape_cast %280 : vector<16x16xbf16> to vector<2x8x16xbf16>
    "tpu.trace_start"() <{level = 10 : i32, message = "bqd,bkd->bqk"}> : () -> ()
    %cst_135 = arith.constant dense<0.000000e+00> : vector<2x8x8xf32>
    %282 = tpu.matmul %277, %279, %cst_135 {dimension_numbers = #tpu.dot_dimension_numbers<[2], [2], [1], [1], [0, 0, 0, 1, 1, 1], [0], [0]>} : vector<2x8x16xbf16>, vector<2x8x16xbf16>, vector<2x8x8xf32> -> vector<2x8x8xf32>
    "tpu.trace_stop"() : () -> ()
    %cst_136 = arith.constant dense<0xFF800000> : vector<2x8xf32>
    %283 = vector.multi_reduction <maximumf>, %282, %cst_136 [2] : vector<2x8x8xf32> to vector<2x8xf32>
    %284 = vector.shape_cast %283 : vector<2x8xf32> to vector<2x8x1xf32>
    %285 = vector.broadcast %284 : vector<2x8x1xf32> to vector<2x8x8xf32>
    %286 = arith.subf %282, %285 : vector<2x8x8xf32>
    %287 = math.exp %286 : vector<2x8x8xf32>
    %cst_137 = arith.constant dense<0.000000e+00> : vector<2x8xf32>
    %288 = vector.multi_reduction <add>, %287, %cst_137 [2] : vector<2x8x8xf32> to vector<2x8xf32>
    %289 = vector.shape_cast %288 : vector<2x8xf32> to vector<2x8x1xf32>
    %290 = vector.broadcast %289 : vector<2x8x1xf32> to vector<2x8x8xf32>
    %291 = arith.divf %287, %290 : vector<2x8x8xf32>
    %292 = arith.truncf %291 : vector<2x8x8xf32> to vector<2x8x8xbf16>
    "tpu.trace_start"() <{level = 10 : i32, message = "bqk,bkd->bqd"}> : () -> ()
    %cst_138 = arith.constant dense<0.000000e+00> : vector<2x8x16xf32>
    %293 = tpu.matmul %292, %281, %cst_138 {dimension_numbers = #tpu.dot_dimension_numbers<[2], [1], [1], [2], [0, 0, 0, 1, 1, 2], [0], [0]>} : vector<2x8x8xbf16>, vector<2x8x16xbf16>, vector<2x8x16xf32> -> vector<2x8x16xf32>
    "tpu.trace_stop"() : () -> ()
    %294 = vector.shape_cast %293 : vector<2x8x16xf32> to vector<16x16xf32>
    %295 = arith.truncf %294 : vector<16x16xf32> to vector<16x16xbf16>
    %296 = vector.extract_strided_slice %202 {offsets = [1, 0, 0], sizes = [1, 16, 32], strides = [1, 1, 1]} : vector<2x16x32xbf16> to vector<1x16x32xbf16>
    %297 = vector.shape_cast %296 : vector<1x16x32xbf16> to vector<16x32xbf16>
    %cst_139 = arith.constant dense<0.000000e+00> : vector<16x32xf32>
    %298 = tpu.matmul %295, %297, %cst_139 {dimension_numbers = #tpu.dot_dimension_numbers<[1], [0], [0], [1], [0, 0, 1, 1], [], []>} : vector<16x16xbf16>, vector<16x32xbf16>, vector<16x32xf32> -> vector<16x32xf32>
    %299 = arith.addf %252, %298 : vector<16x32xf32>
    %300 = vector.broadcast %204 : vector<1x32xf32> to vector<16x32xf32>
    %301 = arith.addf %299, %300 : vector<16x32xf32>
    %302 = arith.addf %188, %301 : vector<16x32xf32>
    %c1_140 = arith.constant 1 : index
    %c0_141 = arith.constant 0 : index
    %c0_142 = arith.constant 0 : index
    %303 = vector.load %arg11[%c1_140, %c0_141, %c0_142] : memref<2x1x32xf32, #tpu.memory_space<vmem>>, vector<1x1x32xf32>
    %304 = vector.shape_cast %303 : vector<1x1x32xf32> to vector<1x32xf32>
    %c1_143 = arith.constant 1 : index
    %c0_144 = arith.constant 0 : index
    %c0_145 = arith.constant 0 : index
    %305 = vector.load %arg12[%c1_143, %c0_144, %c0_145] : memref<2x1x32xf32, #tpu.memory_space<vmem>>, vector<1x1x32xf32>
    %306 = vector.shape_cast %305 : vector<1x1x32xf32> to vector<1x32xf32>
    %cst_146 = arith.constant dense<0.000000e+00> : vector<16xf32>
    %307 = vector.multi_reduction <add>, %302, %cst_146 [1] : vector<16x32xf32> to vector<16xf32>
    %308 = vector.shape_cast %307 : vector<16xf32> to vector<16x1xf32>
    %cst_147 = arith.constant 3.200000e+01 : f32
    %309 = vector.broadcast %cst_147 : f32 to vector<16x1xf32>
    %310 = arith.divf %308, %309 : vector<16x1xf32>
    %311 = vector.broadcast %310 : vector<16x1xf32> to vector<16x32xf32>
    %312 = arith.subf %302, %311 : vector<16x32xf32>
    %313 = arith.mulf %312, %312 : vector<16x32xf32>
    %cst_148 = arith.constant dense<0.000000e+00> : vector<16xf32>
    %314 = vector.multi_reduction <add>, %313, %cst_148 [1] : vector<16x32xf32> to vector<16xf32>
    %315 = vector.shape_cast %314 : vector<16xf32> to vector<16x1xf32>
    %cst_149 = arith.constant 3.200000e+01 : f32
    %316 = vector.broadcast %cst_149 : f32 to vector<16x1xf32>
    %317 = arith.divf %315, %316 : vector<16x1xf32>
    %cst_150 = arith.constant 9.99999974E-6 : f32
    %318 = vector.broadcast %cst_150 : f32 to vector<16x1xf32>
    %319 = arith.addf %317, %318 : vector<16x1xf32>
    %320 = math.rsqrt %319 : vector<16x1xf32>
    %321 = vector.broadcast %320 : vector<16x1xf32> to vector<16x32xf32>
    %322 = arith.mulf %312, %321 : vector<16x32xf32>
    %323 = vector.broadcast %304 : vector<1x32xf32> to vector<16x32xf32>
    %324 = arith.mulf %322, %323 : vector<16x32xf32>
    %325 = vector.broadcast %306 : vector<1x32xf32> to vector<16x32xf32>
    %326 = arith.addf %324, %325 : vector<16x32xf32>
    %c1_151 = arith.constant 1 : index
    %c0_152 = arith.constant 0 : index
    %c0_153 = arith.constant 0 : index
    %327 = vector.load %arg13[%c1_151, %c0_152, %c0_153] : memref<2x32x64xbf16, #tpu.memory_space<vmem>>, vector<1x32x64xbf16>
    %328 = vector.shape_cast %327 : vector<1x32x64xbf16> to vector<32x64xbf16>
    %c1_154 = arith.constant 1 : index
    %c0_155 = arith.constant 0 : index
    %c0_156 = arith.constant 0 : index
    %329 = vector.load %arg14[%c1_154, %c0_155, %c0_156] : memref<2x1x64xf32, #tpu.memory_space<vmem>>, vector<1x1x64xf32>
    %330 = vector.shape_cast %329 : vector<1x1x64xf32> to vector<1x64xf32>
    %c1_157 = arith.constant 1 : index
    %c0_158 = arith.constant 0 : index
    %c0_159 = arith.constant 0 : index
    %331 = vector.load %arg15[%c1_157, %c0_158, %c0_159] : memref<2x64x32xbf16, #tpu.memory_space<vmem>>, vector<1x64x32xbf16>
    %332 = vector.shape_cast %331 : vector<1x64x32xbf16> to vector<64x32xbf16>
    %c1_160 = arith.constant 1 : index
    %c0_161 = arith.constant 0 : index
    %c0_162 = arith.constant 0 : index
    %333 = vector.load %arg16[%c1_160, %c0_161, %c0_162] : memref<2x1x32xf32, #tpu.memory_space<vmem>>, vector<1x1x32xf32>
    %334 = vector.shape_cast %333 : vector<1x1x32xf32> to vector<1x32xf32>
    %335 = arith.truncf %326 : vector<16x32xf32> to vector<16x32xbf16>
    %cst_163 = arith.constant dense<0.000000e+00> : vector<16x64xf32>
    %336 = tpu.matmul %335, %328, %cst_163 {dimension_numbers = #tpu.dot_dimension_numbers<[1], [0], [0], [1], [0, 0, 1, 1], [], []>} : vector<16x32xbf16>, vector<32x64xbf16>, vector<16x64xf32> -> vector<16x64xf32>
    %337 = vector.broadcast %330 : vector<1x64xf32> to vector<16x64xf32>
    %338 = arith.addf %336, %337 : vector<16x64xf32>
    %cst_164 = arith.constant 0.000000e+00 : f32
    %339 = vector.broadcast %cst_164 : f32 to vector<16x64xf32>
    %340 = arith.maximumf %338, %339 : vector<16x64xf32>
    %341 = arith.truncf %340 : vector<16x64xf32> to vector<16x64xbf16>
    %cst_165 = arith.constant dense<0.000000e+00> : vector<16x32xf32>
    %342 = tpu.matmul %341, %332, %cst_165 {dimension_numbers = #tpu.dot_dimension_numbers<[1], [0], [0], [1], [0, 0, 1, 1], [], []>} : vector<16x64xbf16>, vector<64x32xbf16>, vector<16x32xf32> -> vector<16x32xf32>
    %343 = vector.broadcast %334 : vector<1x32xf32> to vector<16x32xf32>
    %344 = arith.addf %342, %343 : vector<16x32xf32>
    %345 = arith.addf %326, %344 : vector<16x32xf32>
    %c1_166 = arith.constant 1 : index
    %c0_167 = arith.constant 0 : index
    %c0_168 = arith.constant 0 : index
    %346 = vector.load %arg17[%c1_166, %c0_167, %c0_168] : memref<2x1x32xf32, #tpu.memory_space<vmem>>, vector<1x1x32xf32>
    %347 = vector.shape_cast %346 : vector<1x1x32xf32> to vector<1x32xf32>
    %c1_169 = arith.constant 1 : index
    %c0_170 = arith.constant 0 : index
    %c0_171 = arith.constant 0 : index
    %348 = vector.load %arg18[%c1_169, %c0_170, %c0_171] : memref<2x1x32xf32, #tpu.memory_space<vmem>>, vector<1x1x32xf32>
    %349 = vector.shape_cast %348 : vector<1x1x32xf32> to vector<1x32xf32>
    %cst_172 = arith.constant dense<0.000000e+00> : vector<16xf32>
    %350 = vector.multi_reduction <add>, %345, %cst_172 [1] : vector<16x32xf32> to vector<16xf32>
    %351 = vector.shape_cast %350 : vector<16xf32> to vector<16x1xf32>
    %cst_173 = arith.constant 3.200000e+01 : f32
    %352 = vector.broadcast %cst_173 : f32 to vector<16x1xf32>
    %353 = arith.divf %351, %352 : vector<16x1xf32>
    %354 = vector.broadcast %353 : vector<16x1xf32> to vector<16x32xf32>
    %355 = arith.subf %345, %354 : vector<16x32xf32>
    %356 = arith.mulf %355, %355 : vector<16x32xf32>
    %cst_174 = arith.constant dense<0.000000e+00> : vector<16xf32>
    %357 = vector.multi_reduction <add>, %356, %cst_174 [1] : vector<16x32xf32> to vector<16xf32>
    %358 = vector.shape_cast %357 : vector<16xf32> to vector<16x1xf32>
    %cst_175 = arith.constant 3.200000e+01 : f32
    %359 = vector.broadcast %cst_175 : f32 to vector<16x1xf32>
    %360 = arith.divf %358, %359 : vector<16x1xf32>
    %cst_176 = arith.constant 9.99999974E-6 : f32
    %361 = vector.broadcast %cst_176 : f32 to vector<16x1xf32>
    %362 = arith.addf %360, %361 : vector<16x1xf32>
    %363 = math.rsqrt %362 : vector<16x1xf32>
    %364 = vector.broadcast %363 : vector<16x1xf32> to vector<16x32xf32>
    %365 = arith.mulf %355, %364 : vector<16x32xf32>
    %366 = vector.broadcast %347 : vector<1x32xf32> to vector<16x32xf32>
    %367 = arith.mulf %365, %366 : vector<16x32xf32>
    %368 = vector.broadcast %349 : vector<1x32xf32> to vector<16x32xf32>
    %369 = arith.addf %367, %368 : vector<16x32xf32>
    %c0_177 = arith.constant 0 : index
    %c0_178 = arith.constant 0 : index
    %c0_179 = arith.constant 0 : index
    %c0_180 = arith.constant 0 : index
    %370 = vector.load %arg19[%c0_177, %c0_178, %c0_179, %c0_180] : memref<2x2x32x16xbf16, #tpu.memory_space<vmem>>, vector<1x2x32x16xbf16>
    %371 = vector.shape_cast %370 : vector<1x2x32x16xbf16> to vector<2x32x16xbf16>
    %c0_181 = arith.constant 0 : index
    %c0_182 = arith.constant 0 : index
    %c0_183 = arith.constant 0 : index
    %c0_184 = arith.constant 0 : index
    %372 = vector.load %arg20[%c0_181, %c0_182, %c0_183, %c0_184] : memref<2x2x1x16xf32, #tpu.memory_space<vmem>>, vector<1x2x1x16xf32>
    %373 = vector.shape_cast %372 : vector<1x2x1x16xf32> to vector<2x1x16xf32>
    %c0_185 = arith.constant 0 : index
    %c0_186 = arith.constant 0 : index
    %c0_187 = arith.constant 0 : index
    %c0_188 = arith.constant 0 : index
    %374 = vector.load %arg21[%c0_185, %c0_186, %c0_187, %c0_188] : memref<2x2x32x16xbf16, #tpu.memory_space<vmem>>, vector<1x2x32x16xbf16>
    %375 = vector.shape_cast %374 : vector<1x2x32x16xbf16> to vector<2x32x16xbf16>
    %c0_189 = arith.constant 0 : index
    %c0_190 = arith.constant 0 : index
    %c0_191 = arith.constant 0 : index
    %c0_192 = arith.constant 0 : index
    %376 = vector.load %arg22[%c0_189, %c0_190, %c0_191, %c0_192] : memref<2x2x1x16xf32, #tpu.memory_space<vmem>>, vector<1x2x1x16xf32>
    %377 = vector.shape_cast %376 : vector<1x2x1x16xf32> to vector<2x1x16xf32>
    %c0_193 = arith.constant 0 : index
    %c0_194 = arith.constant 0 : index
    %c0_195 = arith.constant 0 : index
    %c0_196 = arith.constant 0 : index
    %378 = vector.load %arg23[%c0_193, %c0_194, %c0_195, %c0_196] : memref<2x2x32x16xbf16, #tpu.memory_space<vmem>>, vector<1x2x32x16xbf16>
    %379 = vector.shape_cast %378 : vector<1x2x32x16xbf16> to vector<2x32x16xbf16>
    %c0_197 = arith.constant 0 : index
    %c0_198 = arith.constant 0 : index
    %c0_199 = arith.constant 0 : index
    %c0_200 = arith.constant 0 : index
    %380 = vector.load %arg24[%c0_197, %c0_198, %c0_199, %c0_200] : memref<2x2x1x16xf32, #tpu.memory_space<vmem>>, vector<1x2x1x16xf32>
    %381 = vector.shape_cast %380 : vector<1x2x1x16xf32> to vector<2x1x16xf32>
    %c0_201 = arith.constant 0 : index
    %c0_202 = arith.constant 0 : index
    %c0_203 = arith.constant 0 : index
    %c0_204 = arith.constant 0 : index
    %382 = vector.load %arg25[%c0_201, %c0_202, %c0_203, %c0_204] : memref<2x2x16x32xbf16, #tpu.memory_space<vmem>>, vector<1x2x16x32xbf16>
    %383 = vector.shape_cast %382 : vector<1x2x16x32xbf16> to vector<2x16x32xbf16>
    %c0_205 = arith.constant 0 : index
    %c0_206 = arith.constant 0 : index
    %c0_207 = arith.constant 0 : index
    %384 = vector.load %arg26[%c0_205, %c0_206, %c0_207] : memref<2x1x32xf32, #tpu.memory_space<vmem>>, vector<1x1x32xf32>
    %385 = vector.shape_cast %384 : vector<1x1x32xf32> to vector<1x32xf32>
    %386 = arith.truncf %7 : vector<16x32xf32> to vector<16x32xbf16>
    %387 = arith.truncf %7 : vector<16x32xf32> to vector<16x32xbf16>
    %388 = vector.extract_strided_slice %371 {offsets = [0, 0, 0], sizes = [1, 32, 16], strides = [1, 1, 1]} : vector<2x32x16xbf16> to vector<1x32x16xbf16>
    %389 = vector.shape_cast %388 : vector<1x32x16xbf16> to vector<32x16xbf16>
    %cst_208 = arith.constant dense<0.000000e+00> : vector<16x16xf32>
    %390 = tpu.matmul %386, %389, %cst_208 {dimension_numbers = #tpu.dot_dimension_numbers<[1], [0], [0], [1], [0, 0, 1, 1], [], []>} : vector<16x32xbf16>, vector<32x16xbf16>, vector<16x16xf32> -> vector<16x16xf32>
    %391 = vector.extract_strided_slice %373 {offsets = [0, 0, 0], sizes = [1, 1, 16], strides = [1, 1, 1]} : vector<2x1x16xf32> to vector<1x1x16xf32>
    %392 = vector.shape_cast %391 : vector<1x1x16xf32> to vector<1x16xf32>
    %393 = vector.broadcast %392 : vector<1x16xf32> to vector<16x16xf32>
    %394 = arith.addf %390, %393 : vector<16x16xf32>
    %395 = vector.extract_strided_slice %375 {offsets = [0, 0, 0], sizes = [1, 32, 16], strides = [1, 1, 1]} : vector<2x32x16xbf16> to vector<1x32x16xbf16>
    %396 = vector.shape_cast %395 : vector<1x32x16xbf16> to vector<32x16xbf16>
    %cst_209 = arith.constant dense<0.000000e+00> : vector<16x16xf32>
    %397 = tpu.matmul %387, %396, %cst_209 {dimension_numbers = #tpu.dot_dimension_numbers<[1], [0], [0], [1], [0, 0, 1, 1], [], []>} : vector<16x32xbf16>, vector<32x16xbf16>, vector<16x16xf32> -> vector<16x16xf32>
    %398 = vector.extract_strided_slice %377 {offsets = [0, 0, 0], sizes = [1, 1, 16], strides = [1, 1, 1]} : vector<2x1x16xf32> to vector<1x1x16xf32>
    %399 = vector.shape_cast %398 : vector<1x1x16xf32> to vector<1x16xf32>
    %400 = vector.broadcast %399 : vector<1x16xf32> to vector<16x16xf32>
    %401 = arith.addf %397, %400 : vector<16x16xf32>
    %402 = vector.extract_strided_slice %379 {offsets = [0, 0, 0], sizes = [1, 32, 16], strides = [1, 1, 1]} : vector<2x32x16xbf16> to vector<1x32x16xbf16>
    %403 = vector.shape_cast %402 : vector<1x32x16xbf16> to vector<32x16xbf16>
    %cst_210 = arith.constant dense<0.000000e+00> : vector<16x16xf32>
    %404 = tpu.matmul %387, %403, %cst_210 {dimension_numbers = #tpu.dot_dimension_numbers<[1], [0], [0], [1], [0, 0, 1, 1], [], []>} : vector<16x32xbf16>, vector<32x16xbf16>, vector<16x16xf32> -> vector<16x16xf32>
    %405 = vector.extract_strided_slice %381 {offsets = [0, 0, 0], sizes = [1, 1, 16], strides = [1, 1, 1]} : vector<2x1x16xf32> to vector<1x1x16xf32>
    %406 = vector.shape_cast %405 : vector<1x1x16xf32> to vector<1x16xf32>
    %407 = vector.broadcast %406 : vector<1x16xf32> to vector<16x16xf32>
    %408 = arith.addf %404, %407 : vector<16x16xf32>
    %cst_211 = arith.constant 2.500000e-01 : f32
    %409 = vector.broadcast %cst_211 : f32 to vector<16x16xf32>
    %410 = arith.mulf %394, %409 : vector<16x16xf32>
    %411 = arith.truncf %410 : vector<16x16xf32> to vector<16x16xbf16>
    %412 = vector.shape_cast %411 : vector<16x16xbf16> to vector<2x8x16xbf16>
    %413 = arith.truncf %401 : vector<16x16xf32> to vector<16x16xbf16>
    %414 = vector.shape_cast %413 : vector<16x16xbf16> to vector<2x8x16xbf16>
    %415 = arith.truncf %408 : vector<16x16xf32> to vector<16x16xbf16>
    %416 = vector.shape_cast %415 : vector<16x16xbf16> to vector<2x8x16xbf16>
    "tpu.trace_start"() <{level = 10 : i32, message = "bqd,bkd->bqk"}> : () -> ()
    %cst_212 = arith.constant dense<0.000000e+00> : vector<2x8x8xf32>
    %417 = tpu.matmul %412, %414, %cst_212 {dimension_numbers = #tpu.dot_dimension_numbers<[2], [2], [1], [1], [0, 0, 0, 1, 1, 1], [0], [0]>} : vector<2x8x16xbf16>, vector<2x8x16xbf16>, vector<2x8x8xf32> -> vector<2x8x8xf32>
    "tpu.trace_stop"() : () -> ()
    %cst_213 = arith.constant dense<0xFF800000> : vector<2x8xf32>
    %418 = vector.multi_reduction <maximumf>, %417, %cst_213 [2] : vector<2x8x8xf32> to vector<2x8xf32>
    %419 = vector.shape_cast %418 : vector<2x8xf32> to vector<2x8x1xf32>
    %420 = vector.broadcast %419 : vector<2x8x1xf32> to vector<2x8x8xf32>
    %421 = arith.subf %417, %420 : vector<2x8x8xf32>
    %422 = math.exp %421 : vector<2x8x8xf32>
    %cst_214 = arith.constant dense<0.000000e+00> : vector<2x8xf32>
    %423 = vector.multi_reduction <add>, %422, %cst_214 [2] : vector<2x8x8xf32> to vector<2x8xf32>
    %424 = vector.shape_cast %423 : vector<2x8xf32> to vector<2x8x1xf32>
    %425 = vector.broadcast %424 : vector<2x8x1xf32> to vector<2x8x8xf32>
    %426 = arith.divf %422, %425 : vector<2x8x8xf32>
    %427 = arith.truncf %426 : vector<2x8x8xf32> to vector<2x8x8xbf16>
    "tpu.trace_start"() <{level = 10 : i32, message = "bqk,bkd->bqd"}> : () -> ()
    %cst_215 = arith.constant dense<0.000000e+00> : vector<2x8x16xf32>
    %428 = tpu.matmul %427, %416, %cst_215 {dimension_numbers = #tpu.dot_dimension_numbers<[2], [1], [1], [2], [0, 0, 0, 1, 1, 2], [0], [0]>} : vector<2x8x8xbf16>, vector<2x8x16xbf16>, vector<2x8x16xf32> -> vector<2x8x16xf32>
    "tpu.trace_stop"() : () -> ()
    %429 = vector.shape_cast %428 : vector<2x8x16xf32> to vector<16x16xf32>
    %430 = arith.truncf %429 : vector<16x16xf32> to vector<16x16xbf16>
    %431 = vector.extract_strided_slice %383 {offsets = [0, 0, 0], sizes = [1, 16, 32], strides = [1, 1, 1]} : vector<2x16x32xbf16> to vector<1x16x32xbf16>
    %432 = vector.shape_cast %431 : vector<1x16x32xbf16> to vector<16x32xbf16>
    %cst_216 = arith.constant dense<0.000000e+00> : vector<16x32xf32>
    %433 = tpu.matmul %430, %432, %cst_216 {dimension_numbers = #tpu.dot_dimension_numbers<[1], [0], [0], [1], [0, 0, 1, 1], [], []>} : vector<16x16xbf16>, vector<16x32xbf16>, vector<16x32xf32> -> vector<16x32xf32>
    %434 = vector.extract_strided_slice %371 {offsets = [1, 0, 0], sizes = [1, 32, 16], strides = [1, 1, 1]} : vector<2x32x16xbf16> to vector<1x32x16xbf16>
    %435 = vector.shape_cast %434 : vector<1x32x16xbf16> to vector<32x16xbf16>
    %cst_217 = arith.constant dense<0.000000e+00> : vector<16x16xf32>
    %436 = tpu.matmul %386, %435, %cst_217 {dimension_numbers = #tpu.dot_dimension_numbers<[1], [0], [0], [1], [0, 0, 1, 1], [], []>} : vector<16x32xbf16>, vector<32x16xbf16>, vector<16x16xf32> -> vector<16x16xf32>
    %437 = vector.extract_strided_slice %373 {offsets = [1, 0, 0], sizes = [1, 1, 16], strides = [1, 1, 1]} : vector<2x1x16xf32> to vector<1x1x16xf32>
    %438 = vector.shape_cast %437 : vector<1x1x16xf32> to vector<1x16xf32>
    %439 = vector.broadcast %438 : vector<1x16xf32> to vector<16x16xf32>
    %440 = arith.addf %436, %439 : vector<16x16xf32>
    %441 = vector.extract_strided_slice %375 {offsets = [1, 0, 0], sizes = [1, 32, 16], strides = [1, 1, 1]} : vector<2x32x16xbf16> to vector<1x32x16xbf16>
    %442 = vector.shape_cast %441 : vector<1x32x16xbf16> to vector<32x16xbf16>
    %cst_218 = arith.constant dense<0.000000e+00> : vector<16x16xf32>
    %443 = tpu.matmul %387, %442, %cst_218 {dimension_numbers = #tpu.dot_dimension_numbers<[1], [0], [0], [1], [0, 0, 1, 1], [], []>} : vector<16x32xbf16>, vector<32x16xbf16>, vector<16x16xf32> -> vector<16x16xf32>
    %444 = vector.extract_strided_slice %377 {offsets = [1, 0, 0], sizes = [1, 1, 16], strides = [1, 1, 1]} : vector<2x1x16xf32> to vector<1x1x16xf32>
    %445 = vector.shape_cast %444 : vector<1x1x16xf32> to vector<1x16xf32>
    %446 = vector.broadcast %445 : vector<1x16xf32> to vector<16x16xf32>
    %447 = arith.addf %443, %446 : vector<16x16xf32>
    %448 = vector.extract_strided_slice %379 {offsets = [1, 0, 0], sizes = [1, 32, 16], strides = [1, 1, 1]} : vector<2x32x16xbf16> to vector<1x32x16xbf16>
    %449 = vector.shape_cast %448 : vector<1x32x16xbf16> to vector<32x16xbf16>
    %cst_219 = arith.constant dense<0.000000e+00> : vector<16x16xf32>
    %450 = tpu.matmul %387, %449, %cst_219 {dimension_numbers = #tpu.dot_dimension_numbers<[1], [0], [0], [1], [0, 0, 1, 1], [], []>} : vector<16x32xbf16>, vector<32x16xbf16>, vector<16x16xf32> -> vector<16x16xf32>
    %451 = vector.extract_strided_slice %381 {offsets = [1, 0, 0], sizes = [1, 1, 16], strides = [1, 1, 1]} : vector<2x1x16xf32> to vector<1x1x16xf32>
    %452 = vector.shape_cast %451 : vector<1x1x16xf32> to vector<1x16xf32>
    %453 = vector.broadcast %452 : vector<1x16xf32> to vector<16x16xf32>
    %454 = arith.addf %450, %453 : vector<16x16xf32>
    %cst_220 = arith.constant 2.500000e-01 : f32
    %455 = vector.broadcast %cst_220 : f32 to vector<16x16xf32>
    %456 = arith.mulf %440, %455 : vector<16x16xf32>
    %457 = arith.truncf %456 : vector<16x16xf32> to vector<16x16xbf16>
    %458 = vector.shape_cast %457 : vector<16x16xbf16> to vector<2x8x16xbf16>
    %459 = arith.truncf %447 : vector<16x16xf32> to vector<16x16xbf16>
    %460 = vector.shape_cast %459 : vector<16x16xbf16> to vector<2x8x16xbf16>
    %461 = arith.truncf %454 : vector<16x16xf32> to vector<16x16xbf16>
    %462 = vector.shape_cast %461 : vector<16x16xbf16> to vector<2x8x16xbf16>
    "tpu.trace_start"() <{level = 10 : i32, message = "bqd,bkd->bqk"}> : () -> ()
    %cst_221 = arith.constant dense<0.000000e+00> : vector<2x8x8xf32>
    %463 = tpu.matmul %458, %460, %cst_221 {dimension_numbers = #tpu.dot_dimension_numbers<[2], [2], [1], [1], [0, 0, 0, 1, 1, 1], [0], [0]>} : vector<2x8x16xbf16>, vector<2x8x16xbf16>, vector<2x8x8xf32> -> vector<2x8x8xf32>
    "tpu.trace_stop"() : () -> ()
    %cst_222 = arith.constant dense<0xFF800000> : vector<2x8xf32>
    %464 = vector.multi_reduction <maximumf>, %463, %cst_222 [2] : vector<2x8x8xf32> to vector<2x8xf32>
    %465 = vector.shape_cast %464 : vector<2x8xf32> to vector<2x8x1xf32>
    %466 = vector.broadcast %465 : vector<2x8x1xf32> to vector<2x8x8xf32>
    %467 = arith.subf %463, %466 : vector<2x8x8xf32>
    %468 = math.exp %467 : vector<2x8x8xf32>
    %cst_223 = arith.constant dense<0.000000e+00> : vector<2x8xf32>
    %469 = vector.multi_reduction <add>, %468, %cst_223 [2] : vector<2x8x8xf32> to vector<2x8xf32>
    %470 = vector.shape_cast %469 : vector<2x8xf32> to vector<2x8x1xf32>
    %471 = vector.broadcast %470 : vector<2x8x1xf32> to vector<2x8x8xf32>
    %472 = arith.divf %468, %471 : vector<2x8x8xf32>
    %473 = arith.truncf %472 : vector<2x8x8xf32> to vector<2x8x8xbf16>
    "tpu.trace_start"() <{level = 10 : i32, message = "bqk,bkd->bqd"}> : () -> ()
    %cst_224 = arith.constant dense<0.000000e+00> : vector<2x8x16xf32>
    %474 = tpu.matmul %473, %462, %cst_224 {dimension_numbers = #tpu.dot_dimension_numbers<[2], [1], [1], [2], [0, 0, 0, 1, 1, 2], [0], [0]>} : vector<2x8x8xbf16>, vector<2x8x16xbf16>, vector<2x8x16xf32> -> vector<2x8x16xf32>
    "tpu.trace_stop"() : () -> ()
    %475 = vector.shape_cast %474 : vector<2x8x16xf32> to vector<16x16xf32>
    %476 = arith.truncf %475 : vector<16x16xf32> to vector<16x16xbf16>
    %477 = vector.extract_strided_slice %383 {offsets = [1, 0, 0], sizes = [1, 16, 32], strides = [1, 1, 1]} : vector<2x16x32xbf16> to vector<1x16x32xbf16>
    %478 = vector.shape_cast %477 : vector<1x16x32xbf16> to vector<16x32xbf16>
    %cst_225 = arith.constant dense<0.000000e+00> : vector<16x32xf32>
    %479 = tpu.matmul %476, %478, %cst_225 {dimension_numbers = #tpu.dot_dimension_numbers<[1], [0], [0], [1], [0, 0, 1, 1], [], []>} : vector<16x16xbf16>, vector<16x32xbf16>, vector<16x32xf32> -> vector<16x32xf32>
    %480 = arith.addf %433, %479 : vector<16x32xf32>
    %481 = vector.broadcast %385 : vector<1x32xf32> to vector<16x32xf32>
    %482 = arith.addf %480, %481 : vector<16x32xf32>
    %483 = arith.addf %7, %482 : vector<16x32xf32>
    %c0_226 = arith.constant 0 : index
    %c0_227 = arith.constant 0 : index
    %c0_228 = arith.constant 0 : index
    %484 = vector.load %arg27[%c0_226, %c0_227, %c0_228] : memref<2x1x32xf32, #tpu.memory_space<vmem>>, vector<1x1x32xf32>
    %485 = vector.shape_cast %484 : vector<1x1x32xf32> to vector<1x32xf32>
    %c0_229 = arith.constant 0 : index
    %c0_230 = arith.constant 0 : index
    %c0_231 = arith.constant 0 : index
    %486 = vector.load %arg28[%c0_229, %c0_230, %c0_231] : memref<2x1x32xf32, #tpu.memory_space<vmem>>, vector<1x1x32xf32>
    %487 = vector.shape_cast %486 : vector<1x1x32xf32> to vector<1x32xf32>
    %cst_232 = arith.constant dense<0.000000e+00> : vector<16xf32>
    %488 = vector.multi_reduction <add>, %483, %cst_232 [1] : vector<16x32xf32> to vector<16xf32>
    %489 = vector.shape_cast %488 : vector<16xf32> to vector<16x1xf32>
    %cst_233 = arith.constant 3.200000e+01 : f32
    %490 = vector.broadcast %cst_233 : f32 to vector<16x1xf32>
    %491 = arith.divf %489, %490 : vector<16x1xf32>
    %492 = vector.broadcast %491 : vector<16x1xf32> to vector<16x32xf32>
    %493 = arith.subf %483, %492 : vector<16x32xf32>
    %494 = arith.mulf %493, %493 : vector<16x32xf32>
    %cst_234 = arith.constant dense<0.000000e+00> : vector<16xf32>
    %495 = vector.multi_reduction <add>, %494, %cst_234 [1] : vector<16x32xf32> to vector<16xf32>
    %496 = vector.shape_cast %495 : vector<16xf32> to vector<16x1xf32>
    %cst_235 = arith.constant 3.200000e+01 : f32
    %497 = vector.broadcast %cst_235 : f32 to vector<16x1xf32>
    %498 = arith.divf %496, %497 : vector<16x1xf32>
    %cst_236 = arith.constant 9.99999974E-6 : f32
    %499 = vector.broadcast %cst_236 : f32 to vector<16x1xf32>
    %500 = arith.addf %498, %499 : vector<16x1xf32>
    %501 = math.rsqrt %500 : vector<16x1xf32>
    %502 = vector.broadcast %501 : vector<16x1xf32> to vector<16x32xf32>
    %503 = arith.mulf %493, %502 : vector<16x32xf32>
    %504 = vector.broadcast %485 : vector<1x32xf32> to vector<16x32xf32>
    %505 = arith.mulf %503, %504 : vector<16x32xf32>
    %506 = vector.broadcast %487 : vector<1x32xf32> to vector<16x32xf32>
    %507 = arith.addf %505, %506 : vector<16x32xf32>
    %c0_237 = arith.constant 0 : index
    %c0_238 = arith.constant 0 : index
    %c0_239 = arith.constant 0 : index
    %c0_240 = arith.constant 0 : index
    %508 = vector.load %arg29[%c0_237, %c0_238, %c0_239, %c0_240] : memref<2x2x32x16xbf16, #tpu.memory_space<vmem>>, vector<1x2x32x16xbf16>
    %509 = vector.shape_cast %508 : vector<1x2x32x16xbf16> to vector<2x32x16xbf16>
    %c0_241 = arith.constant 0 : index
    %c0_242 = arith.constant 0 : index
    %c0_243 = arith.constant 0 : index
    %c0_244 = arith.constant 0 : index
    %510 = vector.load %arg30[%c0_241, %c0_242, %c0_243, %c0_244] : memref<2x2x1x16xf32, #tpu.memory_space<vmem>>, vector<1x2x1x16xf32>
    %511 = vector.shape_cast %510 : vector<1x2x1x16xf32> to vector<2x1x16xf32>
    %c0_245 = arith.constant 0 : index
    %c0_246 = arith.constant 0 : index
    %c0_247 = arith.constant 0 : index
    %c0_248 = arith.constant 0 : index
    %512 = vector.load %arg31[%c0_245, %c0_246, %c0_247, %c0_248] : memref<2x2x32x16xbf16, #tpu.memory_space<vmem>>, vector<1x2x32x16xbf16>
    %513 = vector.shape_cast %512 : vector<1x2x32x16xbf16> to vector<2x32x16xbf16>
    %c0_249 = arith.constant 0 : index
    %c0_250 = arith.constant 0 : index
    %c0_251 = arith.constant 0 : index
    %c0_252 = arith.constant 0 : index
    %514 = vector.load %arg32[%c0_249, %c0_250, %c0_251, %c0_252] : memref<2x2x1x16xf32, #tpu.memory_space<vmem>>, vector<1x2x1x16xf32>
    %515 = vector.shape_cast %514 : vector<1x2x1x16xf32> to vector<2x1x16xf32>
    %c0_253 = arith.constant 0 : index
    %c0_254 = arith.constant 0 : index
    %c0_255 = arith.constant 0 : index
    %c0_256 = arith.constant 0 : index
    %516 = vector.load %arg33[%c0_253, %c0_254, %c0_255, %c0_256] : memref<2x2x32x16xbf16, #tpu.memory_space<vmem>>, vector<1x2x32x16xbf16>
    %517 = vector.shape_cast %516 : vector<1x2x32x16xbf16> to vector<2x32x16xbf16>
    %c0_257 = arith.constant 0 : index
    %c0_258 = arith.constant 0 : index
    %c0_259 = arith.constant 0 : index
    %c0_260 = arith.constant 0 : index
    %518 = vector.load %arg34[%c0_257, %c0_258, %c0_259, %c0_260] : memref<2x2x1x16xf32, #tpu.memory_space<vmem>>, vector<1x2x1x16xf32>
    %519 = vector.shape_cast %518 : vector<1x2x1x16xf32> to vector<2x1x16xf32>
    %c0_261 = arith.constant 0 : index
    %c0_262 = arith.constant 0 : index
    %c0_263 = arith.constant 0 : index
    %c0_264 = arith.constant 0 : index
    %520 = vector.load %arg35[%c0_261, %c0_262, %c0_263, %c0_264] : memref<2x2x16x32xbf16, #tpu.memory_space<vmem>>, vector<1x2x16x32xbf16>
    %521 = vector.shape_cast %520 : vector<1x2x16x32xbf16> to vector<2x16x32xbf16>
    %c0_265 = arith.constant 0 : index
    %c0_266 = arith.constant 0 : index
    %c0_267 = arith.constant 0 : index
    %522 = vector.load %arg36[%c0_265, %c0_266, %c0_267] : memref<2x1x32xf32, #tpu.memory_space<vmem>>, vector<1x1x32xf32>
    %523 = vector.shape_cast %522 : vector<1x1x32xf32> to vector<1x32xf32>
    %524 = arith.truncf %507 : vector<16x32xf32> to vector<16x32xbf16>
    %525 = arith.truncf %369 : vector<16x32xf32> to vector<16x32xbf16>
    %526 = vector.extract_strided_slice %509 {offsets = [0, 0, 0], sizes = [1, 32, 16], strides = [1, 1, 1]} : vector<2x32x16xbf16> to vector<1x32x16xbf16>
    %527 = vector.shape_cast %526 : vector<1x32x16xbf16> to vector<32x16xbf16>
    %cst_268 = arith.constant dense<0.000000e+00> : vector<16x16xf32>
    %528 = tpu.matmul %524, %527, %cst_268 {dimension_numbers = #tpu.dot_dimension_numbers<[1], [0], [0], [1], [0, 0, 1, 1], [], []>} : vector<16x32xbf16>, vector<32x16xbf16>, vector<16x16xf32> -> vector<16x16xf32>
    %529 = vector.extract_strided_slice %511 {offsets = [0, 0, 0], sizes = [1, 1, 16], strides = [1, 1, 1]} : vector<2x1x16xf32> to vector<1x1x16xf32>
    %530 = vector.shape_cast %529 : vector<1x1x16xf32> to vector<1x16xf32>
    %531 = vector.broadcast %530 : vector<1x16xf32> to vector<16x16xf32>
    %532 = arith.addf %528, %531 : vector<16x16xf32>
    %533 = vector.extract_strided_slice %513 {offsets = [0, 0, 0], sizes = [1, 32, 16], strides = [1, 1, 1]} : vector<2x32x16xbf16> to vector<1x32x16xbf16>
    %534 = vector.shape_cast %533 : vector<1x32x16xbf16> to vector<32x16xbf16>
    %cst_269 = arith.constant dense<0.000000e+00> : vector<16x16xf32>
    %535 = tpu.matmul %525, %534, %cst_269 {dimension_numbers = #tpu.dot_dimension_numbers<[1], [0], [0], [1], [0, 0, 1, 1], [], []>} : vector<16x32xbf16>, vector<32x16xbf16>, vector<16x16xf32> -> vector<16x16xf32>
    %536 = vector.extract_strided_slice %515 {offsets = [0, 0, 0], sizes = [1, 1, 16], strides = [1, 1, 1]} : vector<2x1x16xf32> to vector<1x1x16xf32>
    %537 = vector.shape_cast %536 : vector<1x1x16xf32> to vector<1x16xf32>
    %538 = vector.broadcast %537 : vector<1x16xf32> to vector<16x16xf32>
    %539 = arith.addf %535, %538 : vector<16x16xf32>
    %540 = vector.extract_strided_slice %517 {offsets = [0, 0, 0], sizes = [1, 32, 16], strides = [1, 1, 1]} : vector<2x32x16xbf16> to vector<1x32x16xbf16>
    %541 = vector.shape_cast %540 : vector<1x32x16xbf16> to vector<32x16xbf16>
    %cst_270 = arith.constant dense<0.000000e+00> : vector<16x16xf32>
    %542 = tpu.matmul %525, %541, %cst_270 {dimension_numbers = #tpu.dot_dimension_numbers<[1], [0], [0], [1], [0, 0, 1, 1], [], []>} : vector<16x32xbf16>, vector<32x16xbf16>, vector<16x16xf32> -> vector<16x16xf32>
    %543 = vector.extract_strided_slice %519 {offsets = [0, 0, 0], sizes = [1, 1, 16], strides = [1, 1, 1]} : vector<2x1x16xf32> to vector<1x1x16xf32>
    %544 = vector.shape_cast %543 : vector<1x1x16xf32> to vector<1x16xf32>
    %545 = vector.broadcast %544 : vector<1x16xf32> to vector<16x16xf32>
    %546 = arith.addf %542, %545 : vector<16x16xf32>
    %cst_271 = arith.constant 2.500000e-01 : f32
    %547 = vector.broadcast %cst_271 : f32 to vector<16x16xf32>
    %548 = arith.mulf %532, %547 : vector<16x16xf32>
    %549 = arith.truncf %548 : vector<16x16xf32> to vector<16x16xbf16>
    %550 = vector.shape_cast %549 : vector<16x16xbf16> to vector<2x8x16xbf16>
    %551 = arith.truncf %539 : vector<16x16xf32> to vector<16x16xbf16>
    %552 = vector.shape_cast %551 : vector<16x16xbf16> to vector<2x8x16xbf16>
    %553 = arith.truncf %546 : vector<16x16xf32> to vector<16x16xbf16>
    %554 = vector.shape_cast %553 : vector<16x16xbf16> to vector<2x8x16xbf16>
    "tpu.trace_start"() <{level = 10 : i32, message = "bqd,bkd->bqk"}> : () -> ()
    %cst_272 = arith.constant dense<0.000000e+00> : vector<2x8x8xf32>
    %555 = tpu.matmul %550, %552, %cst_272 {dimension_numbers = #tpu.dot_dimension_numbers<[2], [2], [1], [1], [0, 0, 0, 1, 1, 1], [0], [0]>} : vector<2x8x16xbf16>, vector<2x8x16xbf16>, vector<2x8x8xf32> -> vector<2x8x8xf32>
    "tpu.trace_stop"() : () -> ()
    %cst_273 = arith.constant dense<0xFF800000> : vector<2x8xf32>
    %556 = vector.multi_reduction <maximumf>, %555, %cst_273 [2] : vector<2x8x8xf32> to vector<2x8xf32>
    %557 = vector.shape_cast %556 : vector<2x8xf32> to vector<2x8x1xf32>
    %558 = vector.broadcast %557 : vector<2x8x1xf32> to vector<2x8x8xf32>
    %559 = arith.subf %555, %558 : vector<2x8x8xf32>
    %560 = math.exp %559 : vector<2x8x8xf32>
    %cst_274 = arith.constant dense<0.000000e+00> : vector<2x8xf32>
    %561 = vector.multi_reduction <add>, %560, %cst_274 [2] : vector<2x8x8xf32> to vector<2x8xf32>
    %562 = vector.shape_cast %561 : vector<2x8xf32> to vector<2x8x1xf32>
    %563 = vector.broadcast %562 : vector<2x8x1xf32> to vector<2x8x8xf32>
    %564 = arith.divf %560, %563 : vector<2x8x8xf32>
    %565 = arith.truncf %564 : vector<2x8x8xf32> to vector<2x8x8xbf16>
    "tpu.trace_start"() <{level = 10 : i32, message = "bqk,bkd->bqd"}> : () -> ()
    %cst_275 = arith.constant dense<0.000000e+00> : vector<2x8x16xf32>
    %566 = tpu.matmul %565, %554, %cst_275 {dimension_numbers = #tpu.dot_dimension_numbers<[2], [1], [1], [2], [0, 0, 0, 1, 1, 2], [0], [0]>} : vector<2x8x8xbf16>, vector<2x8x16xbf16>, vector<2x8x16xf32> -> vector<2x8x16xf32>
    "tpu.trace_stop"() : () -> ()
    %567 = vector.shape_cast %566 : vector<2x8x16xf32> to vector<16x16xf32>
    %568 = arith.truncf %567 : vector<16x16xf32> to vector<16x16xbf16>
    %569 = vector.extract_strided_slice %521 {offsets = [0, 0, 0], sizes = [1, 16, 32], strides = [1, 1, 1]} : vector<2x16x32xbf16> to vector<1x16x32xbf16>
    %570 = vector.shape_cast %569 : vector<1x16x32xbf16> to vector<16x32xbf16>
    %cst_276 = arith.constant dense<0.000000e+00> : vector<16x32xf32>
    %571 = tpu.matmul %568, %570, %cst_276 {dimension_numbers = #tpu.dot_dimension_numbers<[1], [0], [0], [1], [0, 0, 1, 1], [], []>} : vector<16x16xbf16>, vector<16x32xbf16>, vector<16x32xf32> -> vector<16x32xf32>
    %572 = vector.extract_strided_slice %509 {offsets = [1, 0, 0], sizes = [1, 32, 16], strides = [1, 1, 1]} : vector<2x32x16xbf16> to vector<1x32x16xbf16>
    %573 = vector.shape_cast %572 : vector<1x32x16xbf16> to vector<32x16xbf16>
    %cst_277 = arith.constant dense<0.000000e+00> : vector<16x16xf32>
    %574 = tpu.matmul %524, %573, %cst_277 {dimension_numbers = #tpu.dot_dimension_numbers<[1], [0], [0], [1], [0, 0, 1, 1], [], []>} : vector<16x32xbf16>, vector<32x16xbf16>, vector<16x16xf32> -> vector<16x16xf32>
    %575 = vector.extract_strided_slice %511 {offsets = [1, 0, 0], sizes = [1, 1, 16], strides = [1, 1, 1]} : vector<2x1x16xf32> to vector<1x1x16xf32>
    %576 = vector.shape_cast %575 : vector<1x1x16xf32> to vector<1x16xf32>
    %577 = vector.broadcast %576 : vector<1x16xf32> to vector<16x16xf32>
    %578 = arith.addf %574, %577 : vector<16x16xf32>
    %579 = vector.extract_strided_slice %513 {offsets = [1, 0, 0], sizes = [1, 32, 16], strides = [1, 1, 1]} : vector<2x32x16xbf16> to vector<1x32x16xbf16>
    %580 = vector.shape_cast %579 : vector<1x32x16xbf16> to vector<32x16xbf16>
    %cst_278 = arith.constant dense<0.000000e+00> : vector<16x16xf32>
    %581 = tpu.matmul %525, %580, %cst_278 {dimension_numbers = #tpu.dot_dimension_numbers<[1], [0], [0], [1], [0, 0, 1, 1], [], []>} : vector<16x32xbf16>, vector<32x16xbf16>, vector<16x16xf32> -> vector<16x16xf32>
    %582 = vector.extract_strided_slice %515 {offsets = [1, 0, 0], sizes = [1, 1, 16], strides = [1, 1, 1]} : vector<2x1x16xf32> to vector<1x1x16xf32>
    %583 = vector.shape_cast %582 : vector<1x1x16xf32> to vector<1x16xf32>
    %584 = vector.broadcast %583 : vector<1x16xf32> to vector<16x16xf32>
    %585 = arith.addf %581, %584 : vector<16x16xf32>
    %586 = vector.extract_strided_slice %517 {offsets = [1, 0, 0], sizes = [1, 32, 16], strides = [1, 1, 1]} : vector<2x32x16xbf16> to vector<1x32x16xbf16>
    %587 = vector.shape_cast %586 : vector<1x32x16xbf16> to vector<32x16xbf16>
    %cst_279 = arith.constant dense<0.000000e+00> : vector<16x16xf32>
    %588 = tpu.matmul %525, %587, %cst_279 {dimension_numbers = #tpu.dot_dimension_numbers<[1], [0], [0], [1], [0, 0, 1, 1], [], []>} : vector<16x32xbf16>, vector<32x16xbf16>, vector<16x16xf32> -> vector<16x16xf32>
    %589 = vector.extract_strided_slice %519 {offsets = [1, 0, 0], sizes = [1, 1, 16], strides = [1, 1, 1]} : vector<2x1x16xf32> to vector<1x1x16xf32>
    %590 = vector.shape_cast %589 : vector<1x1x16xf32> to vector<1x16xf32>
    %591 = vector.broadcast %590 : vector<1x16xf32> to vector<16x16xf32>
    %592 = arith.addf %588, %591 : vector<16x16xf32>
    %cst_280 = arith.constant 2.500000e-01 : f32
    %593 = vector.broadcast %cst_280 : f32 to vector<16x16xf32>
    %594 = arith.mulf %578, %593 : vector<16x16xf32>
    %595 = arith.truncf %594 : vector<16x16xf32> to vector<16x16xbf16>
    %596 = vector.shape_cast %595 : vector<16x16xbf16> to vector<2x8x16xbf16>
    %597 = arith.truncf %585 : vector<16x16xf32> to vector<16x16xbf16>
    %598 = vector.shape_cast %597 : vector<16x16xbf16> to vector<2x8x16xbf16>
    %599 = arith.truncf %592 : vector<16x16xf32> to vector<16x16xbf16>
    %600 = vector.shape_cast %599 : vector<16x16xbf16> to vector<2x8x16xbf16>
    "tpu.trace_start"() <{level = 10 : i32, message = "bqd,bkd->bqk"}> : () -> ()
    %cst_281 = arith.constant dense<0.000000e+00> : vector<2x8x8xf32>
    %601 = tpu.matmul %596, %598, %cst_281 {dimension_numbers = #tpu.dot_dimension_numbers<[2], [2], [1], [1], [0, 0, 0, 1, 1, 1], [0], [0]>} : vector<2x8x16xbf16>, vector<2x8x16xbf16>, vector<2x8x8xf32> -> vector<2x8x8xf32>
    "tpu.trace_stop"() : () -> ()
    %cst_282 = arith.constant dense<0xFF800000> : vector<2x8xf32>
    %602 = vector.multi_reduction <maximumf>, %601, %cst_282 [2] : vector<2x8x8xf32> to vector<2x8xf32>
    %603 = vector.shape_cast %602 : vector<2x8xf32> to vector<2x8x1xf32>
    %604 = vector.broadcast %603 : vector<2x8x1xf32> to vector<2x8x8xf32>
    %605 = arith.subf %601, %604 : vector<2x8x8xf32>
    %606 = math.exp %605 : vector<2x8x8xf32>
    %cst_283 = arith.constant dense<0.000000e+00> : vector<2x8xf32>
    %607 = vector.multi_reduction <add>, %606, %cst_283 [2] : vector<2x8x8xf32> to vector<2x8xf32>
    %608 = vector.shape_cast %607 : vector<2x8xf32> to vector<2x8x1xf32>
    %609 = vector.broadcast %608 : vector<2x8x1xf32> to vector<2x8x8xf32>
    %610 = arith.divf %606, %609 : vector<2x8x8xf32>
    %611 = arith.truncf %610 : vector<2x8x8xf32> to vector<2x8x8xbf16>
    "tpu.trace_start"() <{level = 10 : i32, message = "bqk,bkd->bqd"}> : () -> ()
    %cst_284 = arith.constant dense<0.000000e+00> : vector<2x8x16xf32>
    %612 = tpu.matmul %611, %600, %cst_284 {dimension_numbers = #tpu.dot_dimension_numbers<[2], [1], [1], [2], [0, 0, 0, 1, 1, 2], [0], [0]>} : vector<2x8x8xbf16>, vector<2x8x16xbf16>, vector<2x8x16xf32> -> vector<2x8x16xf32>
    "tpu.trace_stop"() : () -> ()
    %613 = vector.shape_cast %612 : vector<2x8x16xf32> to vector<16x16xf32>
    %614 = arith.truncf %613 : vector<16x16xf32> to vector<16x16xbf16>
    %615 = vector.extract_strided_slice %521 {offsets = [1, 0, 0], sizes = [1, 16, 32], strides = [1, 1, 1]} : vector<2x16x32xbf16> to vector<1x16x32xbf16>
    %616 = vector.shape_cast %615 : vector<1x16x32xbf16> to vector<16x32xbf16>
    %cst_285 = arith.constant dense<0.000000e+00> : vector<16x32xf32>
    %617 = tpu.matmul %614, %616, %cst_285 {dimension_numbers = #tpu.dot_dimension_numbers<[1], [0], [0], [1], [0, 0, 1, 1], [], []>} : vector<16x16xbf16>, vector<16x32xbf16>, vector<16x32xf32> -> vector<16x32xf32>
    %618 = arith.addf %571, %617 : vector<16x32xf32>
    %619 = vector.broadcast %523 : vector<1x32xf32> to vector<16x32xf32>
    %620 = arith.addf %618, %619 : vector<16x32xf32>
    %621 = arith.addf %507, %620 : vector<16x32xf32>
    %c0_286 = arith.constant 0 : index
    %c0_287 = arith.constant 0 : index
    %c0_288 = arith.constant 0 : index
    %622 = vector.load %arg37[%c0_286, %c0_287, %c0_288] : memref<2x1x32xf32, #tpu.memory_space<vmem>>, vector<1x1x32xf32>
    %623 = vector.shape_cast %622 : vector<1x1x32xf32> to vector<1x32xf32>
    %c0_289 = arith.constant 0 : index
    %c0_290 = arith.constant 0 : index
    %c0_291 = arith.constant 0 : index
    %624 = vector.load %arg38[%c0_289, %c0_290, %c0_291] : memref<2x1x32xf32, #tpu.memory_space<vmem>>, vector<1x1x32xf32>
    %625 = vector.shape_cast %624 : vector<1x1x32xf32> to vector<1x32xf32>
    %cst_292 = arith.constant dense<0.000000e+00> : vector<16xf32>
    %626 = vector.multi_reduction <add>, %621, %cst_292 [1] : vector<16x32xf32> to vector<16xf32>
    %627 = vector.shape_cast %626 : vector<16xf32> to vector<16x1xf32>
    %cst_293 = arith.constant 3.200000e+01 : f32
    %628 = vector.broadcast %cst_293 : f32 to vector<16x1xf32>
    %629 = arith.divf %627, %628 : vector<16x1xf32>
    %630 = vector.broadcast %629 : vector<16x1xf32> to vector<16x32xf32>
    %631 = arith.subf %621, %630 : vector<16x32xf32>
    %632 = arith.mulf %631, %631 : vector<16x32xf32>
    %cst_294 = arith.constant dense<0.000000e+00> : vector<16xf32>
    %633 = vector.multi_reduction <add>, %632, %cst_294 [1] : vector<16x32xf32> to vector<16xf32>
    %634 = vector.shape_cast %633 : vector<16xf32> to vector<16x1xf32>
    %cst_295 = arith.constant 3.200000e+01 : f32
    %635 = vector.broadcast %cst_295 : f32 to vector<16x1xf32>
    %636 = arith.divf %634, %635 : vector<16x1xf32>
    %cst_296 = arith.constant 9.99999974E-6 : f32
    %637 = vector.broadcast %cst_296 : f32 to vector<16x1xf32>
    %638 = arith.addf %636, %637 : vector<16x1xf32>
    %639 = math.rsqrt %638 : vector<16x1xf32>
    %640 = vector.broadcast %639 : vector<16x1xf32> to vector<16x32xf32>
    %641 = arith.mulf %631, %640 : vector<16x32xf32>
    %642 = vector.broadcast %623 : vector<1x32xf32> to vector<16x32xf32>
    %643 = arith.mulf %641, %642 : vector<16x32xf32>
    %644 = vector.broadcast %625 : vector<1x32xf32> to vector<16x32xf32>
    %645 = arith.addf %643, %644 : vector<16x32xf32>
    %c0_297 = arith.constant 0 : index
    %c0_298 = arith.constant 0 : index
    %c0_299 = arith.constant 0 : index
    %646 = vector.load %arg39[%c0_297, %c0_298, %c0_299] : memref<2x32x64xbf16, #tpu.memory_space<vmem>>, vector<1x32x64xbf16>
    %647 = vector.shape_cast %646 : vector<1x32x64xbf16> to vector<32x64xbf16>
    %c0_300 = arith.constant 0 : index
    %c0_301 = arith.constant 0 : index
    %c0_302 = arith.constant 0 : index
    %648 = vector.load %arg40[%c0_300, %c0_301, %c0_302] : memref<2x1x64xf32, #tpu.memory_space<vmem>>, vector<1x1x64xf32>
    %649 = vector.shape_cast %648 : vector<1x1x64xf32> to vector<1x64xf32>
    %c0_303 = arith.constant 0 : index
    %c0_304 = arith.constant 0 : index
    %c0_305 = arith.constant 0 : index
    %650 = vector.load %arg41[%c0_303, %c0_304, %c0_305] : memref<2x64x32xbf16, #tpu.memory_space<vmem>>, vector<1x64x32xbf16>
    %651 = vector.shape_cast %650 : vector<1x64x32xbf16> to vector<64x32xbf16>
    %c0_306 = arith.constant 0 : index
    %c0_307 = arith.constant 0 : index
    %c0_308 = arith.constant 0 : index
    %652 = vector.load %arg42[%c0_306, %c0_307, %c0_308] : memref<2x1x32xf32, #tpu.memory_space<vmem>>, vector<1x1x32xf32>
    %653 = vector.shape_cast %652 : vector<1x1x32xf32> to vector<1x32xf32>
    %654 = arith.truncf %645 : vector<16x32xf32> to vector<16x32xbf16>
    %cst_309 = arith.constant dense<0.000000e+00> : vector<16x64xf32>
    %655 = tpu.matmul %654, %647, %cst_309 {dimension_numbers = #tpu.dot_dimension_numbers<[1], [0], [0], [1], [0, 0, 1, 1], [], []>} : vector<16x32xbf16>, vector<32x64xbf16>, vector<16x64xf32> -> vector<16x64xf32>
    %656 = vector.broadcast %649 : vector<1x64xf32> to vector<16x64xf32>
    %657 = arith.addf %655, %656 : vector<16x64xf32>
    %cst_310 = arith.constant 0.000000e+00 : f32
    %658 = vector.broadcast %cst_310 : f32 to vector<16x64xf32>
    %659 = arith.maximumf %657, %658 : vector<16x64xf32>
    %660 = arith.truncf %659 : vector<16x64xf32> to vector<16x64xbf16>
    %cst_311 = arith.constant dense<0.000000e+00> : vector<16x32xf32>
    %661 = tpu.matmul %660, %651, %cst_311 {dimension_numbers = #tpu.dot_dimension_numbers<[1], [0], [0], [1], [0, 0, 1, 1], [], []>} : vector<16x64xbf16>, vector<64x32xbf16>, vector<16x32xf32> -> vector<16x32xf32>
    %662 = vector.broadcast %653 : vector<1x32xf32> to vector<16x32xf32>
    %663 = arith.addf %661, %662 : vector<16x32xf32>
    %664 = arith.addf %645, %663 : vector<16x32xf32>
    %c0_312 = arith.constant 0 : index
    %c0_313 = arith.constant 0 : index
    %c0_314 = arith.constant 0 : index
    %665 = vector.load %arg43[%c0_312, %c0_313, %c0_314] : memref<2x1x32xf32, #tpu.memory_space<vmem>>, vector<1x1x32xf32>
    %666 = vector.shape_cast %665 : vector<1x1x32xf32> to vector<1x32xf32>
    %c0_315 = arith.constant 0 : index
    %c0_316 = arith.constant 0 : index
    %c0_317 = arith.constant 0 : index
    %667 = vector.load %arg44[%c0_315, %c0_316, %c0_317] : memref<2x1x32xf32, #tpu.memory_space<vmem>>, vector<1x1x32xf32>
    %668 = vector.shape_cast %667 : vector<1x1x32xf32> to vector<1x32xf32>
    %cst_318 = arith.constant dense<0.000000e+00> : vector<16xf32>
    %669 = vector.multi_reduction <add>, %664, %cst_318 [1] : vector<16x32xf32> to vector<16xf32>
    %670 = vector.shape_cast %669 : vector<16xf32> to vector<16x1xf32>
    %cst_319 = arith.constant 3.200000e+01 : f32
    %671 = vector.broadcast %cst_319 : f32 to vector<16x1xf32>
    %672 = arith.divf %670, %671 : vector<16x1xf32>
    %673 = vector.broadcast %672 : vector<16x1xf32> to vector<16x32xf32>
    %674 = arith.subf %664, %673 : vector<16x32xf32>
    %675 = arith.mulf %674, %674 : vector<16x32xf32>
    %cst_320 = arith.constant dense<0.000000e+00> : vector<16xf32>
    %676 = vector.multi_reduction <add>, %675, %cst_320 [1] : vector<16x32xf32> to vector<16xf32>
    %677 = vector.shape_cast %676 : vector<16xf32> to vector<16x1xf32>
    %cst_321 = arith.constant 3.200000e+01 : f32
    %678 = vector.broadcast %cst_321 : f32 to vector<16x1xf32>
    %679 = arith.divf %677, %678 : vector<16x1xf32>
    %cst_322 = arith.constant 9.99999974E-6 : f32
    %680 = vector.broadcast %cst_322 : f32 to vector<16x1xf32>
    %681 = arith.addf %679, %680 : vector<16x1xf32>
    %682 = math.rsqrt %681 : vector<16x1xf32>
    %683 = vector.broadcast %682 : vector<16x1xf32> to vector<16x32xf32>
    %684 = arith.mulf %674, %683 : vector<16x32xf32>
    %685 = vector.broadcast %666 : vector<1x32xf32> to vector<16x32xf32>
    %686 = arith.mulf %684, %685 : vector<16x32xf32>
    %687 = vector.broadcast %668 : vector<1x32xf32> to vector<16x32xf32>
    %688 = arith.addf %686, %687 : vector<16x32xf32>
    %c1_323 = arith.constant 1 : index
    %c0_324 = arith.constant 0 : index
    %c0_325 = arith.constant 0 : index
    %c0_326 = arith.constant 0 : index
    %689 = vector.load %arg19[%c1_323, %c0_324, %c0_325, %c0_326] : memref<2x2x32x16xbf16, #tpu.memory_space<vmem>>, vector<1x2x32x16xbf16>
    %690 = vector.shape_cast %689 : vector<1x2x32x16xbf16> to vector<2x32x16xbf16>
    %c1_327 = arith.constant 1 : index
    %c0_328 = arith.constant 0 : index
    %c0_329 = arith.constant 0 : index
    %c0_330 = arith.constant 0 : index
    %691 = vector.load %arg20[%c1_327, %c0_328, %c0_329, %c0_330] : memref<2x2x1x16xf32, #tpu.memory_space<vmem>>, vector<1x2x1x16xf32>
    %692 = vector.shape_cast %691 : vector<1x2x1x16xf32> to vector<2x1x16xf32>
    %c1_331 = arith.constant 1 : index
    %c0_332 = arith.constant 0 : index
    %c0_333 = arith.constant 0 : index
    %c0_334 = arith.constant 0 : index
    %693 = vector.load %arg21[%c1_331, %c0_332, %c0_333, %c0_334] : memref<2x2x32x16xbf16, #tpu.memory_space<vmem>>, vector<1x2x32x16xbf16>
    %694 = vector.shape_cast %693 : vector<1x2x32x16xbf16> to vector<2x32x16xbf16>
    %c1_335 = arith.constant 1 : index
    %c0_336 = arith.constant 0 : index
    %c0_337 = arith.constant 0 : index
    %c0_338 = arith.constant 0 : index
    %695 = vector.load %arg22[%c1_335, %c0_336, %c0_337, %c0_338] : memref<2x2x1x16xf32, #tpu.memory_space<vmem>>, vector<1x2x1x16xf32>
    %696 = vector.shape_cast %695 : vector<1x2x1x16xf32> to vector<2x1x16xf32>
    %c1_339 = arith.constant 1 : index
    %c0_340 = arith.constant 0 : index
    %c0_341 = arith.constant 0 : index
    %c0_342 = arith.constant 0 : index
    %697 = vector.load %arg23[%c1_339, %c0_340, %c0_341, %c0_342] : memref<2x2x32x16xbf16, #tpu.memory_space<vmem>>, vector<1x2x32x16xbf16>
    %698 = vector.shape_cast %697 : vector<1x2x32x16xbf16> to vector<2x32x16xbf16>
    %c1_343 = arith.constant 1 : index
    %c0_344 = arith.constant 0 : index
    %c0_345 = arith.constant 0 : index
    %c0_346 = arith.constant 0 : index
    %699 = vector.load %arg24[%c1_343, %c0_344, %c0_345, %c0_346] : memref<2x2x1x16xf32, #tpu.memory_space<vmem>>, vector<1x2x1x16xf32>
    %700 = vector.shape_cast %699 : vector<1x2x1x16xf32> to vector<2x1x16xf32>
    %c1_347 = arith.constant 1 : index
    %c0_348 = arith.constant 0 : index
    %c0_349 = arith.constant 0 : index
    %c0_350 = arith.constant 0 : index
    %701 = vector.load %arg25[%c1_347, %c0_348, %c0_349, %c0_350] : memref<2x2x16x32xbf16, #tpu.memory_space<vmem>>, vector<1x2x16x32xbf16>
    %702 = vector.shape_cast %701 : vector<1x2x16x32xbf16> to vector<2x16x32xbf16>
    %c1_351 = arith.constant 1 : index
    %c0_352 = arith.constant 0 : index
    %c0_353 = arith.constant 0 : index
    %703 = vector.load %arg26[%c1_351, %c0_352, %c0_353] : memref<2x1x32xf32, #tpu.memory_space<vmem>>, vector<1x1x32xf32>
    %704 = vector.shape_cast %703 : vector<1x1x32xf32> to vector<1x32xf32>
    %705 = arith.truncf %688 : vector<16x32xf32> to vector<16x32xbf16>
    %706 = arith.truncf %688 : vector<16x32xf32> to vector<16x32xbf16>
    %707 = vector.extract_strided_slice %690 {offsets = [0, 0, 0], sizes = [1, 32, 16], strides = [1, 1, 1]} : vector<2x32x16xbf16> to vector<1x32x16xbf16>
    %708 = vector.shape_cast %707 : vector<1x32x16xbf16> to vector<32x16xbf16>
    %cst_354 = arith.constant dense<0.000000e+00> : vector<16x16xf32>
    %709 = tpu.matmul %705, %708, %cst_354 {dimension_numbers = #tpu.dot_dimension_numbers<[1], [0], [0], [1], [0, 0, 1, 1], [], []>} : vector<16x32xbf16>, vector<32x16xbf16>, vector<16x16xf32> -> vector<16x16xf32>
    %710 = vector.extract_strided_slice %692 {offsets = [0, 0, 0], sizes = [1, 1, 16], strides = [1, 1, 1]} : vector<2x1x16xf32> to vector<1x1x16xf32>
    %711 = vector.shape_cast %710 : vector<1x1x16xf32> to vector<1x16xf32>
    %712 = vector.broadcast %711 : vector<1x16xf32> to vector<16x16xf32>
    %713 = arith.addf %709, %712 : vector<16x16xf32>
    %714 = vector.extract_strided_slice %694 {offsets = [0, 0, 0], sizes = [1, 32, 16], strides = [1, 1, 1]} : vector<2x32x16xbf16> to vector<1x32x16xbf16>
    %715 = vector.shape_cast %714 : vector<1x32x16xbf16> to vector<32x16xbf16>
    %cst_355 = arith.constant dense<0.000000e+00> : vector<16x16xf32>
    %716 = tpu.matmul %706, %715, %cst_355 {dimension_numbers = #tpu.dot_dimension_numbers<[1], [0], [0], [1], [0, 0, 1, 1], [], []>} : vector<16x32xbf16>, vector<32x16xbf16>, vector<16x16xf32> -> vector<16x16xf32>
    %717 = vector.extract_strided_slice %696 {offsets = [0, 0, 0], sizes = [1, 1, 16], strides = [1, 1, 1]} : vector<2x1x16xf32> to vector<1x1x16xf32>
    %718 = vector.shape_cast %717 : vector<1x1x16xf32> to vector<1x16xf32>
    %719 = vector.broadcast %718 : vector<1x16xf32> to vector<16x16xf32>
    %720 = arith.addf %716, %719 : vector<16x16xf32>
    %721 = vector.extract_strided_slice %698 {offsets = [0, 0, 0], sizes = [1, 32, 16], strides = [1, 1, 1]} : vector<2x32x16xbf16> to vector<1x32x16xbf16>
    %722 = vector.shape_cast %721 : vector<1x32x16xbf16> to vector<32x16xbf16>
    %cst_356 = arith.constant dense<0.000000e+00> : vector<16x16xf32>
    %723 = tpu.matmul %706, %722, %cst_356 {dimension_numbers = #tpu.dot_dimension_numbers<[1], [0], [0], [1], [0, 0, 1, 1], [], []>} : vector<16x32xbf16>, vector<32x16xbf16>, vector<16x16xf32> -> vector<16x16xf32>
    %724 = vector.extract_strided_slice %700 {offsets = [0, 0, 0], sizes = [1, 1, 16], strides = [1, 1, 1]} : vector<2x1x16xf32> to vector<1x1x16xf32>
    %725 = vector.shape_cast %724 : vector<1x1x16xf32> to vector<1x16xf32>
    %726 = vector.broadcast %725 : vector<1x16xf32> to vector<16x16xf32>
    %727 = arith.addf %723, %726 : vector<16x16xf32>
    %cst_357 = arith.constant 2.500000e-01 : f32
    %728 = vector.broadcast %cst_357 : f32 to vector<16x16xf32>
    %729 = arith.mulf %713, %728 : vector<16x16xf32>
    %730 = arith.truncf %729 : vector<16x16xf32> to vector<16x16xbf16>
    %731 = vector.shape_cast %730 : vector<16x16xbf16> to vector<2x8x16xbf16>
    %732 = arith.truncf %720 : vector<16x16xf32> to vector<16x16xbf16>
    %733 = vector.shape_cast %732 : vector<16x16xbf16> to vector<2x8x16xbf16>
    %734 = arith.truncf %727 : vector<16x16xf32> to vector<16x16xbf16>
    %735 = vector.shape_cast %734 : vector<16x16xbf16> to vector<2x8x16xbf16>
    "tpu.trace_start"() <{level = 10 : i32, message = "bqd,bkd->bqk"}> : () -> ()
    %cst_358 = arith.constant dense<0.000000e+00> : vector<2x8x8xf32>
    %736 = tpu.matmul %731, %733, %cst_358 {dimension_numbers = #tpu.dot_dimension_numbers<[2], [2], [1], [1], [0, 0, 0, 1, 1, 1], [0], [0]>} : vector<2x8x16xbf16>, vector<2x8x16xbf16>, vector<2x8x8xf32> -> vector<2x8x8xf32>
    "tpu.trace_stop"() : () -> ()
    %cst_359 = arith.constant dense<0xFF800000> : vector<2x8xf32>
    %737 = vector.multi_reduction <maximumf>, %736, %cst_359 [2] : vector<2x8x8xf32> to vector<2x8xf32>
    %738 = vector.shape_cast %737 : vector<2x8xf32> to vector<2x8x1xf32>
    %739 = vector.broadcast %738 : vector<2x8x1xf32> to vector<2x8x8xf32>
    %740 = arith.subf %736, %739 : vector<2x8x8xf32>
    %741 = math.exp %740 : vector<2x8x8xf32>
    %cst_360 = arith.constant dense<0.000000e+00> : vector<2x8xf32>
    %742 = vector.multi_reduction <add>, %741, %cst_360 [2] : vector<2x8x8xf32> to vector<2x8xf32>
    %743 = vector.shape_cast %742 : vector<2x8xf32> to vector<2x8x1xf32>
    %744 = vector.broadcast %743 : vector<2x8x1xf32> to vector<2x8x8xf32>
    %745 = arith.divf %741, %744 : vector<2x8x8xf32>
    %746 = arith.truncf %745 : vector<2x8x8xf32> to vector<2x8x8xbf16>
    "tpu.trace_start"() <{level = 10 : i32, message = "bqk,bkd->bqd"}> : () -> ()
    %cst_361 = arith.constant dense<0.000000e+00> : vector<2x8x16xf32>
    %747 = tpu.matmul %746, %735, %cst_361 {dimension_numbers = #tpu.dot_dimension_numbers<[2], [1], [1], [2], [0, 0, 0, 1, 1, 2], [0], [0]>} : vector<2x8x8xbf16>, vector<2x8x16xbf16>, vector<2x8x16xf32> -> vector<2x8x16xf32>
    "tpu.trace_stop"() : () -> ()
    %748 = vector.shape_cast %747 : vector<2x8x16xf32> to vector<16x16xf32>
    %749 = arith.truncf %748 : vector<16x16xf32> to vector<16x16xbf16>
    %750 = vector.extract_strided_slice %702 {offsets = [0, 0, 0], sizes = [1, 16, 32], strides = [1, 1, 1]} : vector<2x16x32xbf16> to vector<1x16x32xbf16>
    %751 = vector.shape_cast %750 : vector<1x16x32xbf16> to vector<16x32xbf16>
    %cst_362 = arith.constant dense<0.000000e+00> : vector<16x32xf32>
    %752 = tpu.matmul %749, %751, %cst_362 {dimension_numbers = #tpu.dot_dimension_numbers<[1], [0], [0], [1], [0, 0, 1, 1], [], []>} : vector<16x16xbf16>, vector<16x32xbf16>, vector<16x32xf32> -> vector<16x32xf32>
    %753 = vector.extract_strided_slice %690 {offsets = [1, 0, 0], sizes = [1, 32, 16], strides = [1, 1, 1]} : vector<2x32x16xbf16> to vector<1x32x16xbf16>
    %754 = vector.shape_cast %753 : vector<1x32x16xbf16> to vector<32x16xbf16>
    %cst_363 = arith.constant dense<0.000000e+00> : vector<16x16xf32>
    %755 = tpu.matmul %705, %754, %cst_363 {dimension_numbers = #tpu.dot_dimension_numbers<[1], [0], [0], [1], [0, 0, 1, 1], [], []>} : vector<16x32xbf16>, vector<32x16xbf16>, vector<16x16xf32> -> vector<16x16xf32>
    %756 = vector.extract_strided_slice %692 {offsets = [1, 0, 0], sizes = [1, 1, 16], strides = [1, 1, 1]} : vector<2x1x16xf32> to vector<1x1x16xf32>
    %757 = vector.shape_cast %756 : vector<1x1x16xf32> to vector<1x16xf32>
    %758 = vector.broadcast %757 : vector<1x16xf32> to vector<16x16xf32>
    %759 = arith.addf %755, %758 : vector<16x16xf32>
    %760 = vector.extract_strided_slice %694 {offsets = [1, 0, 0], sizes = [1, 32, 16], strides = [1, 1, 1]} : vector<2x32x16xbf16> to vector<1x32x16xbf16>
    %761 = vector.shape_cast %760 : vector<1x32x16xbf16> to vector<32x16xbf16>
    %cst_364 = arith.constant dense<0.000000e+00> : vector<16x16xf32>
    %762 = tpu.matmul %706, %761, %cst_364 {dimension_numbers = #tpu.dot_dimension_numbers<[1], [0], [0], [1], [0, 0, 1, 1], [], []>} : vector<16x32xbf16>, vector<32x16xbf16>, vector<16x16xf32> -> vector<16x16xf32>
    %763 = vector.extract_strided_slice %696 {offsets = [1, 0, 0], sizes = [1, 1, 16], strides = [1, 1, 1]} : vector<2x1x16xf32> to vector<1x1x16xf32>
    %764 = vector.shape_cast %763 : vector<1x1x16xf32> to vector<1x16xf32>
    %765 = vector.broadcast %764 : vector<1x16xf32> to vector<16x16xf32>
    %766 = arith.addf %762, %765 : vector<16x16xf32>
    %767 = vector.extract_strided_slice %698 {offsets = [1, 0, 0], sizes = [1, 32, 16], strides = [1, 1, 1]} : vector<2x32x16xbf16> to vector<1x32x16xbf16>
    %768 = vector.shape_cast %767 : vector<1x32x16xbf16> to vector<32x16xbf16>
    %cst_365 = arith.constant dense<0.000000e+00> : vector<16x16xf32>
    %769 = tpu.matmul %706, %768, %cst_365 {dimension_numbers = #tpu.dot_dimension_numbers<[1], [0], [0], [1], [0, 0, 1, 1], [], []>} : vector<16x32xbf16>, vector<32x16xbf16>, vector<16x16xf32> -> vector<16x16xf32>
    %770 = vector.extract_strided_slice %700 {offsets = [1, 0, 0], sizes = [1, 1, 16], strides = [1, 1, 1]} : vector<2x1x16xf32> to vector<1x1x16xf32>
    %771 = vector.shape_cast %770 : vector<1x1x16xf32> to vector<1x16xf32>
    %772 = vector.broadcast %771 : vector<1x16xf32> to vector<16x16xf32>
    %773 = arith.addf %769, %772 : vector<16x16xf32>
    %cst_366 = arith.constant 2.500000e-01 : f32
    %774 = vector.broadcast %cst_366 : f32 to vector<16x16xf32>
    %775 = arith.mulf %759, %774 : vector<16x16xf32>
    %776 = arith.truncf %775 : vector<16x16xf32> to vector<16x16xbf16>
    %777 = vector.shape_cast %776 : vector<16x16xbf16> to vector<2x8x16xbf16>
    %778 = arith.truncf %766 : vector<16x16xf32> to vector<16x16xbf16>
    %779 = vector.shape_cast %778 : vector<16x16xbf16> to vector<2x8x16xbf16>
    %780 = arith.truncf %773 : vector<16x16xf32> to vector<16x16xbf16>
    %781 = vector.shape_cast %780 : vector<16x16xbf16> to vector<2x8x16xbf16>
    "tpu.trace_start"() <{level = 10 : i32, message = "bqd,bkd->bqk"}> : () -> ()
    %cst_367 = arith.constant dense<0.000000e+00> : vector<2x8x8xf32>
    %782 = tpu.matmul %777, %779, %cst_367 {dimension_numbers = #tpu.dot_dimension_numbers<[2], [2], [1], [1], [0, 0, 0, 1, 1, 1], [0], [0]>} : vector<2x8x16xbf16>, vector<2x8x16xbf16>, vector<2x8x8xf32> -> vector<2x8x8xf32>
    "tpu.trace_stop"() : () -> ()
    %cst_368 = arith.constant dense<0xFF800000> : vector<2x8xf32>
    %783 = vector.multi_reduction <maximumf>, %782, %cst_368 [2] : vector<2x8x8xf32> to vector<2x8xf32>
    %784 = vector.shape_cast %783 : vector<2x8xf32> to vector<2x8x1xf32>
    %785 = vector.broadcast %784 : vector<2x8x1xf32> to vector<2x8x8xf32>
    %786 = arith.subf %782, %785 : vector<2x8x8xf32>
    %787 = math.exp %786 : vector<2x8x8xf32>
    %cst_369 = arith.constant dense<0.000000e+00> : vector<2x8xf32>
    %788 = vector.multi_reduction <add>, %787, %cst_369 [2] : vector<2x8x8xf32> to vector<2x8xf32>
    %789 = vector.shape_cast %788 : vector<2x8xf32> to vector<2x8x1xf32>
    %790 = vector.broadcast %789 : vector<2x8x1xf32> to vector<2x8x8xf32>
    %791 = arith.divf %787, %790 : vector<2x8x8xf32>
    %792 = arith.truncf %791 : vector<2x8x8xf32> to vector<2x8x8xbf16>
    "tpu.trace_start"() <{level = 10 : i32, message = "bqk,bkd->bqd"}> : () -> ()
    %cst_370 = arith.constant dense<0.000000e+00> : vector<2x8x16xf32>
    %793 = tpu.matmul %792, %781, %cst_370 {dimension_numbers = #tpu.dot_dimension_numbers<[2], [1], [1], [2], [0, 0, 0, 1, 1, 2], [0], [0]>} : vector<2x8x8xbf16>, vector<2x8x16xbf16>, vector<2x8x16xf32> -> vector<2x8x16xf32>
    "tpu.trace_stop"() : () -> ()
    %794 = vector.shape_cast %793 : vector<2x8x16xf32> to vector<16x16xf32>
    %795 = arith.truncf %794 : vector<16x16xf32> to vector<16x16xbf16>
    %796 = vector.extract_strided_slice %702 {offsets = [1, 0, 0], sizes = [1, 16, 32], strides = [1, 1, 1]} : vector<2x16x32xbf16> to vector<1x16x32xbf16>
    %797 = vector.shape_cast %796 : vector<1x16x32xbf16> to vector<16x32xbf16>
    %cst_371 = arith.constant dense<0.000000e+00> : vector<16x32xf32>
    %798 = tpu.matmul %795, %797, %cst_371 {dimension_numbers = #tpu.dot_dimension_numbers<[1], [0], [0], [1], [0, 0, 1, 1], [], []>} : vector<16x16xbf16>, vector<16x32xbf16>, vector<16x32xf32> -> vector<16x32xf32>
    %799 = arith.addf %752, %798 : vector<16x32xf32>
    %800 = vector.broadcast %704 : vector<1x32xf32> to vector<16x32xf32>
    %801 = arith.addf %799, %800 : vector<16x32xf32>
    %802 = arith.addf %688, %801 : vector<16x32xf32>
    %c1_372 = arith.constant 1 : index
    %c0_373 = arith.constant 0 : index
    %c0_374 = arith.constant 0 : index
    %803 = vector.load %arg27[%c1_372, %c0_373, %c0_374] : memref<2x1x32xf32, #tpu.memory_space<vmem>>, vector<1x1x32xf32>
    %804 = vector.shape_cast %803 : vector<1x1x32xf32> to vector<1x32xf32>
    %c1_375 = arith.constant 1 : index
    %c0_376 = arith.constant 0 : index
    %c0_377 = arith.constant 0 : index
    %805 = vector.load %arg28[%c1_375, %c0_376, %c0_377] : memref<2x1x32xf32, #tpu.memory_space<vmem>>, vector<1x1x32xf32>
    %806 = vector.shape_cast %805 : vector<1x1x32xf32> to vector<1x32xf32>
    %cst_378 = arith.constant dense<0.000000e+00> : vector<16xf32>
    %807 = vector.multi_reduction <add>, %802, %cst_378 [1] : vector<16x32xf32> to vector<16xf32>
    %808 = vector.shape_cast %807 : vector<16xf32> to vector<16x1xf32>
    %cst_379 = arith.constant 3.200000e+01 : f32
    %809 = vector.broadcast %cst_379 : f32 to vector<16x1xf32>
    %810 = arith.divf %808, %809 : vector<16x1xf32>
    %811 = vector.broadcast %810 : vector<16x1xf32> to vector<16x32xf32>
    %812 = arith.subf %802, %811 : vector<16x32xf32>
    %813 = arith.mulf %812, %812 : vector<16x32xf32>
    %cst_380 = arith.constant dense<0.000000e+00> : vector<16xf32>
    %814 = vector.multi_reduction <add>, %813, %cst_380 [1] : vector<16x32xf32> to vector<16xf32>
    %815 = vector.shape_cast %814 : vector<16xf32> to vector<16x1xf32>
    %cst_381 = arith.constant 3.200000e+01 : f32
    %816 = vector.broadcast %cst_381 : f32 to vector<16x1xf32>
    %817 = arith.divf %815, %816 : vector<16x1xf32>
    %cst_382 = arith.constant 9.99999974E-6 : f32
    %818 = vector.broadcast %cst_382 : f32 to vector<16x1xf32>
    %819 = arith.addf %817, %818 : vector<16x1xf32>
    %820 = math.rsqrt %819 : vector<16x1xf32>
    %821 = vector.broadcast %820 : vector<16x1xf32> to vector<16x32xf32>
    %822 = arith.mulf %812, %821 : vector<16x32xf32>
    %823 = vector.broadcast %804 : vector<1x32xf32> to vector<16x32xf32>
    %824 = arith.mulf %822, %823 : vector<16x32xf32>
    %825 = vector.broadcast %806 : vector<1x32xf32> to vector<16x32xf32>
    %826 = arith.addf %824, %825 : vector<16x32xf32>
    %c1_383 = arith.constant 1 : index
    %c0_384 = arith.constant 0 : index
    %c0_385 = arith.constant 0 : index
    %c0_386 = arith.constant 0 : index
    %827 = vector.load %arg29[%c1_383, %c0_384, %c0_385, %c0_386] : memref<2x2x32x16xbf16, #tpu.memory_space<vmem>>, vector<1x2x32x16xbf16>
    %828 = vector.shape_cast %827 : vector<1x2x32x16xbf16> to vector<2x32x16xbf16>
    %c1_387 = arith.constant 1 : index
    %c0_388 = arith.constant 0 : index
    %c0_389 = arith.constant 0 : index
    %c0_390 = arith.constant 0 : index
    %829 = vector.load %arg30[%c1_387, %c0_388, %c0_389, %c0_390] : memref<2x2x1x16xf32, #tpu.memory_space<vmem>>, vector<1x2x1x16xf32>
    %830 = vector.shape_cast %829 : vector<1x2x1x16xf32> to vector<2x1x16xf32>
    %c1_391 = arith.constant 1 : index
    %c0_392 = arith.constant 0 : index
    %c0_393 = arith.constant 0 : index
    %c0_394 = arith.constant 0 : index
    %831 = vector.load %arg31[%c1_391, %c0_392, %c0_393, %c0_394] : memref<2x2x32x16xbf16, #tpu.memory_space<vmem>>, vector<1x2x32x16xbf16>
    %832 = vector.shape_cast %831 : vector<1x2x32x16xbf16> to vector<2x32x16xbf16>
    %c1_395 = arith.constant 1 : index
    %c0_396 = arith.constant 0 : index
    %c0_397 = arith.constant 0 : index
    %c0_398 = arith.constant 0 : index
    %833 = vector.load %arg32[%c1_395, %c0_396, %c0_397, %c0_398] : memref<2x2x1x16xf32, #tpu.memory_space<vmem>>, vector<1x2x1x16xf32>
    %834 = vector.shape_cast %833 : vector<1x2x1x16xf32> to vector<2x1x16xf32>
    %c1_399 = arith.constant 1 : index
    %c0_400 = arith.constant 0 : index
    %c0_401 = arith.constant 0 : index
    %c0_402 = arith.constant 0 : index
    %835 = vector.load %arg33[%c1_399, %c0_400, %c0_401, %c0_402] : memref<2x2x32x16xbf16, #tpu.memory_space<vmem>>, vector<1x2x32x16xbf16>
    %836 = vector.shape_cast %835 : vector<1x2x32x16xbf16> to vector<2x32x16xbf16>
    %c1_403 = arith.constant 1 : index
    %c0_404 = arith.constant 0 : index
    %c0_405 = arith.constant 0 : index
    %c0_406 = arith.constant 0 : index
    %837 = vector.load %arg34[%c1_403, %c0_404, %c0_405, %c0_406] : memref<2x2x1x16xf32, #tpu.memory_space<vmem>>, vector<1x2x1x16xf32>
    %838 = vector.shape_cast %837 : vector<1x2x1x16xf32> to vector<2x1x16xf32>
    %c1_407 = arith.constant 1 : index
    %c0_408 = arith.constant 0 : index
    %c0_409 = arith.constant 0 : index
    %c0_410 = arith.constant 0 : index
    %839 = vector.load %arg35[%c1_407, %c0_408, %c0_409, %c0_410] : memref<2x2x16x32xbf16, #tpu.memory_space<vmem>>, vector<1x2x16x32xbf16>
    %840 = vector.shape_cast %839 : vector<1x2x16x32xbf16> to vector<2x16x32xbf16>
    %c1_411 = arith.constant 1 : index
    %c0_412 = arith.constant 0 : index
    %c0_413 = arith.constant 0 : index
    %841 = vector.load %arg36[%c1_411, %c0_412, %c0_413] : memref<2x1x32xf32, #tpu.memory_space<vmem>>, vector<1x1x32xf32>
    %842 = vector.shape_cast %841 : vector<1x1x32xf32> to vector<1x32xf32>
    %843 = arith.truncf %826 : vector<16x32xf32> to vector<16x32xbf16>
    %844 = arith.truncf %369 : vector<16x32xf32> to vector<16x32xbf16>
    %845 = vector.extract_strided_slice %828 {offsets = [0, 0, 0], sizes = [1, 32, 16], strides = [1, 1, 1]} : vector<2x32x16xbf16> to vector<1x32x16xbf16>
    %846 = vector.shape_cast %845 : vector<1x32x16xbf16> to vector<32x16xbf16>
    %cst_414 = arith.constant dense<0.000000e+00> : vector<16x16xf32>
    %847 = tpu.matmul %843, %846, %cst_414 {dimension_numbers = #tpu.dot_dimension_numbers<[1], [0], [0], [1], [0, 0, 1, 1], [], []>} : vector<16x32xbf16>, vector<32x16xbf16>, vector<16x16xf32> -> vector<16x16xf32>
    %848 = vector.extract_strided_slice %830 {offsets = [0, 0, 0], sizes = [1, 1, 16], strides = [1, 1, 1]} : vector<2x1x16xf32> to vector<1x1x16xf32>
    %849 = vector.shape_cast %848 : vector<1x1x16xf32> to vector<1x16xf32>
    %850 = vector.broadcast %849 : vector<1x16xf32> to vector<16x16xf32>
    %851 = arith.addf %847, %850 : vector<16x16xf32>
    %852 = vector.extract_strided_slice %832 {offsets = [0, 0, 0], sizes = [1, 32, 16], strides = [1, 1, 1]} : vector<2x32x16xbf16> to vector<1x32x16xbf16>
    %853 = vector.shape_cast %852 : vector<1x32x16xbf16> to vector<32x16xbf16>
    %cst_415 = arith.constant dense<0.000000e+00> : vector<16x16xf32>
    %854 = tpu.matmul %844, %853, %cst_415 {dimension_numbers = #tpu.dot_dimension_numbers<[1], [0], [0], [1], [0, 0, 1, 1], [], []>} : vector<16x32xbf16>, vector<32x16xbf16>, vector<16x16xf32> -> vector<16x16xf32>
    %855 = vector.extract_strided_slice %834 {offsets = [0, 0, 0], sizes = [1, 1, 16], strides = [1, 1, 1]} : vector<2x1x16xf32> to vector<1x1x16xf32>
    %856 = vector.shape_cast %855 : vector<1x1x16xf32> to vector<1x16xf32>
    %857 = vector.broadcast %856 : vector<1x16xf32> to vector<16x16xf32>
    %858 = arith.addf %854, %857 : vector<16x16xf32>
    %859 = vector.extract_strided_slice %836 {offsets = [0, 0, 0], sizes = [1, 32, 16], strides = [1, 1, 1]} : vector<2x32x16xbf16> to vector<1x32x16xbf16>
    %860 = vector.shape_cast %859 : vector<1x32x16xbf16> to vector<32x16xbf16>
    %cst_416 = arith.constant dense<0.000000e+00> : vector<16x16xf32>
    %861 = tpu.matmul %844, %860, %cst_416 {dimension_numbers = #tpu.dot_dimension_numbers<[1], [0], [0], [1], [0, 0, 1, 1], [], []>} : vector<16x32xbf16>, vector<32x16xbf16>, vector<16x16xf32> -> vector<16x16xf32>
    %862 = vector.extract_strided_slice %838 {offsets = [0, 0, 0], sizes = [1, 1, 16], strides = [1, 1, 1]} : vector<2x1x16xf32> to vector<1x1x16xf32>
    %863 = vector.shape_cast %862 : vector<1x1x16xf32> to vector<1x16xf32>
    %864 = vector.broadcast %863 : vector<1x16xf32> to vector<16x16xf32>
    %865 = arith.addf %861, %864 : vector<16x16xf32>
    %cst_417 = arith.constant 2.500000e-01 : f32
    %866 = vector.broadcast %cst_417 : f32 to vector<16x16xf32>
    %867 = arith.mulf %851, %866 : vector<16x16xf32>
    %868 = arith.truncf %867 : vector<16x16xf32> to vector<16x16xbf16>
    %869 = vector.shape_cast %868 : vector<16x16xbf16> to vector<2x8x16xbf16>
    %870 = arith.truncf %858 : vector<16x16xf32> to vector<16x16xbf16>
    %871 = vector.shape_cast %870 : vector<16x16xbf16> to vector<2x8x16xbf16>
    %872 = arith.truncf %865 : vector<16x16xf32> to vector<16x16xbf16>
    %873 = vector.shape_cast %872 : vector<16x16xbf16> to vector<2x8x16xbf16>
    "tpu.trace_start"() <{level = 10 : i32, message = "bqd,bkd->bqk"}> : () -> ()
    %cst_418 = arith.constant dense<0.000000e+00> : vector<2x8x8xf32>
    %874 = tpu.matmul %869, %871, %cst_418 {dimension_numbers = #tpu.dot_dimension_numbers<[2], [2], [1], [1], [0, 0, 0, 1, 1, 1], [0], [0]>} : vector<2x8x16xbf16>, vector<2x8x16xbf16>, vector<2x8x8xf32> -> vector<2x8x8xf32>
    "tpu.trace_stop"() : () -> ()
    %cst_419 = arith.constant dense<0xFF800000> : vector<2x8xf32>
    %875 = vector.multi_reduction <maximumf>, %874, %cst_419 [2] : vector<2x8x8xf32> to vector<2x8xf32>
    %876 = vector.shape_cast %875 : vector<2x8xf32> to vector<2x8x1xf32>
    %877 = vector.broadcast %876 : vector<2x8x1xf32> to vector<2x8x8xf32>
    %878 = arith.subf %874, %877 : vector<2x8x8xf32>
    %879 = math.exp %878 : vector<2x8x8xf32>
    %cst_420 = arith.constant dense<0.000000e+00> : vector<2x8xf32>
    %880 = vector.multi_reduction <add>, %879, %cst_420 [2] : vector<2x8x8xf32> to vector<2x8xf32>
    %881 = vector.shape_cast %880 : vector<2x8xf32> to vector<2x8x1xf32>
    %882 = vector.broadcast %881 : vector<2x8x1xf32> to vector<2x8x8xf32>
    %883 = arith.divf %879, %882 : vector<2x8x8xf32>
    %884 = arith.truncf %883 : vector<2x8x8xf32> to vector<2x8x8xbf16>
    "tpu.trace_start"() <{level = 10 : i32, message = "bqk,bkd->bqd"}> : () -> ()
    %cst_421 = arith.constant dense<0.000000e+00> : vector<2x8x16xf32>
    %885 = tpu.matmul %884, %873, %cst_421 {dimension_numbers = #tpu.dot_dimension_numbers<[2], [1], [1], [2], [0, 0, 0, 1, 1, 2], [0], [0]>} : vector<2x8x8xbf16>, vector<2x8x16xbf16>, vector<2x8x16xf32> -> vector<2x8x16xf32>
    "tpu.trace_stop"() : () -> ()
    %886 = vector.shape_cast %885 : vector<2x8x16xf32> to vector<16x16xf32>
    %887 = arith.truncf %886 : vector<16x16xf32> to vector<16x16xbf16>
    %888 = vector.extract_strided_slice %840 {offsets = [0, 0, 0], sizes = [1, 16, 32], strides = [1, 1, 1]} : vector<2x16x32xbf16> to vector<1x16x32xbf16>
    %889 = vector.shape_cast %888 : vector<1x16x32xbf16> to vector<16x32xbf16>
    %cst_422 = arith.constant dense<0.000000e+00> : vector<16x32xf32>
    %890 = tpu.matmul %887, %889, %cst_422 {dimension_numbers = #tpu.dot_dimension_numbers<[1], [0], [0], [1], [0, 0, 1, 1], [], []>} : vector<16x16xbf16>, vector<16x32xbf16>, vector<16x32xf32> -> vector<16x32xf32>
    %891 = vector.extract_strided_slice %828 {offsets = [1, 0, 0], sizes = [1, 32, 16], strides = [1, 1, 1]} : vector<2x32x16xbf16> to vector<1x32x16xbf16>
    %892 = vector.shape_cast %891 : vector<1x32x16xbf16> to vector<32x16xbf16>
    %cst_423 = arith.constant dense<0.000000e+00> : vector<16x16xf32>
    %893 = tpu.matmul %843, %892, %cst_423 {dimension_numbers = #tpu.dot_dimension_numbers<[1], [0], [0], [1], [0, 0, 1, 1], [], []>} : vector<16x32xbf16>, vector<32x16xbf16>, vector<16x16xf32> -> vector<16x16xf32>
    %894 = vector.extract_strided_slice %830 {offsets = [1, 0, 0], sizes = [1, 1, 16], strides = [1, 1, 1]} : vector<2x1x16xf32> to vector<1x1x16xf32>
    %895 = vector.shape_cast %894 : vector<1x1x16xf32> to vector<1x16xf32>
    %896 = vector.broadcast %895 : vector<1x16xf32> to vector<16x16xf32>
    %897 = arith.addf %893, %896 : vector<16x16xf32>
    %898 = vector.extract_strided_slice %832 {offsets = [1, 0, 0], sizes = [1, 32, 16], strides = [1, 1, 1]} : vector<2x32x16xbf16> to vector<1x32x16xbf16>
    %899 = vector.shape_cast %898 : vector<1x32x16xbf16> to vector<32x16xbf16>
    %cst_424 = arith.constant dense<0.000000e+00> : vector<16x16xf32>
    %900 = tpu.matmul %844, %899, %cst_424 {dimension_numbers = #tpu.dot_dimension_numbers<[1], [0], [0], [1], [0, 0, 1, 1], [], []>} : vector<16x32xbf16>, vector<32x16xbf16>, vector<16x16xf32> -> vector<16x16xf32>
    %901 = vector.extract_strided_slice %834 {offsets = [1, 0, 0], sizes = [1, 1, 16], strides = [1, 1, 1]} : vector<2x1x16xf32> to vector<1x1x16xf32>
    %902 = vector.shape_cast %901 : vector<1x1x16xf32> to vector<1x16xf32>
    %903 = vector.broadcast %902 : vector<1x16xf32> to vector<16x16xf32>
    %904 = arith.addf %900, %903 : vector<16x16xf32>
    %905 = vector.extract_strided_slice %836 {offsets = [1, 0, 0], sizes = [1, 32, 16], strides = [1, 1, 1]} : vector<2x32x16xbf16> to vector<1x32x16xbf16>
    %906 = vector.shape_cast %905 : vector<1x32x16xbf16> to vector<32x16xbf16>
    %cst_425 = arith.constant dense<0.000000e+00> : vector<16x16xf32>
    %907 = tpu.matmul %844, %906, %cst_425 {dimension_numbers = #tpu.dot_dimension_numbers<[1], [0], [0], [1], [0, 0, 1, 1], [], []>} : vector<16x32xbf16>, vector<32x16xbf16>, vector<16x16xf32> -> vector<16x16xf32>
    %908 = vector.extract_strided_slice %838 {offsets = [1, 0, 0], sizes = [1, 1, 16], strides = [1, 1, 1]} : vector<2x1x16xf32> to vector<1x1x16xf32>
    %909 = vector.shape_cast %908 : vector<1x1x16xf32> to vector<1x16xf32>
    %910 = vector.broadcast %909 : vector<1x16xf32> to vector<16x16xf32>
    %911 = arith.addf %907, %910 : vector<16x16xf32>
    %cst_426 = arith.constant 2.500000e-01 : f32
    %912 = vector.broadcast %cst_426 : f32 to vector<16x16xf32>
    %913 = arith.mulf %897, %912 : vector<16x16xf32>
    %914 = arith.truncf %913 : vector<16x16xf32> to vector<16x16xbf16>
    %915 = vector.shape_cast %914 : vector<16x16xbf16> to vector<2x8x16xbf16>
    %916 = arith.truncf %904 : vector<16x16xf32> to vector<16x16xbf16>
    %917 = vector.shape_cast %916 : vector<16x16xbf16> to vector<2x8x16xbf16>
    %918 = arith.truncf %911 : vector<16x16xf32> to vector<16x16xbf16>
    %919 = vector.shape_cast %918 : vector<16x16xbf16> to vector<2x8x16xbf16>
    "tpu.trace_start"() <{level = 10 : i32, message = "bqd,bkd->bqk"}> : () -> ()
    %cst_427 = arith.constant dense<0.000000e+00> : vector<2x8x8xf32>
    %920 = tpu.matmul %915, %917, %cst_427 {dimension_numbers = #tpu.dot_dimension_numbers<[2], [2], [1], [1], [0, 0, 0, 1, 1, 1], [0], [0]>} : vector<2x8x16xbf16>, vector<2x8x16xbf16>, vector<2x8x8xf32> -> vector<2x8x8xf32>
    "tpu.trace_stop"() : () -> ()
    %cst_428 = arith.constant dense<0xFF800000> : vector<2x8xf32>
    %921 = vector.multi_reduction <maximumf>, %920, %cst_428 [2] : vector<2x8x8xf32> to vector<2x8xf32>
    %922 = vector.shape_cast %921 : vector<2x8xf32> to vector<2x8x1xf32>
    %923 = vector.broadcast %922 : vector<2x8x1xf32> to vector<2x8x8xf32>
    %924 = arith.subf %920, %923 : vector<2x8x8xf32>
    %925 = math.exp %924 : vector<2x8x8xf32>
    %cst_429 = arith.constant dense<0.000000e+00> : vector<2x8xf32>
    %926 = vector.multi_reduction <add>, %925, %cst_429 [2] : vector<2x8x8xf32> to vector<2x8xf32>
    %927 = vector.shape_cast %926 : vector<2x8xf32> to vector<2x8x1xf32>
    %928 = vector.broadcast %927 : vector<2x8x1xf32> to vector<2x8x8xf32>
    %929 = arith.divf %925, %928 : vector<2x8x8xf32>
    %930 = arith.truncf %929 : vector<2x8x8xf32> to vector<2x8x8xbf16>
    "tpu.trace_start"() <{level = 10 : i32, message = "bqk,bkd->bqd"}> : () -> ()
    %cst_430 = arith.constant dense<0.000000e+00> : vector<2x8x16xf32>
    %931 = tpu.matmul %930, %919, %cst_430 {dimension_numbers = #tpu.dot_dimension_numbers<[2], [1], [1], [2], [0, 0, 0, 1, 1, 2], [0], [0]>} : vector<2x8x8xbf16>, vector<2x8x16xbf16>, vector<2x8x16xf32> -> vector<2x8x16xf32>
    "tpu.trace_stop"() : () -> ()
    %932 = vector.shape_cast %931 : vector<2x8x16xf32> to vector<16x16xf32>
    %933 = arith.truncf %932 : vector<16x16xf32> to vector<16x16xbf16>
    %934 = vector.extract_strided_slice %840 {offsets = [1, 0, 0], sizes = [1, 16, 32], strides = [1, 1, 1]} : vector<2x16x32xbf16> to vector<1x16x32xbf16>
    %935 = vector.shape_cast %934 : vector<1x16x32xbf16> to vector<16x32xbf16>
    %cst_431 = arith.constant dense<0.000000e+00> : vector<16x32xf32>
    %936 = tpu.matmul %933, %935, %cst_431 {dimension_numbers = #tpu.dot_dimension_numbers<[1], [0], [0], [1], [0, 0, 1, 1], [], []>} : vector<16x16xbf16>, vector<16x32xbf16>, vector<16x32xf32> -> vector<16x32xf32>
    %937 = arith.addf %890, %936 : vector<16x32xf32>
    %938 = vector.broadcast %842 : vector<1x32xf32> to vector<16x32xf32>
    %939 = arith.addf %937, %938 : vector<16x32xf32>
    %940 = arith.addf %826, %939 : vector<16x32xf32>
    %c1_432 = arith.constant 1 : index
    %c0_433 = arith.constant 0 : index
    %c0_434 = arith.constant 0 : index
    %941 = vector.load %arg37[%c1_432, %c0_433, %c0_434] : memref<2x1x32xf32, #tpu.memory_space<vmem>>, vector<1x1x32xf32>
    %942 = vector.shape_cast %941 : vector<1x1x32xf32> to vector<1x32xf32>
    %c1_435 = arith.constant 1 : index
    %c0_436 = arith.constant 0 : index
    %c0_437 = arith.constant 0 : index
    %943 = vector.load %arg38[%c1_435, %c0_436, %c0_437] : memref<2x1x32xf32, #tpu.memory_space<vmem>>, vector<1x1x32xf32>
    %944 = vector.shape_cast %943 : vector<1x1x32xf32> to vector<1x32xf32>
    %cst_438 = arith.constant dense<0.000000e+00> : vector<16xf32>
    %945 = vector.multi_reduction <add>, %940, %cst_438 [1] : vector<16x32xf32> to vector<16xf32>
    %946 = vector.shape_cast %945 : vector<16xf32> to vector<16x1xf32>
    %cst_439 = arith.constant 3.200000e+01 : f32
    %947 = vector.broadcast %cst_439 : f32 to vector<16x1xf32>
    %948 = arith.divf %946, %947 : vector<16x1xf32>
    %949 = vector.broadcast %948 : vector<16x1xf32> to vector<16x32xf32>
    %950 = arith.subf %940, %949 : vector<16x32xf32>
    %951 = arith.mulf %950, %950 : vector<16x32xf32>
    %cst_440 = arith.constant dense<0.000000e+00> : vector<16xf32>
    %952 = vector.multi_reduction <add>, %951, %cst_440 [1] : vector<16x32xf32> to vector<16xf32>
    %953 = vector.shape_cast %952 : vector<16xf32> to vector<16x1xf32>
    %cst_441 = arith.constant 3.200000e+01 : f32
    %954 = vector.broadcast %cst_441 : f32 to vector<16x1xf32>
    %955 = arith.divf %953, %954 : vector<16x1xf32>
    %cst_442 = arith.constant 9.99999974E-6 : f32
    %956 = vector.broadcast %cst_442 : f32 to vector<16x1xf32>
    %957 = arith.addf %955, %956 : vector<16x1xf32>
    %958 = math.rsqrt %957 : vector<16x1xf32>
    %959 = vector.broadcast %958 : vector<16x1xf32> to vector<16x32xf32>
    %960 = arith.mulf %950, %959 : vector<16x32xf32>
    %961 = vector.broadcast %942 : vector<1x32xf32> to vector<16x32xf32>
    %962 = arith.mulf %960, %961 : vector<16x32xf32>
    %963 = vector.broadcast %944 : vector<1x32xf32> to vector<16x32xf32>
    %964 = arith.addf %962, %963 : vector<16x32xf32>
    %c1_443 = arith.constant 1 : index
    %c0_444 = arith.constant 0 : index
    %c0_445 = arith.constant 0 : index
    %965 = vector.load %arg39[%c1_443, %c0_444, %c0_445] : memref<2x32x64xbf16, #tpu.memory_space<vmem>>, vector<1x32x64xbf16>
    %966 = vector.shape_cast %965 : vector<1x32x64xbf16> to vector<32x64xbf16>
    %c1_446 = arith.constant 1 : index
    %c0_447 = arith.constant 0 : index
    %c0_448 = arith.constant 0 : index
    %967 = vector.load %arg40[%c1_446, %c0_447, %c0_448] : memref<2x1x64xf32, #tpu.memory_space<vmem>>, vector<1x1x64xf32>
    %968 = vector.shape_cast %967 : vector<1x1x64xf32> to vector<1x64xf32>
    %c1_449 = arith.constant 1 : index
    %c0_450 = arith.constant 0 : index
    %c0_451 = arith.constant 0 : index
    %969 = vector.load %arg41[%c1_449, %c0_450, %c0_451] : memref<2x64x32xbf16, #tpu.memory_space<vmem>>, vector<1x64x32xbf16>
    %970 = vector.shape_cast %969 : vector<1x64x32xbf16> to vector<64x32xbf16>
    %c1_452 = arith.constant 1 : index
    %c0_453 = arith.constant 0 : index
    %c0_454 = arith.constant 0 : index
    %971 = vector.load %arg42[%c1_452, %c0_453, %c0_454] : memref<2x1x32xf32, #tpu.memory_space<vmem>>, vector<1x1x32xf32>
    %972 = vector.shape_cast %971 : vector<1x1x32xf32> to vector<1x32xf32>
    %973 = arith.truncf %964 : vector<16x32xf32> to vector<16x32xbf16>
    %cst_455 = arith.constant dense<0.000000e+00> : vector<16x64xf32>
    %974 = tpu.matmul %973, %966, %cst_455 {dimension_numbers = #tpu.dot_dimension_numbers<[1], [0], [0], [1], [0, 0, 1, 1], [], []>} : vector<16x32xbf16>, vector<32x64xbf16>, vector<16x64xf32> -> vector<16x64xf32>
    %975 = vector.broadcast %968 : vector<1x64xf32> to vector<16x64xf32>
    %976 = arith.addf %974, %975 : vector<16x64xf32>
    %cst_456 = arith.constant 0.000000e+00 : f32
    %977 = vector.broadcast %cst_456 : f32 to vector<16x64xf32>
    %978 = arith.maximumf %976, %977 : vector<16x64xf32>
    %979 = arith.truncf %978 : vector<16x64xf32> to vector<16x64xbf16>
    %cst_457 = arith.constant dense<0.000000e+00> : vector<16x32xf32>
    %980 = tpu.matmul %979, %970, %cst_457 {dimension_numbers = #tpu.dot_dimension_numbers<[1], [0], [0], [1], [0, 0, 1, 1], [], []>} : vector<16x64xbf16>, vector<64x32xbf16>, vector<16x32xf32> -> vector<16x32xf32>
    %981 = vector.broadcast %972 : vector<1x32xf32> to vector<16x32xf32>
    %982 = arith.addf %980, %981 : vector<16x32xf32>
    %983 = arith.addf %964, %982 : vector<16x32xf32>
    %c1_458 = arith.constant 1 : index
    %c0_459 = arith.constant 0 : index
    %c0_460 = arith.constant 0 : index
    %984 = vector.load %arg43[%c1_458, %c0_459, %c0_460] : memref<2x1x32xf32, #tpu.memory_space<vmem>>, vector<1x1x32xf32>
    %985 = vector.shape_cast %984 : vector<1x1x32xf32> to vector<1x32xf32>
    %c1_461 = arith.constant 1 : index
    %c0_462 = arith.constant 0 : index
    %c0_463 = arith.constant 0 : index
    %986 = vector.load %arg44[%c1_461, %c0_462, %c0_463] : memref<2x1x32xf32, #tpu.memory_space<vmem>>, vector<1x1x32xf32>
    %987 = vector.shape_cast %986 : vector<1x1x32xf32> to vector<1x32xf32>
    %cst_464 = arith.constant dense<0.000000e+00> : vector<16xf32>
    %988 = vector.multi_reduction <add>, %983, %cst_464 [1] : vector<16x32xf32> to vector<16xf32>
    %989 = vector.shape_cast %988 : vector<16xf32> to vector<16x1xf32>
    %cst_465 = arith.constant 3.200000e+01 : f32
    %990 = vector.broadcast %cst_465 : f32 to vector<16x1xf32>
    %991 = arith.divf %989, %990 : vector<16x1xf32>
    %992 = vector.broadcast %991 : vector<16x1xf32> to vector<16x32xf32>
    %993 = arith.subf %983, %992 : vector<16x32xf32>
    %994 = arith.mulf %993, %993 : vector<16x32xf32>
    %cst_466 = arith.constant dense<0.000000e+00> : vector<16xf32>
    %995 = vector.multi_reduction <add>, %994, %cst_466 [1] : vector<16x32xf32> to vector<16xf32>
    %996 = vector.shape_cast %995 : vector<16xf32> to vector<16x1xf32>
    %cst_467 = arith.constant 3.200000e+01 : f32
    %997 = vector.broadcast %cst_467 : f32 to vector<16x1xf32>
    %998 = arith.divf %996, %997 : vector<16x1xf32>
    %cst_468 = arith.constant 9.99999974E-6 : f32
    %999 = vector.broadcast %cst_468 : f32 to vector<16x1xf32>
    %1000 = arith.addf %998, %999 : vector<16x1xf32>
    %1001 = math.rsqrt %1000 : vector<16x1xf32>
    %1002 = vector.broadcast %1001 : vector<16x1xf32> to vector<16x32xf32>
    %1003 = arith.mulf %993, %1002 : vector<16x32xf32>
    %1004 = vector.broadcast %985 : vector<1x32xf32> to vector<16x32xf32>
    %1005 = arith.mulf %1003, %1004 : vector<16x32xf32>
    %1006 = vector.broadcast %987 : vector<1x32xf32> to vector<16x32xf32>
    %1007 = arith.addf %1005, %1006 : vector<16x32xf32>
    %1008 = vector.shape_cast %1007 : vector<16x32xf32> to vector<2x8x32xf32>
    %cst_469 = arith.constant dense<0.000000e+00> : vector<2x32xf32>
    %1009 = vector.multi_reduction <add>, %1008, %cst_469 [1] : vector<2x8x32xf32> to vector<2x32xf32>
    %cst_470 = arith.constant 8.000000e+00 : f32
    %1010 = vector.broadcast %cst_470 : f32 to vector<2x32xf32>
    %1011 = arith.divf %1009, %1010 : vector<2x32xf32>
    %1012 = arith.truncf %1011 : vector<2x32xf32> to vector<2x32xbf16>
    %c0_471 = arith.constant 0 : index
    %c0_472 = arith.constant 0 : index
    %1013 = vector.load %arg45[%c0_471, %c0_472] : memref<32x128xbf16, #tpu.memory_space<vmem>>, vector<32x128xbf16>
    %cst_473 = arith.constant dense<0.000000e+00> : vector<2x128xf32>
    %1014 = tpu.matmul %1012, %1013, %cst_473 {dimension_numbers = #tpu.dot_dimension_numbers<[1], [0], [0], [1], [0, 0, 1, 1], [], []>} : vector<2x32xbf16>, vector<32x128xbf16>, vector<2x128xf32> -> vector<2x128xf32>
    %c0_474 = arith.constant 0 : index
    %c0_475 = arith.constant 0 : index
    %1015 = vector.load %arg46[%c0_474, %c0_475] : memref<1x128xf32, #tpu.memory_space<vmem>>, vector<1x128xf32>
    %1016 = vector.broadcast %1015 : vector<1x128xf32> to vector<2x128xf32>
    %1017 = arith.addf %1014, %1016 : vector<2x128xf32>
    %c0_476 = arith.constant 0 : index
    %c0_477 = arith.constant 0 : index
    %1018 = vector.load %arg47[%c0_476, %c0_477] : memref<2x128xf32, #tpu.memory_space<vmem>>, vector<2x128xf32>
    tpu.vector_store %arg47[%c0_476, %c0_477], %1017 {strides = array<i32>} : memref<2x128xf32, #tpu.memory_space<vmem>>, vector<2x128xf32>,
    return
  }
}

</mosaic_0001>

<bundles_post_ra>
// kernel: transformer_forward.1
= control target key start
LH: loop header
LB: loop body
LE: loop exit
PB: predicated region body
PF: predicated region fallthrough
CT: control target
= control target key end

     0   :  { %s5657_s6 = smov 1   ;;  %s5658_s10 = smov 2   ;;  %s6587_s0 = inlined_call_operand.smem [shape: u32[48], index: -1, kind: input, shape index: {}] }
   0x1   :  { %s5715_s5 = sld [smem:[%s6587_s0]]   ;;  %s5659_s14 = smov 3  }
   0x2   :  { %s5720_s9 = sld [smem:[%s6587_s0 + %s5657_s6]]   ;;  %s5660_s18 = smov 4  }
   0x3   :  { %s5725_s13 = sld [smem:[%s6587_s0 + %s5658_s10]]   ;;  %s5661_s22 = smov 5  }
   0x4   :  { %s5730_s17 = sld [smem:[%s6587_s0 + %s5659_s14]]   ;;  %s5662_s26 = smov 6  }
   0x5   :  { %s5735_s21 = sld [smem:[%s6587_s0 + %s5660_s18]]   ;;  %s5663_s30 = smov 7  }
   0x6   :  { %s5740_s25 = sld [smem:[%s6587_s0 + %s5661_s22]]   ;;  %s5664_s4 = smov 8  }
   0x7   :  { %s5745_s29 = sld [smem:[%s6587_s0 + %s5662_s26]]   ;;  %s5665_s10 = smov 9  }
   0x8   :  { %s5750_s3 = sld [smem:[%s6587_s0 + %s5663_s30]]   ;;  %s5666_s15 = smov 10  }
   0x9   :  { %s5755_s8 = sld [smem:[%s6587_s0 + %s5664_s4]]   ;;  %s5667_s20 = smov 11  }
   0xa   :  { %s5760_s14 = sld [smem:[%s6587_s0 + %s5665_s10]]   ;;  %s5668_s26 = smov 12  }
   0xb   :  { %s5765_s19 = sld [smem:[%s6587_s0 + %s5666_s15]]   ;;  %s5669_s1 = smov 13  }
   0xc   :  { %s5770_s24 = sld [smem:[%s6587_s0 + %s5667_s20]]   ;;  %s5670_s7 = smov 14  }
   0xd   :  { %s5775_s30 = sld [smem:[%s6587_s0 + %s5668_s26]]   ;;  %s5671_s15 = smov 15  }
   0xe   :  { %s5780_s6 = sld [smem:[%s6587_s0 + %s5669_s1]]   ;;  %s5672_s22 = smov 16  }
   0xf   :  { %s5785_s12 = sld [smem:[%s6587_s0 + %s5670_s7]]   ;;  %s5673_s28 = smov 17  }
  0x10   :  { %s5790_s20 = sld [smem:[%s6587_s0 + %s5671_s15]]   ;;  %s5674_s7 = smov 18  }
  0x11   :  { %s5795_s27 = sld [smem:[%s6587_s0 + %s5672_s22]]   ;;  %s5675_s15 = smov 19  }
  0x12   :  { %s5800_s4 = sld [smem:[%s6587_s0 + %s5673_s28]]   ;;  %s5676_s22 = smov 20  }
  0x13   :  { %s5677_s28 = smov 21  }
  0x15   :  { %6618 = sst [smem:[#allocation5_spill]] %s5785_s12 }
  0x16   :  { %6619 = sst [smem:[#allocation6_spill]] %s5790_s20 }
  0x17   :  { %6620 = sst [smem:[#allocation7_spill]] %s5795_s27 }
  0x18   :  { %6621 = sst [smem:[#allocation8_spill]] %s5800_s4 }
  0x19   :  { %s5805_s12 = sld [smem:[%s6587_s0 + %s5674_s7]]   ;;  %s5678_s7 = smov 22  }
  0x1a   :  { %s5810_s20 = sld [smem:[%s6587_s0 + %s5675_s15]]   ;;  %s5679_s15 = smov 23  }
  0x1b   :  { %s5815_s27 = sld [smem:[%s6587_s0 + %s5676_s22]]   ;;  %s5680_s22 = smov 24  }
  0x1c   :  { %s5820_s4 = sld [smem:[%s6587_s0 + %s5677_s28]]   ;;  %s5681_s28 = smov 25  }
  0x1f   :  { %6622 = sst [smem:[#allocation9_spill]] %s5805_s12 }
  0x20   :  { %6623 = sst [smem:[#allocation10_spill]] %s5810_s20 }
  0x21   :  { %6624 = sst [smem:[#allocation11_spill]] %s5815_s27 }
  0x22   :  { %6625 = sst [smem:[#allocation12_spill]] %s5820_s4 }
  0x23   :  { %s5825_s12 = sld [smem:[%s6587_s0 + %s5678_s7]]   ;;  %s5682_s7 = smov 26  }
  0x24   :  { %s5830_s20 = sld [smem:[%s6587_s0 + %s5679_s15]]   ;;  %s5683_s15 = smov 27  }
  0x25   :  { %s5835_s27 = sld [smem:[%s6587_s0 + %s5680_s22]]   ;;  %s5684_s22 = smov 28  }
  0x26   :  { %s5840_s4 = sld [smem:[%s6587_s0 + %s5681_s28]]   ;;  %s5685_s28 = smov 29  }
  0x29   :  { %6626 = sst [smem:[#allocation13_spill]] %s5825_s12 }
  0x2a   :  { %6627 = sst [smem:[#allocation14_spill]] %s5830_s20 }
  0x2b   :  { %6628 = sst [smem:[#allocation15_spill]] %s5835_s27 }
  0x2c   :  { %6629 = sst [smem:[#allocation16_spill]] %s5840_s4 }
  0x2d   :  { %s5845_s12 = sld [smem:[%s6587_s0 + %s5682_s7]]   ;;  %s5686_s7 = smov 30  }
  0x2e   :  { %s5850_s20 = sld [smem:[%s6587_s0 + %s5683_s15]]   ;;  %s5687_s15 = smov 31  }
  0x2f   :  { %s5855_s27 = sld [smem:[%s6587_s0 + %s5684_s22]]   ;;  %s5688_s22 = smov 32  }
  0x30   :  { %s5860_s4 = sld [smem:[%s6587_s0 + %s5685_s28]]   ;;  %s5689_s28 = smov 33  }
  0x33   :  { %6630 = sst [smem:[#allocation17_spill]] %s5845_s12 }
  0x34   :  { %6631 = sst [smem:[#allocation18_spill]] %s5850_s20 }
  0x35   :  { %6632 = sst [smem:[#allocation19_spill]] %s5855_s27 }
  0x36   :  { %6633 = sst [smem:[#allocation20_spill]] %s5860_s4 }
  0x37   :  { %s5865_s12 = sld [smem:[%s6587_s0 + %s5686_s7]]   ;;  %s5690_s7 = smov 34  }
  0x38   :  { %s5870_s20 = sld [smem:[%s6587_s0 + %s5687_s15]]   ;;  %s5691_s15 = smov 35  }
  0x39   :  { %s5875_s27 = sld [smem:[%s6587_s0 + %s5688_s22]]   ;;  %s5692_s22 = smov 36  }
  0x3a   :  { %s5880_s4 = sld [smem:[%s6587_s0 + %s5689_s28]]   ;;  %s5693_s28 = smov 37  }
  0x3d   :  { %6634 = sst [smem:[#allocation21_spill]] %s5865_s12 }
  0x3e   :  { %6635 = sst [smem:[#allocation22_spill]] %s5870_s20 }
  0x3f   :  { %6636 = sst [smem:[#allocation23_spill]] %s5875_s27 }
  0x40   :  { %6637 = sst [smem:[#allocation24_spill]] %s5880_s4 }
  0x41   :  { %s5885_s12 = sld [smem:[%s6587_s0 + %s5690_s7]]   ;;  %s5694_s7 = smov 38  }
  0x42   :  { %s5890_s20 = sld [smem:[%s6587_s0 + %s5691_s15]]   ;;  %s5695_s15 = smov 39  }
  0x43   :  { %s5895_s27 = sld [smem:[%s6587_s0 + %s5692_s22]]   ;;  %s5696_s22 = smov 40  }
  0x44   :  { %s5900_s4 = sld [smem:[%s6587_s0 + %s5693_s28]]   ;;  %s5697_s28 = smov 41  }
  0x47   :  { %6638 = sst [smem:[#allocation25_spill]] %s5885_s12 }
  0x48   :  { %6639 = sst [smem:[#allocation26_spill]] %s5890_s20 }
  0x49   :  { %6640 = sst [smem:[#allocation27_spill]] %s5895_s27 }
  0x4a   :  { %6641 = sst [smem:[#allocation28_spill]] %s5900_s4 }
  0x4b   :  { %s5905_s12 = sld [smem:[%s6587_s0 + %s5694_s7]]   ;;  %s5698_s7 = smov 42  }
  0x4c   :  { %s5910_s20 = sld [smem:[%s6587_s0 + %s5695_s15]]   ;;  %s5699_s15 = smov 43  }
  0x4d   :  { %s5915_s27 = sld [smem:[%s6587_s0 + %s5696_s22]]   ;;  %s5700_s22 = smov 44  }
  0x4e   :  { %s5920_s4 = sld [smem:[%s6587_s0 + %s5697_s28]]   ;;  %s5701_s28 = smov 45  }
  0x51   :  { %6642 = sst [smem:[#allocation29_spill]] %s5905_s12 }
  0x52   :  { %6643 = sst [smem:[#allocation30_spill]] %s5910_s20 }
  0x53   :  { %6644 = sst [smem:[#allocation31_spill]] %s5915_s27 }
  0x54   :  { %6645 = sst [smem:[#allocation32_spill]] %s5920_s4 }
  0x55   :  { %s5925_s12 = sld [smem:[%s6587_s0 + %s5698_s7]]   ;;  %s5702_s7 = smov 46  }
  0x56   :  { %s5930_s20 = sld [smem:[%s6587_s0 + %s5699_s15]]   ;;  %s5703_s15 = smov 47  }
  0x57   :  { %s5935_s27 = sld [smem:[%s6587_s0 + %s5700_s22]]  }
  0x58   :  { %s5940_s4 = sld [smem:[%s6587_s0 + %s5701_s28]]  }
  0x5b   :  { %6646 = sst [smem:[#allocation33_spill]] %s5925_s12 }
  0x5c   :  { %6647 = sst [smem:[#allocation34_spill]] %s5930_s20 }
  0x5d   :  { %s5945_s12 = sld [smem:[%s6587_s0 + %s5702_s7]]  }
  0x5e   :  { %s5950_s20 = sld [smem:[%s6587_s0 + %s5703_s15]]  }
  0x5f   :  { %v199_v0 = vld [vmem:[%s5720_s9] sm:$0xf]  ;;  %vm208_vm0 = vcmask 1043456   ;;  %v197_v2 = vld [vmem:[%s5715_s5 + $0x8] sm:$0xff]  ;;  %vm204_vm1 = vcmask 64512  }
  0x60   :  { %v196_v1 = vld [vmem:[%s5715_s5] sm:$0xff]  ;;  %v210_v3 = vsel %vm208_vm0, %v199_v0, 0 }
  0x61   :  { %v198_v4 = vpack.c.bf16 %v197_v2, %v196_v1  ;;  %219 = vmatpush.bf16.msra.mxu0 %v210_v3 }
  0x64   :  { %4570 = vmatmul.msk.bf16.vlgmr.msra.gmra.mxu0 %vm204_vm1, %v198_v4 }
  0x65   :  { %100 = vsyncpa [#allocation3], 0  ;;  %v5260_v5 = vld [vmem:[%s5730_s17 + $0x8] sm:$0xff]  ;;  %v5259_v8 = vld [vmem:[%s5730_s17] sm:$0xff]  ;;  %vm277_vm2 = vcmask 261120   ;;  %vm361_vm3 = vcmask 130048  }
  0x66   :  { %v5264_v6 = vld [vmem:[%s5740_s25 + $0x8] sm:$0xff]  ;;  %287 = vmatpush.bf16.msra.mxu1 %v5260_v5  ;;  %v5263_v9 = vld [vmem:[%s5740_s25] sm:$0xff]  ;;  %v5262_v27 = vld [vmem:[%s5730_s17 + $0x18] sm:$0xff]  ;;  %s6648_s0 = sld [smem:[#allocation6_spill]] }
  0x67   :  { %v5268_v7 = vld [vmem:[%s5750_s3 + $0x8] sm:$0xff]  ;;  %316 = vmatpush.bf16.msra.mxu2 %v5264_v6  ;;  %v5267_v10 = vld [vmem:[%s5750_s3] sm:$0xff]  ;;  %v5261_v32 = vld [vmem:[%s5730_s17 + $0x10] sm:$0xff]  ;;  %s6649_s5 = sld [smem:[#allocation5_spill]] }
  0x68   :  { %345 = vmatpush.bf16.msra.mxu3 %v5268_v7  ;;  %v5419_v12 = vld [vmem:[%s5725_s13] ss:$0 sm:$0xff]  ;;  %v5266_v41 = vld [vmem:[%s5740_s25 + $0x18] sm:$0xff]  ;;  %v5265_v46 = vld [vmem:[%s5740_s25 + $0x10] sm:$0xff]  ;;  %s6650_s9 = sld [smem:[#allocation7_spill]] }
  0x69   :  { %v5421_v17 = vld [vmem:[%s5745_s29] ss:$0 sm:$0xff]  ;;  %v5423_v53 = vld [vmem:[%s5735_s21 + $0x1] ss:$0 sm:$0xff]  ;;  %s6651_s13 = sld [smem:[#allocation8_spill]] }
  0x6a   :  { %288 = vmatpush.bf16.msra.mxu1 %v5259_v8  ;;  %v5422_v19 = vld [vmem:[%s5755_s8] ss:$0 sm:$0xff]  ;;  %v5424_v57 = vld [vmem:[%s5745_s29 + $0x1] ss:$0 sm:$0xff]  ;;  %s6652_s22 = sld [smem:[#allocation9_spill]] }
  0x6b   :  { %317 = vmatpush.bf16.msra.mxu2 %v5263_v9  ;;  %v5420_v20 = vld [vmem:[%s5735_s21] ss:$0 sm:$0xff]  ;;  %s6664_s23 = sld [smem:[#allocation18_spill]] }
  0x6c   :  { %346 = vmatpush.bf16.msra.mxu3 %v5267_v10  ;;  %s6665_s26 = sld [smem:[#allocation19_spill]] }
  0x6d   :  { %s6666_s28 = sld [smem:[#allocation23_spill]] }
  0x6e   :  { %s6667_s1 = sld [smem:[#allocation25_spill]] }
  0x6f   :  { %s6668_s2 = sld [smem:[#allocation21_spill]] }
  0x70   :  { %s6669_s7 = sld [smem:[#allocation26_spill]] }
  0x71   :  { %s6670_s10 = sld [smem:[#allocation27_spill]] }
  0x72   :  { %s6671_s11 = sld [smem:[#allocation30_spill]] }
  0x73   :  { %s6672_s15 = sld [smem:[#allocation28_spill]] }
  0x74   :  { %s6673_s16 = sld [smem:[#allocation29_spill]] }
  0x75   :  { %s6674_s18 = sld [smem:[#allocation32_spill]] }
  0xe1   :  { %v221_v11 = vpop.f32.mrf.mxu0 }
  0xe2   :  { %v5964_v14 = vadd.f32 %v5419_v12, %v221_v11 }
  0xe9   :  { %v223_v13 = vpop.f32.mrf.mxu0 }
  0xea   :  { %v5966_v15 = vadd.f32 %v5419_v12, %v223_v13 }
  0xec   :  { %v5970_v16 = vpack.c.bf16 %v5966_v15, %v5964_v14 }
  0xee   :  { %4579 = vmatmul.msk.bf16.vlgmr.msra.gmra.mxu1 %vm277_vm2, %v5970_v16  ;;  %4588 = vmatmul.msk.bf16.vlgmr.msra.gmra.mxu2 %vm277_vm2, %v5970_v16 }
  0xef   :  { %4597 = vmatmul.msk.bf16.vlgmr.msra.gmra.mxu3 %vm277_vm2, %v5970_v16 }
 0x16b   :  { %v290_v18 = vpop.f32.mrf.mxu1 }
 0x16c   :  { %v291_v25 = vadd.f32 %v5420_v20, %v290_v18 }
 0x16e   :  { %v353_v31 = vmul.f32 0.25, %v291_v25 }
 0x170   :  { %v355_v38 = vpack.c.bf16 %v353_v31, %v353_v31 }
 0x171   :  { %v319_v21 = vpop.f32.mrf.mxu2 }
 0x172   :  { %v320_v22 = vadd.f32 %v5421_v17, %v319_v21  ;;  %v348_v23 = vpop.f32.mrf.mxu3 }
 0x173   :  { %v349_v24 = vadd.f32 %v5422_v19, %v348_v23  ;;  %v292_v33 = vpop.f32.mrf.mxu1 }
 0x174   :  { %v357_v26 = vpack.c.bf16 %v320_v22, %v320_v22  ;;  %v293_v39 = vadd.f32 %v5420_v20, %v292_v33  ;;  %v5270_v22 = vld [vmem:[%s5750_s3 + $0x18] sm:$0xff] }
 0x175   :  { %v359_v28 = vpack.c.bf16 %v349_v24, %v349_v24  ;;  %v5269_v24 = vld [vmem:[%s5750_s3 + $0x10] sm:$0xff] }
 0x176   :  { %v366_v29 = vsel %vm361_vm3, %v357_v26, 0  ;;  %v354_v45 = vmul.f32 0.25, %v293_v39 }
 0x177   :  { %375 = vmatpush.bf16.xpose.msrb.mxu0 %v366_v29  ;;  %v454_v30 = vsel %vm208_vm0, %v359_v28, 0 }
 0x178   :  { %463 = vmatpush.bf16.msrb.mxu2 %v454_v30  ;;  %v356_v47 = vpack.c.bf16 %v354_v45, %v354_v45 }
 0x179   :  { %v321_v34 = vpop.f32.mrf.mxu2 }
 0x17a   :  { %v322_v35 = vadd.f32 %v5421_v17, %v321_v34  ;;  %v350_v36 = vpop.f32.mrf.mxu3 }
 0x17b   :  { %v351_v37 = vadd.f32 %v5422_v19, %v350_v36 }
 0x17c   :  { %v358_v40 = vpack.c.bf16 %v322_v35, %v322_v35  ;;  %568 = vmatpush.bf16.msra.mxu2 %v5270_v22 }
 0x17d   :  { %v360_v42 = vpack.c.bf16 %v351_v37, %v351_v37 }
 0x17e   :  { %4598 = vmatmul.msk.bf16.vlgmr.msrb.gmra.mxu0 %vm361_vm3, %v355_v38  ;;  %v385_v43 = vsel %vm361_vm3, %v358_v40, 0 }
 0x17f   :  { %510 = vmatpush.bf16.msra.mxu0 %v5262_v27  ;;  %394 = vmatpush.bf16.xpose.msrb.mxu1 %v385_v43  ;;  %v473_v44 = vsel %vm208_vm0, %v360_v42, 0 }
 0x180   :  { %482 = vmatpush.bf16.msrb.mxu3 %v473_v44  ;;  %569 = vmatpush.bf16.msra.mxu2 %v5269_v24 }
 0x183   :  { %511 = vmatpush.bf16.msra.mxu0 %v5261_v32 }
 0x186   :  { %4599 = vmatmul.msk.bf16.vlgmr.msrb.gmra.mxu1 %vm361_vm3, %v356_v47 }
 0x187   :  { %539 = vmatpush.bf16.msra.mxu1 %v5266_v41 }
 0x18b   :  { %540 = vmatpush.bf16.msra.mxu1 %v5265_v46 }
 0x18e   :  { %4610 = vmatmul.msk.bf16.vlgmr.msra.gmra.mxu0 %vm277_vm2, %v5970_v16 }
 0x196   :  { %4619 = vmatmul.msk.bf16.vlgmr.msra.gmra.mxu1 %vm277_vm2, %v5970_v16 }
 0x1fb   :  { %v377_v48 = vpop.f32.mrf.mxu0 }
 0x1fc   :  { %v400_v49 = vsel %vm204_vm1, %v377_v48, -inf }
 0x1fd   :  { %401 = vmax.xlane.f32.xlu1 %v400_v49 }
 0x203   :  { %v379_v50 = vpop.f32.mrf.mxu0  ;;  %v396_v51 = vpop.f32.mrf.mxu1 }
 0x204   :  { %v403_v52 = vsel %vm204_vm1, %v396_v51, -inf }
 0x205   :  { %404 = vmax.xlane.f32.xlu0 %v403_v52 }
 0x20b   :  { %v398_v54 = vpop.f32.mrf.mxu1  ;;  %v513_v55 = vpop.f32.mrf.mxu0 }
 0x20c   :  { %v5998_v56 = vadd.f32 %v5423_v53, %v513_v55 }
 0x20e   :  { %v576_v50 = vmul.f32 0.25, %v5998_v56  ;;  %v5425_v56 = vld [vmem:[%s5755_s8 + $0x1] ss:$0 sm:$0xff] }
 0x213   :  { %v542_v58 = vpop.f32.mrf.mxu1  ;;  %v515_v62 = vpop.f32.mrf.mxu0 }
 0x214   :  { %v543_v59 = vadd.f32 %v5424_v57, %v542_v58  ;;  %v516_v1 = vadd.f32 %v5423_v53, %v515_v62  ;;  %v578_v53 = vpack.c.bf16 %v576_v50, %v576_v50  ;;  %v5271_v58 = vld [vmem:[%s5760_s14] sm:$0xff] }
 0x216   :  { %v580_v60 = vpack.c.bf16 %v543_v59, %v543_v59  ;;  %v577_v4 = vmul.f32 0.25, %v516_v1 }
 0x218   :  { %v588_v61 = vsel %vm361_vm3, %v580_v60, 0  ;;  %v579_v5 = vpack.c.bf16 %v577_v4, %v577_v4 }
 0x219   :  { %597 = vmatpush.bf16.xpose.msra.mxu3 %v588_v61 }
 0x21b   :  { %v544_v63 = vpop.f32.mrf.mxu1 }
 0x21c   :  { %v545_v0 = vadd.f32 %v5424_v57, %v544_v63 }
 0x21e   :  { %v581_v2 = vpack.c.bf16 %v545_v0, %v545_v0 }
 0x220   :  { %v607_v3 = vsel %vm361_vm3, %v581_v2, 0 }
 0x221   :  { %616 = vmatpush.bf16.xpose.msrb.mxu0 %v607_v3 }
 0x228   :  { %4630 = vmatmul.msk.bf16.vlgmr.msrb.gmra.mxu0 %vm361_vm3, %v579_v5 }
 0x229   :  { %750 = vmatpush.bf16.msra.mxu0 %v5271_v58 }
 0x270   :  { %v402_v6 = vpop.xlane.xlu1 %401 }
 0x271   :  { %v406_v7 = vsub.f32 %v377_v48, %v402_v6 }
 0x273   :  { %v408_v8 = vmul.f32 1.442695, %v406_v7 }
 0x275   :  { %5491 = vpow2.f32 %v408_v8 }
 0x278   :  { %v405_v9 = vpop.xlane.xlu0 %404 }
 0x279   :  { %v407_v10 = vsub.f32 %v396_v51, %v405_v9 }
 0x27b   :  { %v5492_v11 = vpop.eup %5491  ;;  %v410_v12 = vmul.f32 1.442695, %v407_v10 }
 0x27c   :  { %v412_v13 = vsel %vm204_vm1, %v5492_v11, 0.0 }
 0x27d   :  { %5493 = vpow2.f32 %v410_v12  ;;  %413 = vadd.xlane.f32.xlu1 %v412_v13 }
 0x283   :  { %v5494_v17 = vpop.eup %5493 }
 0x284   :  { %v415_v18 = vsel %vm204_vm1, %v5494_v17, 0.0 }
 0x285   :  { %416 = vadd.xlane.f32.xlu0 %v415_v18 }
 0x2a5   :  { %v618_v19 = vpop.f32.mrf.mxu0 }
 0x2a6   :  { %v625_v20 = vsel %vm204_vm1, %v618_v19, -inf }
 0x2a7   :  { %626 = vmax.xlane.f32.xlu2 %v625_v20 }
 0x2ad   :  { %v620_v21 = vpop.f32.mrf.mxu0 }
 0x2f0   :  { %v414_v23 = vpop.xlane.xlu1 %413 }
 0x2f1   :  { %5495 = vrcp.f32 %v414_v23  ;;  %v429_v29 = vand.u32 2147483648, %v414_v23  ;;  %v427_v31 = vand.u32 2147483647, %v414_v23  ;;  %vm423_vm5 = vweird.f32 %v414_v23 }
 0x2f3   :  { %v430_v34 = vor.u32 1.1754944e-38, %v429_v29  ;;  %vm428_vm7 = vcmp.eq.f32.partialorder %v427_v31, 8.507059e+37 }
 0x2f7   :  { %v5496_v25 = vpop.eup %5495 }
 0x2f8   :  { %v419_v26 = vmul.f32 %v5496_v25, %v414_v23  ;;  %v417_v27 = vpop.xlane.xlu0 %416  ;;  %vm424_vm4 = vweird.f32 %v5496_v25 }
 0x2f9   :  { %5497 = vrcp.f32 %v417_v27  ;;  %vm425_vm6 = vmor %vm423_vm5, %vm424_vm4  ;;  %v444_v40 = vand.u32 2147483648, %v417_v27  ;;  %v442_v42 = vand.u32 2147483647, %v417_v27  ;;  %vm438_vm9 = vweird.f32 %v417_v27 }
 0x2fa   :  { %v420_v28 = vsub.f32 1.0, %v419_v26 }
 0x2fb   :  { %v445_v45 = vor.u32 1.1754944e-38, %v444_v40  ;;  %vm443_vm11 = vcmp.eq.f32.partialorder %v442_v42, 8.507059e+37 }
 0x2fc   :  { %v421_v30 = vmul.f32 %v5496_v25, %v420_v28 }
 0x2fe   :  { %v422_v32 = vadd.f32 %v5496_v25, %v421_v30 }
 0x2ff   :  { %v5498_v33 = vpop.eup %5497 }
 0x300   :  { %v434_v35 = vmul.f32 %v5498_v33, %v417_v27  ;;  %v426_v36 = vsel %vm425_vm6, %v5496_v25, %v422_v32  ;;  %vm439_vm8 = vweird.f32 %v5498_v33 }
 0x301   :  { %v431_v37 = vsel %vm428_vm7, %v430_v34, %v426_v36  ;;  %vm440_vm10 = vmor %vm438_vm9, %vm439_vm8 }
 0x302   :  { %v435_v38 = vsub.f32 1.0, %v434_v35  ;;  %v432_v39 = vmul.f32 %v5492_v11, %v431_v37 }
 0x304   :  { %v436_v41 = vmul.f32 %v5498_v33, %v435_v38  ;;  %v448_v43 = vpack.c.bf16 %v432_v39, %v432_v39 }
 0x306   :  { %v437_v44 = vadd.f32 %v5498_v33, %v436_v41  ;;  %4600 = vmatmul.msk.bf16.vlgmr.msrb.gmra.mxu2 %vm204_vm1, %v448_v43 }
 0x308   :  { %v441_v46 = vsel %vm440_vm10, %v5498_v33, %v437_v44 }
 0x309   :  { %v446_v47 = vsel %vm443_vm11, %v445_v45, %v441_v46 }
 0x30a   :  { %v447_v48 = vmul.f32 %v5494_v17, %v446_v47  ;;  %v5272_v47 = vld [vmem:[%s5760_s14 + $0x8] sm:$0xff] }
 0x30c   :  { %v449_v49 = vpack.c.bf16 %v447_v48, %v447_v48 }
 0x30e   :  { %4601 = vmatmul.msk.bf16.vlgmr.msrb.gmra.mxu3 %vm204_vm1, %v449_v49 }
 0x30f   :  { %727 = vmatpush.bf16.msrb.mxu3 %v5272_v47 }
 0x316   :  { %4628 = vmatmul.msk.bf16.vlgmr.msra.gmra.mxu2 %vm277_vm2, %v5970_v16 }
 0x31a   :  { %v627_v51 = vpop.xlane.xlu2 %626 }
 0x31b   :  { %v629_v52 = vsub.f32 %v618_v19, %v627_v51 }
 0x31d   :  { %v632_v54 = vmul.f32 1.442695, %v629_v52  ;;  %v5426_v52 = vld [vmem:[%s5765_s19] ss:$0 sm:$0xff] }
 0x31e   :  { %4629 = vmatmul.msk.bf16.vlgmr.msra.gmra.mxu3 %vm361_vm3, %v578_v53 }
 0x31f   :  { %5499 = vpow2.f32 %v632_v54 }
 0x325   :  { %v5500_v55 = vpop.eup %5499 }
 0x326   :  { %v637_v57 = vsel %vm204_vm1, %v5500_v55, 0.0 }
 0x327   :  { %638 = vadd.xlane.f32.xlu0 %v637_v57 }
 0x389   :  { %v465_v59 = vpop.f32.mrf.mxu2 }
 0x391   :  { %v467_v60 = vpop.f32.mrf.mxu2  ;;  %v484_v61 = vpop.f32.mrf.mxu3 }
 0x392   :  { %v488_v62 = vpack.c.bf16 %v484_v61, %v465_v59 }
 0x394   :  { %4642 = vmatmul.msk.bf16.vlgmr.msra.gmra.mxu0 %vm361_vm3, %v488_v62 }
 0x399   :  { %v486_v63 = vpop.f32.mrf.mxu3  ;;  %v571_v0 = vpop.f32.mrf.mxu2 }
 0x39a   :  { %v572_v1 = vadd.f32 %v5425_v56, %v571_v0  ;;  %v639_v2 = vpop.xlane.xlu0 %638  ;;  %v5704_v0 = vmov 32.0  }
 0x39b   :  { %5501 = vrcp.f32 %v639_v2  ;;  %v666_v13 = vand.u32 2147483648, %v639_v2  ;;  %v664_v18 = vand.u32 2147483647, %v639_v2  ;;  %vm660_vm13 = vweird.f32 %v639_v2 }
 0x39c   :  { %v582_v3 = vpack.c.bf16 %v572_v1, %v572_v1 }
 0x39d   :  { %v667_v21 = vor.u32 1.1754944e-38, %v666_v13  ;;  %vm665_vm15 = vcmp.eq.f32.partialorder %v664_v18, 8.507059e+37 }
 0x39e   :  { %v676_v4 = vsel %vm208_vm0, %v582_v3, 0 }
 0x39f   :  { %685 = vmatpush.bf16.msrb.mxu1 %v676_v4 }
 0x3a1   :  { %v5502_v5 = vpop.eup %5501  ;;  %v573_v6 = vpop.f32.mrf.mxu2 }
 0x3a2   :  { %v599_v7 = vpop.f32.mrf.mxu3  ;;  %v656_v8 = vmul.f32 %v5502_v5, %v639_v2  ;;  %v574_v9 = vadd.f32 %v5425_v56, %v573_v6  ;;  %vm661_vm12 = vweird.f32 %v5502_v5 }
 0x3a3   :  { %v622_v10 = vsel %vm204_vm1, %v599_v7, -inf  ;;  %vm662_vm14 = vmor %vm660_vm13, %vm661_vm12 }
 0x3a4   :  { %623 = vmax.xlane.f32.xlu2 %v622_v10  ;;  %v657_v11 = vsub.f32 1.0, %v656_v8  ;;  %v583_v12 = vpack.c.bf16 %v574_v9, %v574_v9 }
 0x3a6   :  { %v658_v17 = vmul.f32 %v5502_v5, %v657_v11  ;;  %v695_v19 = vsel %vm208_vm0, %v583_v12, 0 }
 0x3a7   :  { %704 = vmatpush.bf16.msrb.mxu2 %v695_v19 }
 0x3a8   :  { %v659_v20 = vadd.f32 %v5502_v5, %v658_v17 }
 0x3aa   :  { %v601_v22 = vpop.f32.mrf.mxu3  ;;  %v663_v23 = vsel %vm662_vm14, %v5502_v5, %v659_v20  ;;  %v5274_v20 = vld [vmem:[%s5780_s6 + $0x8] sm:$0xff] }
 0x3ab   :  { %v668_v24 = vsel %vm665_vm15, %v667_v21, %v663_v23  ;;  %866 = vmatpush.bf16.msra.mxu1 %v5274_v20  ;;  %vm904_vm15 = vcmask 523264  }
 0x3ac   :  { %v669_v25 = vmul.f32 %v5500_v55, %v668_v24  ;;  %v5273_v24 = vld [vmem:[%s5780_s6] sm:$0xff] }
 0x3ae   :  { %v671_v26 = vpack.c.bf16 %v669_v25, %v669_v25 }
 0x3af   :  { %867 = vmatpush.bf16.msra.mxu1 %v5273_v24  ;;  %v5288_v24 = vld [vmem:[%s5750_s3 + $0x28] sm:$0xff] }
 0x3b0   :  { %4632 = vmatmul.msk.bf16.vlgmr.msrb.gmra.mxu2 %vm204_vm1, %v671_v26 }
 0x411   :  { %v752_v51 = vpop.f32.mrf.mxu0 }
 0x417   :  { %v624_v27 = vpop.xlane.xlu2 %623 }
 0x418   :  { %v628_v28 = vsub.f32 %v599_v7, %v624_v27 }
 0x419   :  { %v754_v59 = vpop.f32.mrf.mxu0 }
 0x41a   :  { %v630_v29 = vmul.f32 1.442695, %v628_v28 }
 0x41c   :  { %5503 = vpow2.f32 %v630_v29 }
 0x422   :  { %v5504_v30 = vpop.eup %5503 }
 0x423   :  { %v634_v31 = vsel %vm204_vm1, %v5504_v30, 0.0 }
 0x424   :  { %635 = vadd.xlane.f32.xlu1 %v634_v31 }
 0x433   :  { %v706_v32 = vpop.f32.mrf.mxu2 }
 0x43b   :  { %v708_v33 = vpop.f32.mrf.mxu2 }
 0x497   :  { %v636_v34 = vpop.xlane.xlu1 %635 }
 0x498   :  { %5505 = vrcp.f32 %v636_v34  ;;  %v651_v38 = vand.u32 2147483648, %v636_v34  ;;  %v649_v40 = vand.u32 2147483647, %v636_v34  ;;  %vm645_vm5 = vweird.f32 %v636_v34 }
 0x499   :  { %5507 = vrcp.f32 %v5704_v0 }
 0x49a   :  { %v652_v42 = vor.u32 1.1754944e-38, %v651_v38  ;;  %vm650_vm7 = vcmp.eq.f32.partialorder %v649_v40, 8.507059e+37  ;;  %v5427_v40 = vld [vmem:[%s5770_s24] ss:$0 sm:$0xff] }
 0x49e   :  { %v5506_v35 = vpop.eup %5505 }
 0x49f   :  { %v641_v36 = vmul.f32 %v5506_v35, %v636_v34  ;;  %vm646_vm4 = vweird.f32 %v5506_v35  ;;  %v5508_v1 = vpop.eup %5507 }
 0x4a0   :  { %vm647_vm6 = vmor %vm645_vm5, %vm646_vm4  ;;  %v773_v2 = vmul.f32 32.0, %v5508_v1  ;;  %vm777_vm8 = vweird.f32 %v5508_v1 }
 0x4a1   :  { %v642_v37 = vsub.f32 1.0, %v641_v36 }
 0x4a2   :  { %v774_v3 = vsub.f32 1.0, %v773_v2 }
 0x4a3   :  { %v643_v39 = vmul.f32 %v5506_v35, %v642_v37 }
 0x4a4   :  { %v775_v4 = vmul.f32 %v5508_v1, %v774_v3 }
 0x4a5   :  { %v644_v41 = vadd.f32 %v5506_v35, %v643_v39 }
 0x4a6   :  { %v776_v5 = vadd.f32 %v5508_v1, %v775_v4 }
 0x4a7   :  { %v648_v43 = vsel %vm647_vm6, %v5506_v35, %v644_v41 }
 0x4a8   :  { %v653_v44 = vsel %vm650_vm7, %v652_v42, %v648_v43  ;;  %v6032_v6 = vsel %vm777_vm8, %v5508_v1, %v776_v5 }
 0x4a9   :  { %v654_v45 = vmul.f32 %v5504_v30, %v653_v44  ;;  %v5428_v44 = vld [vmem:[%s5775_s30] ss:$0 sm:$0xff] }
 0x4ab   :  { %v670_v46 = vpack.c.bf16 %v654_v45, %v654_v45 }
 0x4ad   :  { %4631 = vmatmul.msk.bf16.vlgmr.msrb.gmra.mxu1 %vm204_vm1, %v670_v46 }
 0x4ae   :  { %1106 = vmatpush.bf16.msrb.mxu1 %v5288_v24 }
 0x52a   :  { %v687_v48 = vpop.f32.mrf.mxu1 }
 0x52b   :  { %v710_v49 = vpack.c.bf16 %v706_v32, %v687_v48 }
 0x52d   :  { %4637 = vmatmul.msk.bf16.vlgmr.msrb.gmra.mxu3 %vm361_vm3, %v710_v49 }
 0x532   :  { %v689_v50 = vpop.f32.mrf.mxu1 }
 0x5b0   :  { %v729_v53 = vpop.f32.mrf.mxu3 }
 0x5b1   :  { %v753_v54 = vadd.f32 %v752_v51, %v729_v53  ;;  %v5278_v51 = vld [vmem:[%s6648_s0 + $0x18] sm:$0xff]  ;;  %v5276_v53 = vld [vmem:[%s6648_s0 + $0x8] sm:$0xff] }
 0x5b2   :  { %912 = vmatpush.bf16.msra.mxu2 %v5278_v51 }
 0x5b3   :  { %v760_v55 = vadd.f32 %v5426_v52, %v753_v54  ;;  %v5275_v54 = vld [vmem:[%s6648_s0] sm:$0xff] }
 0x5b5   :  { %v762_v57 = vadd.f32 %v760_v55, %v5964_v14 }
 0x5b7   :  { %v766_v58 = vsel %vm277_vm2, %v762_v57, 0.0 }
 0x5b8   :  { %767 = vadd.xlane.f32.xlu2 %v766_v58  ;;  %v731_v60 = vpop.f32.mrf.mxu3 }
 0x5b9   :  { %v755_v61 = vadd.f32 %v754_v59, %v731_v60 }
 0x5bb   :  { %v761_v62 = vadd.f32 %v5426_v52, %v755_v61  ;;  %v5277_v52 = vld [vmem:[%s6648_s0 + $0x10] sm:$0xff] }
 0x5bc   :  { %913 = vmatpush.bf16.msra.mxu2 %v5277_v52 }
 0x5bd   :  { %v763_v56 = vadd.f32 %v761_v62, %v5966_v15 }
 0x5bf   :  { %v769_v63 = vsel %vm277_vm2, %v763_v56, 0.0 }
 0x5c0   :  { %770 = vadd.xlane.f32.xlu0 %v769_v63  ;;  %914 = vmatpush.bf16.msra.mxu2 %v5276_v53  ;;  %v5430_v63 = vld [vmem:[%s6650_s9] ss:$0 sm:$0xff] }
 0x5c4   :  { %915 = vmatpush.bf16.msra.mxu2 %v5275_v54 }
 0x62b   :  { %v768_v7 = vpop.xlane.xlu2 %767 }
 0x62c   :  { %v779_v8 = vmul.f32 %v6032_v6, %v768_v7 }
 0x62e   :  { %v781_v9 = vsub.f32 %v762_v57, %v779_v8  ;;  %v5429_v57 = vld [vmem:[%s6649_s5] ss:$0 sm:$0xff] }
 0x630   :  { %v783_v10 = vmul.f32 %v781_v9, %v781_v9 }
 0x632   :  { %v785_v11 = vsel %vm277_vm2, %v783_v10, 0.0 }
 0x633   :  { %786 = vadd.xlane.f32.xlu1 %v785_v11  ;;  %v771_v12 = vpop.xlane.xlu0 %770 }
 0x634   :  { %v780_v13 = vmul.f32 %v6032_v6, %v771_v12 }
 0x636   :  { %v782_v17 = vsub.f32 %v763_v56, %v780_v13 }
 0x638   :  { %v784_v18 = vmul.f32 %v782_v17, %v782_v17 }
 0x63a   :  { %v788_v19 = vsel %vm277_vm2, %v784_v18, 0.0 }
 0x63b   :  { %789 = vadd.xlane.f32.xlu2 %v788_v19 }
 0x6a6   :  { %v787_v21 = vpop.xlane.xlu1 %786 }
 0x6a7   :  { %v791_v22 = vmul.f32 %v787_v21, %v6032_v6 }
 0x6a9   :  { %v793_v23 = vadd.f32 1e-05, %v791_v22  ;;  %v5280_v22 = vld [vmem:[%s5730_s17 + $0x28] sm:$0xff] }
 0x6aa   :  { %1048 = vmatpush.bf16.msra.mxu3 %v5280_v22 }
 0x6ab   :  { %5509 = vrsqrt.f32 %v793_v23  ;;  %vm801_vm10 = vweird.f32 %v793_v23 }
 0x6ae   :  { %v790_v25 = vpop.xlane.xlu2 %789 }
 0x6af   :  { %v792_v26 = vmul.f32 %v790_v25, %v6032_v6 }
 0x6b1   :  { %v5510_v27 = vpop.eup %5509  ;;  %v794_v28 = vadd.f32 1e-05, %v792_v26 }
 0x6b2   :  { %v796_v29 = vmul.f32 %v5510_v27, %v793_v23  ;;  %vm802_vm9 = vweird.f32 %v5510_v27  ;;  %v5284_v23 = vld [vmem:[%s5740_s25 + $0x28] sm:$0xff] }
 0x6b3   :  { %5511 = vrsqrt.f32 %v794_v28  ;;  %vm803_vm11 = vmor %vm801_vm10, %vm802_vm9  ;;  %vm811_vm13 = vweird.f32 %v794_v28  ;;  %1077 = vmatpush.bf16.msrb.mxu0 %v5284_v23 }
 0x6b4   :  { %v797_v30 = vmul.f32 %v5510_v27, %v796_v29  ;;  %v5283_v29 = vld [vmem:[%s5740_s25 + $0x20] sm:$0xff] }
 0x6b6   :  { %v798_v31 = vmul.f32 0.5, %v797_v30  ;;  %v5287_v30 = vld [vmem:[%s5750_s3 + $0x20] sm:$0xff] }
 0x6b7   :  { %1078 = vmatpush.bf16.msrb.mxu0 %v5283_v29  ;;  %1107 = vmatpush.bf16.msrb.mxu1 %v5287_v30 }
 0x6b8   :  { %v799_v32 = vsub.f32 1.5, %v798_v31 }
 0x6b9   :  { %v5512_v33 = vpop.eup %5511 }
 0x6ba   :  { %v800_v34 = vmul.f32 %v5510_v27, %v799_v32  ;;  %v806_v35 = vmul.f32 %v5512_v33, %v794_v28  ;;  %vm812_vm12 = vweird.f32 %v5512_v33  ;;  %v5279_v28 = vld [vmem:[%s5730_s17 + $0x20] sm:$0xff] }
 0x6bb   :  { %vm813_vm14 = vmor %vm811_vm13, %vm812_vm12  ;;  %1049 = vmatpush.bf16.msra.mxu3 %v5279_v28 }
 0x6bc   :  { %v807_v36 = vmul.f32 %v5512_v33, %v806_v35  ;;  %v804_v37 = vsel %vm803_vm11, %v5510_v27, %v800_v34 }
 0x6bd   :  { %v815_v41 = vmul.f32 %v804_v37, %v781_v9 }
 0x6be   :  { %v808_v38 = vmul.f32 0.5, %v807_v36 }
 0x6bf   :  { %v820_v45 = vmul.f32 %v5427_v40, %v815_v41 }
 0x6c0   :  { %v809_v39 = vsub.f32 1.5, %v808_v38 }
 0x6c1   :  { %v825_v48 = vadd.f32 %v5428_v44, %v820_v45 }
 0x6c2   :  { %v810_v42 = vmul.f32 %v5512_v33, %v809_v39 }
 0x6c4   :  { %v814_v43 = vsel %vm813_vm14, %v5512_v33, %v810_v42 }
 0x6c5   :  { %v816_v46 = vmul.f32 %v814_v43, %v782_v17 }
 0x6c7   :  { %v821_v47 = vmul.f32 %v5427_v40, %v816_v46  ;;  %v5431_v46 = vld [vmem:[%s6651_s13] ss:$0 sm:$0xff] }
 0x6c9   :  { %v826_v49 = vadd.f32 %v5428_v44, %v821_v47 }
 0x6cb   :  { %v841_v50 = vpack.c.bf16 %v826_v49, %v825_v48 }
 0x6cd   :  { %4651 = vmatmul.msk.bf16.vlgmr.msra.gmra.mxu1 %vm277_vm2, %v841_v50  ;;  %v5432_v50 = vld [vmem:[%s6652_s22] ss:$0 sm:$0xff] }
 0x74a   :  { %v869_v55 = vpop.f32.mrf.mxu1 }
 0x74b   :  { %v870_v58 = vadd.f32 %v5429_v57, %v869_v55 }
 0x74d   :  { %v874_v61 = vmax.f32 %v870_v58, 0.0  ;;  %v5433_v58 = vld [vmem:[%s5745_s29 + $0x2] ss:$0 sm:$0xff] }
 0x752   :  { %v871_v59 = vpop.f32.mrf.mxu1 }
 0x753   :  { %v872_v60 = vadd.f32 %v5429_v57, %v871_v59  ;;  %v5434_v59 = vld [vmem:[%s5755_s8 + $0x2] ss:$0 sm:$0xff] }
 0x755   :  { %v875_v62 = vmax.f32 %v872_v60, 0.0 }
 0x757   :  { %v876_v56 = vpack.c.bf16 %v875_v62, %v874_v61 }
 0x759   :  { %4668 = vmatmul.msk.bf16.vlgmr.msra.gmra.mxu2 %vm904_vm15, %v876_v56 }
 0x7dc   :  { %v917_v0 = vpop.f32.mrf.mxu2 }
 0x7dd   :  { %v918_v1 = vadd.f32 %v5430_v63, %v917_v0  ;;  %v5435_v0 = vld [vmem:[%s5735_s21 + $0x2] ss:$0 sm:$0xff] }
 0x7df   :  { %v922_v2 = vadd.f32 %v918_v1, %v825_v48  ;;  %v5282_v1 = vld [vmem:[%s5730_s17 + $0x38] sm:$0xff] }
 0x7e1   :  { %v926_v3 = vsel %vm277_vm2, %v922_v2, 0.0 }
 0x7e2   :  { %927 = vadd.xlane.f32.xlu0 %v926_v3 }
 0x7e4   :  { %v919_v4 = vpop.f32.mrf.mxu2 }
 0x7e5   :  { %v920_v5 = vadd.f32 %v5430_v63, %v919_v4 }
 0x7e7   :  { %v923_v7 = vadd.f32 %v920_v5, %v826_v49 }
 0x7e9   :  { %v929_v8 = vsel %vm277_vm2, %v923_v7, 0.0 }
 0x7ea   :  { %930 = vadd.xlane.f32.xlu1 %v929_v8  ;;  %v5281_v8 = vld [vmem:[%s5730_s17 + $0x30] sm:$0xff]  ;;  %s6653_s17 = sld [smem:[#allocation12_spill]] }
 0x855   :  { %v928_v9 = vpop.xlane.xlu0 %927 }
 0x856   :  { %v932_v10 = vmul.f32 %v928_v9, %v6032_v6 }
 0x858   :  { %v934_v11 = vsub.f32 %v922_v2, %v932_v10 }
 0x85a   :  { %v936_v12 = vmul.f32 %v934_v11, %v934_v11 }
 0x85c   :  { %v938_v13 = vsel %vm277_vm2, %v936_v12, 0.0 }
 0x85d   :  { %v931_v17 = vpop.xlane.xlu1 %930  ;;  %939 = vadd.xlane.f32.xlu2 %v938_v13 }
 0x85e   :  { %v933_v18 = vmul.f32 %v931_v17, %v6032_v6 }
 0x860   :  { %v935_v19 = vsub.f32 %v923_v7, %v933_v18 }
 0x862   :  { %v937_v20 = vmul.f32 %v935_v19, %v935_v19 }
 0x864   :  { %v941_v21 = vsel %vm277_vm2, %v937_v20, 0.0 }
 0x865   :  { %942 = vadd.xlane.f32.xlu0 %v941_v21 }
 0x8d0   :  { %v940_v25 = vpop.xlane.xlu2 %939 }
 0x8d1   :  { %v944_v26 = vmul.f32 %v940_v25, %v6032_v6  ;;  %v5285_v25 = vld [vmem:[%s5740_s25 + $0x30] sm:$0xff] }
 0x8d3   :  { %v946_v27 = vadd.f32 1e-05, %v944_v26 }
 0x8d5   :  { %5513 = vrsqrt.f32 %v946_v27  ;;  %vm954_vm5 = vweird.f32 %v946_v27 }
 0x8d8   :  { %v943_v31 = vpop.xlane.xlu0 %942 }
 0x8d9   :  { %v945_v32 = vmul.f32 %v943_v31, %v6032_v6 }
 0x8db   :  { %v5514_v33 = vpop.eup %5513  ;;  %v947_v34 = vadd.f32 1e-05, %v945_v32 }
 0x8dc   :  { %v949_v35 = vmul.f32 %v5514_v33, %v946_v27  ;;  %vm955_vm4 = vweird.f32 %v5514_v33 }
 0x8dd   :  { %5515 = vrsqrt.f32 %v947_v34  ;;  %vm956_vm6 = vmor %vm954_vm5, %vm955_vm4  ;;  %vm964_vm8 = vweird.f32 %v947_v34 }
 0x8de   :  { %v950_v36 = vmul.f32 %v5514_v33, %v949_v35 }
 0x8e0   :  { %v951_v37 = vmul.f32 0.5, %v950_v36 }
 0x8e2   :  { %v952_v38 = vsub.f32 1.5, %v951_v37  ;;  %v5437_v37 = vld [vmem:[%s5745_s29 + $0x3] ss:$0 sm:$0xff]  ;;  %s6656_s29 = sld [smem:[#allocation11_spill]] }
 0x8e3   :  { %v5516_v39 = vpop.eup %5515 }
 0x8e4   :  { %v953_v40 = vmul.f32 %v5514_v33, %v952_v38  ;;  %v959_v41 = vmul.f32 %v5516_v39, %v947_v34  ;;  %vm965_vm7 = vweird.f32 %v5516_v39 }
 0x8e5   :  { %vm966_vm9 = vmor %vm964_vm8, %vm965_vm7 }
 0x8e6   :  { %v960_v42 = vmul.f32 %v5516_v39, %v959_v41  ;;  %v957_v43 = vsel %vm956_vm6, %v5514_v33, %v953_v40  ;;  %v5436_v33 = vld [vmem:[%s5735_s21 + $0x3] ss:$0 sm:$0xff]  ;;  %s6654_s21 = sld [smem:[#allocation13_spill]] }
 0x8e7   :  { %v968_v47 = vmul.f32 %v957_v43, %v934_v11 }
 0x8e8   :  { %v961_v44 = vmul.f32 0.5, %v960_v42 }
 0x8e9   :  { %v973_v51 = vmul.f32 %v5431_v46, %v968_v47 }
 0x8ea   :  { %v962_v45 = vsub.f32 1.5, %v961_v44 }
 0x8eb   :  { %v6068_v54 = vadd.f32 %v5432_v50, %v973_v51 }
 0x8ec   :  { %v963_v48 = vmul.f32 %v5516_v39, %v962_v45 }
 0x8ee   :  { %v967_v49 = vsel %vm966_vm9, %v5516_v39, %v963_v48 }
 0x8ef   :  { %v969_v52 = vmul.f32 %v967_v49, %v935_v19  ;;  %v5286_v19 = vld [vmem:[%s5740_s25 + $0x38] sm:$0xff]  ;;  %s6655_s25 = sld [smem:[#allocation10_spill]] }
 0x8f1   :  { %v974_v53 = vmul.f32 %v5431_v46, %v969_v52 }
 0x8f3   :  { %v6070_v55 = vadd.f32 %v5432_v50, %v974_v53 }
 0x8f5   :  { %v6074_v57 = vpack.c.bf16 %v6070_v55, %v6068_v54 }
 0x8f7   :  { %4712 = vmatmul.msk.bf16.vlgmr.msra.gmra.mxu3 %vm277_vm2, %v6074_v57  ;;  %4721 = vmatmul.msk.bf16.vlgmr.msrb.gmra.mxu0 %vm277_vm2, %v6074_v57 }
 0x8f8   :  { %4730 = vmatmul.msk.bf16.vlgmr.msrb.gmra.mxu1 %vm277_vm2, %v6074_v57 }
 0x974   :  { %v1080_v60 = vpop.f32.mrf.mxu0 }
 0x975   :  { %v1081_v61 = vadd.f32 %v5433_v58, %v1080_v60  ;;  %v1109_v62 = vpop.f32.mrf.mxu1 }
 0x976   :  { %v1110_v56 = vadd.f32 %v5434_v59, %v1109_v62 }
 0x977   :  { %v1118_v63 = vpack.c.bf16 %v1081_v61, %v1081_v61 }
 0x978   :  { %v1120_v2 = vpack.c.bf16 %v1110_v56, %v1110_v56 }
 0x979   :  { %v1126_v3 = vsel %vm361_vm3, %v1118_v63, 0 }
 0x97a   :  { %v1214_v4 = vsel %vm208_vm0, %v1120_v2, 0  ;;  %v1051_v5 = vpop.f32.mrf.mxu3  ;;  %1135 = vmatpush.bf16.xpose.msrb.mxu2 %v1126_v3  ;;  %v5290_v2 = vld [vmem:[%s5750_s3 + $0x38] sm:$0xff] }
 0x97b   :  { %v1052_v7 = vadd.f32 %v5435_v0, %v1051_v5  ;;  %1223 = vmatpush.bf16.msra.mxu0 %v1214_v4  ;;  %v5289_v4 = vld [vmem:[%s5750_s3 + $0x30] sm:$0xff]  ;;  %s6657_s3 = sld [smem:[#allocation14_spill]] }
 0x97c   :  { %v1082_v9 = vpop.f32.mrf.mxu0 }
 0x97d   :  { %v1114_v10 = vmul.f32 0.25, %v1052_v7  ;;  %v1083_v11 = vadd.f32 %v5433_v58, %v1082_v9  ;;  %v1111_v12 = vpop.f32.mrf.mxu1 }
 0x97e   :  { %v1112_v13 = vadd.f32 %v5434_v59, %v1111_v12 }
 0x97f   :  { %v1116_v17 = vpack.c.bf16 %v1114_v10, %v1114_v10  ;;  %v1119_v18 = vpack.c.bf16 %v1083_v11, %v1083_v11  ;;  %1328 = vmatpush.bf16.msrb.mxu0 %v5290_v2  ;;  %v5295_v2 = vld [vmem:[%s6648_s0 + $0x20] sm:$0xff] }
 0x980   :  { %v1121_v20 = vpack.c.bf16 %v1112_v13, %v1112_v13 }
 0x981   :  { %4731 = vmatmul.msk.bf16.vlgmr.msrb.gmra.mxu2 %vm361_vm3, %v1116_v17  ;;  %v1145_v21 = vsel %vm361_vm3, %v1119_v18, 0 }
 0x982   :  { %1270 = vmatpush.bf16.msra.mxu2 %v5282_v1  ;;  %v1053_v22 = vpop.f32.mrf.mxu3  ;;  %1154 = vmatpush.bf16.xpose.msrb.mxu3 %v1145_v21  ;;  %v1233_v23 = vsel %vm208_vm0, %v1121_v20, 0 }
 0x983   :  { %v1054_v24 = vadd.f32 %v5435_v0, %v1053_v22  ;;  %1242 = vmatpush.bf16.msra.mxu1 %v1233_v23  ;;  %1329 = vmatpush.bf16.msrb.mxu0 %v5289_v4 }
 0x985   :  { %v1115_v26 = vmul.f32 0.25, %v1054_v24 }
 0x986   :  { %1271 = vmatpush.bf16.msra.mxu2 %v5281_v8 }
 0x987   :  { %v1117_v27 = vpack.c.bf16 %v1115_v26, %v1115_v26 }
 0x989   :  { %4732 = vmatmul.msk.bf16.vlgmr.msrb.gmra.mxu3 %vm361_vm3, %v1117_v27 }
 0x98a   :  { %1299 = vmatpush.bf16.msra.mxu3 %v5286_v19 }
 0x98e   :  { %1300 = vmatpush.bf16.msra.mxu3 %v5285_v25 }
 0x991   :  { %4743 = vmatmul.msk.bf16.vlgmr.msra.gmra.mxu2 %vm277_vm2, %v6074_v57 }
 0x999   :  { %4752 = vmatmul.msk.bf16.vlgmr.msra.gmra.mxu3 %vm277_vm2, %v6074_v57 }
 0xa04   :  { %v1137_v28 = vpop.f32.mrf.mxu2 }
 0xa05   :  { %v1160_v29 = vsel %vm204_vm1, %v1137_v28, -inf }
 0xa06   :  { %1161 = vmax.xlane.f32.xlu0 %v1160_v29 }
 0xa0c   :  { %v1139_v30 = vpop.f32.mrf.mxu2  ;;  %v1156_v31 = vpop.f32.mrf.mxu3 }
 0xa0d   :  { %v1163_v32 = vsel %vm204_vm1, %v1156_v31, -inf }
 0xa0e   :  { %1164 = vmax.xlane.f32.xlu1 %v1163_v32 }
 0xa14   :  { %v1158_v34 = vpop.f32.mrf.mxu3  ;;  %v1273_v35 = vpop.f32.mrf.mxu2 }
 0xa15   :  { %v6102_v36 = vadd.f32 %v5436_v33, %v1273_v35 }
 0xa17   :  { %v1336_v34 = vmul.f32 0.25, %v6102_v36 }
 0xa19   :  { %v1338_v35 = vpack.c.bf16 %v1336_v34, %v1336_v34  ;;  %v5300_v34 = vld [vmem:[%s6655_s25 + $0x8] sm:$0xff] }
 0xa1c   :  { %v1302_v38 = vpop.f32.mrf.mxu3  ;;  %v1275_v42 = vpop.f32.mrf.mxu2 }
 0xa1d   :  { %v1303_v39 = vadd.f32 %v5437_v37, %v1302_v38  ;;  %v1276_v45 = vadd.f32 %v5436_v33, %v1275_v42  ;;  %v5304_v38 = vld [vmem:[%s6653_s17 + $0x8] sm:$0xff] }
 0xa1f   :  { %v1340_v40 = vpack.c.bf16 %v1303_v39, %v1303_v39  ;;  %v1337_v48 = vmul.f32 0.25, %v1276_v45  ;;  %v5303_v39 = vld [vmem:[%s6653_s17] sm:$0xff] }
 0xa21   :  { %v1348_v41 = vsel %vm361_vm3, %v1340_v40, 0  ;;  %v1339_v49 = vpack.c.bf16 %v1337_v48, %v1337_v48 }
 0xa22   :  { %1357 = vmatpush.bf16.xpose.msrb.mxu1 %v1348_v41 }
 0xa24   :  { %v1304_v43 = vpop.f32.mrf.mxu3 }
 0xa25   :  { %v1305_v44 = vadd.f32 %v5437_v37, %v1304_v43  ;;  %v5291_v37 = vld [vmem:[%s5760_s14 + $0x10] sm:$0xff] }
 0xa27   :  { %v1341_v46 = vpack.c.bf16 %v1305_v44, %v1305_v44 }
 0xa29   :  { %v1367_v47 = vsel %vm361_vm3, %v1341_v46, 0 }
 0xa2a   :  { %1376 = vmatpush.bf16.xpose.msrb.mxu2 %v1367_v47 }
 0xa31   :  { %4763 = vmatmul.msk.bf16.vlgmr.msrb.gmra.mxu2 %vm361_vm3, %v1339_v49 }
 0xa32   :  { %1510 = vmatpush.bf16.msra.mxu2 %v5291_v37 }
 0xa36   :  { %1825 = vmatpush.bf16.msrb.mxu2 %v5304_v38 }
 0xa3a   :  { %1826 = vmatpush.bf16.msrb.mxu2 %v5303_v39 }
 0xa79   :  { %v1162_v50 = vpop.xlane.xlu0 %1161 }
 0xa7a   :  { %v1166_v51 = vsub.f32 %v1137_v28, %v1162_v50 }
 0xa7c   :  { %v1168_v52 = vmul.f32 1.442695, %v1166_v51 }
 0xa7e   :  { %5517 = vpow2.f32 %v1168_v52 }
 0xa81   :  { %v1165_v53 = vpop.xlane.xlu1 %1164 }
 0xa82   :  { %v1167_v58 = vsub.f32 %v1156_v31, %v1165_v53 }
 0xa84   :  { %v5518_v59 = vpop.eup %5517  ;;  %v1170_v60 = vmul.f32 1.442695, %v1167_v58 }
 0xa85   :  { %v1172_v61 = vsel %vm204_vm1, %v5518_v59, 0.0 }
 0xa86   :  { %5519 = vpow2.f32 %v1170_v60  ;;  %1173 = vadd.xlane.f32.xlu1 %v1172_v61 }
 0xa8c   :  { %v5520_v62 = vpop.eup %5519 }
 0xa8d   :  { %v1175_v56 = vsel %vm204_vm1, %v5520_v62, 0.0 }
 0xa8e   :  { %1176 = vadd.xlane.f32.xlu2 %v1175_v56 }
 0xab4   :  { %v6110_v63 = vpop.f32.mrf.mxu2 }
 0xab5   :  { %v1385_v0 = vsel %vm204_vm1, %v6110_v63, -inf }
 0xab6   :  { %1386 = vmax.xlane.f32.xlu0 %v1385_v0  ;;  %v5297_v0 = vld [vmem:[%s6648_s0 + $0x30] sm:$0xff] }
 0xabc   :  { %v1380_v1 = vpop.f32.mrf.mxu2 }
 0xabd   :  { %v5296_v1 = vld [vmem:[%s6648_s0 + $0x28] sm:$0xff] }
 0xaf9   :  { %v1174_v3 = vpop.xlane.xlu1 %1173 }
 0xafa   :  { %5521 = vrcp.f32 %v1174_v3  ;;  %v1189_v10 = vand.u32 2147483648, %v1174_v3  ;;  %v1187_v12 = vand.u32 2147483647, %v1174_v3  ;;  %vm1183_vm11 = vweird.f32 %v1174_v3 }
 0xafc   :  { %v1190_v18 = vor.u32 1.1754944e-38, %v1189_v10  ;;  %vm1188_vm13 = vcmp.eq.f32.partialorder %v1187_v12, 8.507059e+37 }
 0xb00   :  { %v5522_v5 = vpop.eup %5521 }
 0xb01   :  { %v1179_v7 = vmul.f32 %v5522_v5, %v1174_v3  ;;  %v1177_v8 = vpop.xlane.xlu2 %1176  ;;  %vm1184_vm10 = vweird.f32 %v5522_v5 }
 0xb02   :  { %5523 = vrcp.f32 %v1177_v8  ;;  %vm1185_vm12 = vmor %vm1183_vm11, %vm1184_vm10  ;;  %v1204_v24 = vand.u32 2147483648, %v1177_v8  ;;  %v1202_v26 = vand.u32 2147483647, %v1177_v8  ;;  %vm1198_vm4 = vweird.f32 %v1177_v8 }
 0xb03   :  { %v1180_v9 = vsub.f32 1.0, %v1179_v7 }
 0xb04   :  { %v1205_v29 = vor.u32 1.1754944e-38, %v1204_v24  ;;  %vm1203_vm6 = vcmp.eq.f32.partialorder %v1202_v26, 8.507059e+37 }
 0xb05   :  { %v1181_v11 = vmul.f32 %v5522_v5, %v1180_v9 }
 0xb07   :  { %v1182_v13 = vadd.f32 %v5522_v5, %v1181_v11 }
 0xb08   :  { %v5524_v17 = vpop.eup %5523 }
 0xb09   :  { %v1186_v19 = vsel %vm1185_vm12, %v5522_v5, %v1182_v13  ;;  %v1194_v20 = vmul.f32 %v5524_v17, %v1177_v8  ;;  %vm1199_vm14 = vweird.f32 %v5524_v17 }
 0xb0a   :  { %v1191_v21 = vsel %vm1188_vm13, %v1190_v18, %v1186_v19  ;;  %vm1200_vm5 = vmor %vm1198_vm4, %vm1199_vm14  ;;  %v5439_v18 = vld [vmem:[%s6654_s21] ss:$0 sm:$0xff] }
 0xb0b   :  { %v1192_v22 = vmul.f32 %v5518_v59, %v1191_v21  ;;  %v1195_v23 = vsub.f32 1.0, %v1194_v20 }
 0xb0d   :  { %v1196_v25 = vmul.f32 %v5524_v17, %v1195_v23  ;;  %v1208_v27 = vpack.c.bf16 %v1192_v22, %v1192_v22 }
 0xb0f   :  { %v1197_v28 = vadd.f32 %v5524_v17, %v1196_v25  ;;  %4733 = vmatmul.msk.bf16.vlgmr.msra.gmra.mxu0 %vm204_vm1, %v1208_v27 }
 0xb11   :  { %v1201_v30 = vsel %vm1200_vm5, %v5524_v17, %v1197_v28 }
 0xb12   :  { %v1206_v31 = vsel %vm1203_vm6, %v1205_v29, %v1201_v30 }
 0xb13   :  { %v1207_v32 = vmul.f32 %v5520_v62, %v1206_v31 }
 0xb15   :  { %v1209_v33 = vpack.c.bf16 %v1207_v32, %v1207_v32 }
 0xb17   :  { %4734 = vmatmul.msk.bf16.vlgmr.msra.gmra.mxu1 %vm204_vm1, %v1209_v33  ;;  %v5292_v33 = vld [vmem:[%s5760_s14 + $0x18] sm:$0xff]  ;;  %s6659_s14 = sld [smem:[#allocation16_spill]] }
 0xb18   :  { %1487 = vmatpush.bf16.msra.mxu1 %v5292_v33 }
 0xb1f   :  { %4761 = vmatmul.msk.bf16.vlgmr.msrb.gmra.mxu0 %vm277_vm2, %v6074_v57  ;;  %v5438_v57 = vld [vmem:[%s5755_s8 + $0x3] ss:$0 sm:$0xff]  ;;  %s6658_s8 = sld [smem:[#allocation15_spill]] }
 0xb27   :  { %4762 = vmatmul.msk.bf16.vlgmr.msrb.gmra.mxu1 %vm361_vm3, %v1338_v35 }
 0xb28   :  { %1796 = vmatpush.bf16.msrb.mxu1 %v5300_v34  ;;  %v5293_v34 = vld [vmem:[%s5780_s6 + $0x10] sm:$0xff] }
 0xb29   :  { %v1387_v44 = vpop.xlane.xlu0 %1386 }
 0xb2a   :  { %v1389_v45 = vsub.f32 %v6110_v63, %v1387_v44  ;;  %v5298_v63 = vld [vmem:[%s6648_s0 + $0x38] sm:$0xff]  ;;  %s6675_s0 = sld [smem:[#allocation31_spill]] }
 0xb2c   :  { %v1392_v49 = vmul.f32 1.442695, %v1389_v45 }
 0xb2e   :  { %5525 = vpow2.f32 %v1392_v49 }
 0xb34   :  { %v5526_v61 = vpop.eup %5525 }
 0xb35   :  { %v1397_v56 = vsel %vm204_vm1, %v5526_v61, 0.0 }
 0xb8c   :  { %v1225_v40 = vpop.f32.mrf.mxu0 }
 0xb94   :  { %v1227_v41 = vpop.f32.mrf.mxu0  ;;  %v1244_v42 = vpop.f32.mrf.mxu1 }
 0xb95   :  { %v1248_v43 = vpack.c.bf16 %v1244_v42, %v1225_v40 }
 0xb97   :  { %4775 = vmatmul.msk.bf16.vlgmr.msra.gmra.mxu2 %vm361_vm3, %v1248_v43 }
 0xb9c   :  { %v1246_v36 = vpop.f32.mrf.mxu1  ;;  %v1331_v46 = vpop.f32.mrf.mxu0 }
 0xb9d   :  { %v1332_v47 = vadd.f32 %v5438_v57, %v1331_v46 }
 0xb9f   :  { %v1342_v48 = vpack.c.bf16 %v1332_v47, %v1332_v47 }
 0xba1   :  { %v1436_v50 = vsel %vm208_vm0, %v1342_v48, 0  ;;  %v5299_v48 = vld [vmem:[%s6655_s25] sm:$0xff] }
 0xba2   :  { %1445 = vmatpush.bf16.msrb.mxu3 %v1436_v50  ;;  %1797 = vmatpush.bf16.msrb.mxu1 %v5299_v48 }
 0xba4   :  { %v1333_v51 = vpop.f32.mrf.mxu0  ;;  %v1359_v52 = vpop.f32.mrf.mxu1 }
 0xba5   :  { %v1334_v53 = vadd.f32 %v5438_v57, %v1333_v51  ;;  %v1382_v58 = vsel %vm204_vm1, %v1359_v52, -inf }
 0xba6   :  { %1383 = vmax.xlane.f32.xlu2 %v1382_v58 }
 0xba7   :  { %v1343_v59 = vpack.c.bf16 %v1334_v53, %v1334_v53  ;;  %4837 = vmatmul.msk.bf16.vlgmr.msrb.gmra.mxu2 %vm277_vm2, %v5970_v16 }
 0xba9   :  { %v1455_v60 = vsel %vm208_vm0, %v1343_v59, 0 }
 0xbaa   :  { %1464 = vmatpush.bf16.msra.mxu0 %v1455_v60  ;;  %v5440_v60 = vld [vmem:[%s5765_s19 + $0x1] ss:$0 sm:$0xff]  ;;  %s6660_s19 = sld [smem:[#allocation17_spill]] }
 0xbac   :  { %v1361_v62 = vpop.f32.mrf.mxu1 }
 0xbae   :  { %1398 = vadd.xlane.f32.xlu2 %v1397_v56  ;;  %1670 = vmatpush.bf16.msrb.mxu0 %v5298_v63  ;;  %v5305_v63 = vld [vmem:[%s6653_s17 + $0x10] sm:$0xff] }
 0xbb2   :  { %1671 = vmatpush.bf16.msrb.mxu0 %v5297_v0 }
 0xbb6   :  { %1672 = vmatpush.bf16.msrb.mxu0 %v5296_v1 }
 0xbba   :  { %1673 = vmatpush.bf16.msrb.mxu0 %v5295_v2 }
 0xc19   :  { %v1384_v3 = vpop.xlane.xlu2 %1383 }
 0xc1a   :  { %v1388_v4 = vsub.f32 %v1359_v52, %v1384_v3  ;;  %v6138_v5 = vpop.f32.mrf.mxu2 }
 0xc1c   :  { %v1390_v7 = vmul.f32 1.442695, %v1388_v4 }
 0xc1e   :  { %5527 = vpow2.f32 %v1390_v7 }
 0xc21   :  { %v1399_v8 = vpop.xlane.xlu2 %1398 }
 0xc22   :  { %5529 = vrcp.f32 %v1399_v8  ;;  %v6140_v9 = vpop.f32.mrf.mxu2  ;;  %v1426_v19 = vand.u32 2147483648, %v1399_v8  ;;  %v1424_v22 = vand.u32 2147483647, %v1399_v8  ;;  %vm1420_vm8 = vweird.f32 %v1399_v8 }
 0xc24   :  { %v5528_v10 = vpop.eup %5527  ;;  %v1427_v25 = vor.u32 1.1754944e-38, %v1426_v19  ;;  %vm1425_vm10 = vcmp.eq.f32.partialorder %v1424_v22, 8.507059e+37 }
 0xc25   :  { %v1394_v11 = vsel %vm204_vm1, %v5528_v10, 0.0 }
 0xc26   :  { %1395 = vadd.xlane.f32.xlu1 %v1394_v11 }
 0xc28   :  { %v5530_v12 = vpop.eup %5529 }
 0xc29   :  { %v1416_v13 = vmul.f32 %v5530_v12, %v1399_v8  ;;  %vm1421_vm7 = vweird.f32 %v5530_v12  ;;  %v5441_v8 = vld [vmem:[%s6656_s29] ss:$0 sm:$0xff] }
 0xc2a   :  { %v1828_v20 = vpop.f32.mrf.mxu2  ;;  %vm1422_vm9 = vmor %vm1420_vm8, %vm1421_vm7 }
 0xc2b   :  { %v1417_v17 = vsub.f32 1.0, %v1416_v13  ;;  %v1829_v24 = vadd.f32 %v5439_v18, %v1828_v20 }
 0xc2d   :  { %v1418_v21 = vmul.f32 %v5530_v12, %v1417_v17  ;;  %v1866_v29 = vpack.c.bf16 %v1829_v24, %v1829_v24 }
 0xc2f   :  { %v1419_v23 = vadd.f32 %v5530_v12, %v1418_v21  ;;  %v1874_v31 = vsel %vm361_vm3, %v1866_v29, 0 }
 0xc31   :  { %v1423_v26 = vsel %vm1422_vm9, %v5530_v12, %v1419_v23 }
 0xc32   :  { %v1428_v27 = vsel %vm1425_vm10, %v1427_v25, %v1423_v26  ;;  %v1830_v49 = vpop.f32.mrf.mxu2 }
 0xc33   :  { %v1429_v28 = vmul.f32 %v5526_v61, %v1428_v27  ;;  %v1831_v50 = vadd.f32 %v5439_v18, %v1830_v49  ;;  %v5306_v61 = vld [vmem:[%s6653_s17 + $0x18] sm:$0xff] }
 0xc35   :  { %v1431_v30 = vpack.c.bf16 %v1429_v28, %v1429_v28  ;;  %v1867_v51 = vpack.c.bf16 %v1831_v50, %v1831_v50 }
 0xc37   :  { %4765 = vmatmul.msk.bf16.vlgmr.msra.gmra.mxu0 %vm204_vm1, %v1431_v30  ;;  %v1893_v58 = vsel %vm361_vm3, %v1867_v51, 0  ;;  %v5294_v30 = vld [vmem:[%s5780_s6 + $0x18] sm:$0xff]  ;;  %v5443_v51 = vld [vmem:[%s5770_s24 + $0x1] ss:$0 sm:$0xff]  ;;  %s6661_s24 = sld [smem:[#allocation22_spill]] }
 0xc38   :  { %1883 = vmatpush.bf16.xpose.msra.mxu0 %v1874_v31  ;;  %1625 = vmatpush.bf16.msra.mxu3 %v5294_v30  ;;  %s6663_s6 = sld [smem:[#allocation20_spill]] }
 0xc3c   :  { %1626 = vmatpush.bf16.msra.mxu3 %v5293_v34 }
 0xc99   :  { %v1396_v32 = vpop.xlane.xlu1 %1395 }
 0xc9a   :  { %5531 = vrcp.f32 %v1396_v32  ;;  %v1411_v39 = vand.u32 2147483648, %v1396_v32  ;;  %v1409_v41 = vand.u32 2147483647, %v1396_v32  ;;  %vm1405_vm12 = vweird.f32 %v1396_v32 }
 0xc9c   :  { %v1412_v43 = vor.u32 1.1754944e-38, %v1411_v39  ;;  %vm1410_vm14 = vcmp.eq.f32.partialorder %v1409_v41, 8.507059e+37  ;;  %v5307_v39 = vld [vmem:[%s6657_s3] sm:$0xff] }
 0xca0   :  { %v5532_v35 = vpop.eup %5531 }
 0xca1   :  { %v1401_v37 = vmul.f32 %v5532_v35, %v1396_v32  ;;  %vm1406_vm11 = vweird.f32 %v5532_v35 }
 0xca2   :  { %vm1407_vm13 = vmor %vm1405_vm12, %vm1406_vm11 }
 0xca3   :  { %v1402_v38 = vsub.f32 1.0, %v1401_v37  ;;  %v5308_v37 = vld [vmem:[%s6657_s3 + $0x8] sm:$0xff] }
 0xca5   :  { %v1403_v40 = vmul.f32 %v5532_v35, %v1402_v38 }
 0xca7   :  { %v1404_v42 = vadd.f32 %v5532_v35, %v1403_v40 }
 0xca9   :  { %v1408_v44 = vsel %vm1407_vm13, %v5532_v35, %v1404_v42 }
 0xcaa   :  { %v1413_v57 = vsel %vm1410_vm14, %v1412_v43, %v1408_v44 }
 0xcab   :  { %v1414_v45 = vmul.f32 %v5528_v10, %v1413_v57 }
 0xcad   :  { %v1430_v36 = vpack.c.bf16 %v1414_v45, %v1414_v45 }
 0xcaf   :  { %4764 = vmatmul.msk.bf16.vlgmr.msrb.gmra.mxu3 %vm204_vm1, %v1430_v36 }
 0xcb0   :  { %1854 = vmatpush.bf16.msrb.mxu3 %v5308_v37 }
 0xcb4   :  { %v1466_v46 = vpop.f32.mrf.mxu0  ;;  %1855 = vmatpush.bf16.msrb.mxu3 %v5307_v39 }
 0xcbc   :  { %v1468_v47 = vpop.f32.mrf.mxu0 }
 0xd32   :  { %v1447_v52 = vpop.f32.mrf.mxu3 }
 0xd33   :  { %v1470_v53 = vpack.c.bf16 %v1466_v46, %v1447_v52 }
 0xd35   :  { %4770 = vmatmul.msk.bf16.vlgmr.msra.gmra.mxu1 %vm361_vm3, %v1470_v53 }
 0xd36   :  { %1902 = vmatpush.bf16.xpose.msra.mxu1 %v1893_v58 }
 0xd3a   :  { %v1449_v59 = vpop.f32.mrf.mxu3 }
 0xd45   :  { %4828 = vmatmul.msk.bf16.vlgmr.msrb.gmra.mxu1 %vm277_vm2, %v5970_v16 }
 0xd46   :  { %2047 = vmatpush.bf16.msrb.mxu1 %v5306_v61 }
 0xd4a   :  { %2048 = vmatpush.bf16.msrb.mxu1 %v5305_v63 }
 0xdb2   :  { %v1489_v62 = vpop.f32.mrf.mxu1 }
 0xdb3   :  { %v1513_v56 = vadd.f32 %v6138_v5, %v1489_v62  ;;  %v5444_v62 = vld [vmem:[%s5775_s30 + $0x1] ss:$0 sm:$0xff]  ;;  %s6662_s30 = sld [smem:[#allocation24_spill]] }
 0xdb5   :  { %v1520_v0 = vadd.f32 %v5440_v60, %v1513_v56 }
 0xdb7   :  { %v1522_v1 = vadd.f32 %v1520_v0, %v6068_v54 }
 0xdb9   :  { %v1528_v2 = vsel %vm277_vm2, %v1522_v1, 0.0 }
 0xdba   :  { %1529 = vadd.xlane.f32.xlu0 %v1528_v2  ;;  %v1491_v3 = vpop.f32.mrf.mxu1 }
 0xdbb   :  { %v1515_v4 = vadd.f32 %v6140_v9, %v1491_v3 }
 0xdbd   :  { %v1521_v7 = vadd.f32 %v5440_v60, %v1515_v4 }
 0xdbf   :  { %v1523_v10 = vadd.f32 %v1521_v7, %v6070_v55 }
 0xdc1   :  { %v1531_v11 = vsel %vm277_vm2, %v1523_v10, 0.0 }
 0xdc2   :  { %v1799_v12 = vpop.f32.mrf.mxu1  ;;  %1532 = vadd.xlane.f32.xlu1 %v1531_v11 }
 0xdc3   :  { %v6164_v5 = vadd.f32 %v5441_v8, %v1799_v12  ;;  %v5445_v12 = vld [vmem:[%s6649_s5 + $0x1] ss:$0 sm:$0xff]  ;;  %s6676_s5 = sld [smem:[#allocation33_spill]] }
 0xdca   :  { %v1801_v13 = vpop.f32.mrf.mxu1 }
 0xdcb   :  { %v1802_v17 = vadd.f32 %v5441_v8, %v1801_v13 }
 0xdcd   :  { %v1863_v54 = vmul.f32 0.25, %v1802_v17 }
 0xdcf   :  { %v1865_v18 = vpack.c.bf16 %v1863_v54, %v1863_v54 }
 0xdd1   :  { %4848 = vmatmul.msk.bf16.vlgmr.msra.gmra.mxu1 %vm361_vm3, %v1865_v18 }
 0xde1   :  { %4868 = vmatmul.msk.bf16.vlgmr.msrb.gmra.mxu1 %vm277_vm2, %v5970_v16 }
 0xe2d   :  { %v1530_v9 = vpop.xlane.xlu0 %1529 }
 0xe2e   :  { %v1534_v19 = vmul.f32 %v1530_v9, %v6032_v6 }
 0xe30   :  { %v1536_v55 = vsub.f32 %v1522_v1, %v1534_v19 }
 0xe32   :  { %v1538_v20 = vmul.f32 %v1536_v55, %v1536_v55 }
 0xe34   :  { %v1540_v21 = vsel %vm277_vm2, %v1538_v20, 0.0 }
 0xe35   :  { %1541 = vadd.xlane.f32.xlu2 %v1540_v21  ;;  %v1533_v22 = vpop.xlane.xlu1 %1532  ;;  %v5302_v21 = vld [vmem:[%s6655_s25 + $0x18] sm:$0xff] }
 0xe36   :  { %v1535_v23 = vmul.f32 %v1533_v22, %v6032_v6 }
 0xe38   :  { %v1537_v24 = vsub.f32 %v1523_v10, %v1535_v23 }
 0xe3a   :  { %v1539_v25 = vmul.f32 %v1537_v24, %v1537_v24 }
 0xe3c   :  { %v1543_v26 = vsel %vm277_vm2, %v1539_v25, 0.0 }
 0xe3d   :  { %1544 = vadd.xlane.f32.xlu0 %v1543_v26  ;;  %v5301_v26 = vld [vmem:[%s6655_s25 + $0x10] sm:$0xff] }
 0xe4e   :  { %v1904_v27 = vpop.f32.mrf.mxu1 }
 0xe4f   :  { %v1911_v28 = vsel %vm204_vm1, %v1904_v27, -inf }
 0xe50   :  { %1912 = vmax.xlane.f32.xlu1 %v1911_v28 }
 0xe56   :  { %v1906_v29 = vpop.f32.mrf.mxu1 }
 0xe57   :  { %v5442_v29 = vld [vmem:[%s6654_s21 + $0x1] ss:$0 sm:$0xff] }
 0xe5e   :  { %v2050_v19 = vpop.f32.mrf.mxu1 }
 0xe5f   :  { %v2051_v37 = vadd.f32 %v5442_v29, %v2050_v19 }
 0xea8   :  { %v1542_v31 = vpop.xlane.xlu2 %1541 }
 0xea9   :  { %v1546_v32 = vmul.f32 %v1542_v31, %v6032_v6 }
 0xeab   :  { %v1548_v33 = vadd.f32 1e-05, %v1546_v32 }
 0xead   :  { %5533 = vrsqrt.f32 %v1548_v33  ;;  %vm1556_vm5 = vweird.f32 %v1548_v33 }
 0xeb0   :  { %v1545_v35 = vpop.xlane.xlu0 %1544 }
 0xeb1   :  { %v1547_v38 = vmul.f32 %v1545_v35, %v6032_v6 }
 0xeb3   :  { %v5534_v40 = vpop.eup %5533  ;;  %v1549_v41 = vadd.f32 1e-05, %v1547_v38 }
 0xeb4   :  { %v1551_v42 = vmul.f32 %v5534_v40, %v1548_v33  ;;  %vm1557_vm4 = vweird.f32 %v5534_v40  ;;  %v2052_v33 = vpop.f32.mrf.mxu1 }
 0xeb5   :  { %5535 = vrsqrt.f32 %v1549_v41  ;;  %vm1558_vm6 = vmor %vm1556_vm5, %vm1557_vm4  ;;  %vm1566_vm8 = vweird.f32 %v1549_v41  ;;  %v2053_v39 = vadd.f32 %v5442_v29, %v2052_v33 }
 0xeb6   :  { %v1552_v43 = vmul.f32 %v5534_v40, %v1551_v42  ;;  %v1862_v42 = vmul.f32 0.25, %v6164_v5 }
 0xeb8   :  { %v1553_v44 = vmul.f32 0.5, %v1552_v43 }
 0xeba   :  { %v1554_v57 = vsub.f32 1.5, %v1553_v44  ;;  %v2088_v44 = vpack.c.bf16 %v2051_v37, %v2051_v37 }
 0xebb   :  { %v5536_v45 = vpop.eup %5535 }
 0xebc   :  { %v1555_v36 = vmul.f32 %v5534_v40, %v1554_v57  ;;  %v1561_v46 = vmul.f32 %v5536_v45, %v1549_v41  ;;  %vm1567_vm7 = vweird.f32 %v5536_v45  ;;  %v2089_v57 = vpack.c.bf16 %v2053_v39, %v2053_v39 }
 0xebd   :  { %vm1568_vm9 = vmor %vm1566_vm8, %vm1567_vm7 }
 0xebe   :  { %v1562_v47 = vmul.f32 %v5536_v45, %v1561_v46  ;;  %v1559_v48 = vsel %vm1558_vm6, %v5534_v40, %v1555_v36  ;;  %v1864_v46 = vpack.c.bf16 %v1862_v42, %v1862_v42 }
 0xebf   :  { %v1570_v52 = vmul.f32 %v1559_v48, %v1536_v55  ;;  %v2096_v48 = vsel %vm361_vm3, %v2088_v44, 0 }
 0xec0   :  { %v1563_v49 = vmul.f32 0.5, %v1562_v47 }
 0xec1   :  { %v1575_v56 = vmul.f32 %v5443_v51, %v1570_v52 }
 0xec2   :  { %v1564_v50 = vsub.f32 1.5, %v1563_v49  ;;  %v2115_v49 = vsel %vm361_vm3, %v2089_v57, 0 }
 0xec3   :  { %v1913_v53 = vpop.xlane.xlu1 %1912  ;;  %v6182_v1 = vadd.f32 %v5444_v62, %v1575_v56 }
 0xec4   :  { %v1565_v58 = vmul.f32 %v5536_v45, %v1564_v50  ;;  %v1915_v59 = vsub.f32 %v1904_v27, %v1913_v53 }
 0xec6   :  { %v1569_v60 = vsel %vm1568_vm9, %v5536_v45, %v1565_v58  ;;  %v1918_v61 = vmul.f32 1.442695, %v1915_v59 }
 0xec7   :  { %v1571_v63 = vmul.f32 %v1569_v60, %v1537_v24  ;;  %v5446_v24 = vld [vmem:[%s6658_s8] ss:$0 sm:$0xff]  ;;  %v5448_v60 = vld [vmem:[%s6656_s29 + $0x1] ss:$0 sm:$0xff] }
 0xec8   :  { %5537 = vpow2.f32 %v1918_v61 }
 0xec9   :  { %v1576_v0 = vmul.f32 %v5443_v51, %v1571_v63 }
 0xecb   :  { %v6184_v2 = vadd.f32 %v5444_v62, %v1576_v0 }
 0xecd   :  { %v1600_v3 = vpack.c.bf16 %v6184_v2, %v6182_v1 }
 0xece   :  { %v5538_v4 = vpop.eup %5537 }
 0xecf   :  { %4800 = vmatmul.msk.bf16.vlgmr.msra.gmra.mxu3 %vm277_vm2, %v1600_v3  ;;  %v1923_v7 = vsel %vm204_vm1, %v5538_v4, 0.0 }
 0xed0   :  { %1924 = vadd.xlane.f32.xlu2 %v1923_v7 }
 0xedf   :  { %4846 = vmatmul.msk.bf16.vlgmr.msrb.gmra.mxu3 %vm277_vm2, %v5970_v16 }
 0xf43   :  { %v1925_v8 = vpop.xlane.xlu2 %1924 }
 0xf44   :  { %5539 = vrcp.f32 %v1925_v8  ;;  %v1952_v30 = vand.u32 2147483648, %v1925_v8  ;;  %vm1946_vm11 = vweird.f32 %v1925_v8  ;;  %v1950_v31 = vand.u32 2147483647, %v1925_v8 }
 0xf46   :  { %v1953_v38 = vor.u32 1.1754944e-38, %v1952_v30  ;;  %vm1951_vm13 = vcmp.eq.f32.partialorder %v1950_v31, 8.507059e+37 }
 0xf4a   :  { %v5540_v11 = vpop.eup %5539 }
 0xf4b   :  { %v1942_v13 = vmul.f32 %v5540_v11, %v1925_v8  ;;  %vm1947_vm10 = vweird.f32 %v5540_v11 }
 0xf4c   :  { %vm1948_vm12 = vmor %vm1946_vm11, %vm1947_vm10 }
 0xf4d   :  { %v1943_v18 = vsub.f32 1.0, %v1942_v13 }
 0xf4f   :  { %v1944_v22 = vmul.f32 %v5540_v11, %v1943_v18 }
 0xf51   :  { %v1945_v27 = vadd.f32 %v5540_v11, %v1944_v22 }
 0xf52   :  { %v1628_v10 = vpop.f32.mrf.mxu3 }
 0xf53   :  { %v1629_v17 = vadd.f32 %v5445_v12, %v1628_v10  ;;  %v1949_v34 = vsel %vm1948_vm12, %v5540_v11, %v1945_v27  ;;  %v5309_v27 = vld [vmem:[%s6657_s3 + $0x10] sm:$0xff] }
 0xf54   :  { %v1954_v40 = vsel %vm1951_vm13, %v1953_v38, %v1949_v34 }
 0xf55   :  { %v1633_v55 = vmax.f32 %v1629_v17, 0.0  ;;  %v1955_v45 = vmul.f32 %v5538_v4, %v1954_v40 }
 0xf57   :  { %v1957_v50 = vpack.c.bf16 %v1955_v45, %v1955_v45 }
 0xf5a   :  { %v1630_v54 = vpop.f32.mrf.mxu3 }
 0xf5b   :  { %v1631_v9 = vadd.f32 %v5445_v12, %v1630_v54  ;;  %v5447_v54 = vld [vmem:[%s6650_s9 + $0x1] ss:$0 sm:$0xff]  ;;  %s6677_s9 = sld [smem:[#allocation34_spill]] }
 0xf5d   :  { %v1634_v20 = vmax.f32 %v1631_v9, 0.0 }
 0xf5f   :  { %v1635_v23 = vpack.c.bf16 %v1634_v20, %v1633_v55 }
 0xf61   :  { %4817 = vmatmul.msk.bf16.vlgmr.msrb.gmra.mxu0 %vm904_vm15, %v1635_v23 }
 0xf62   :  { %v1857_v25 = vpop.f32.mrf.mxu3  ;;  %2018 = vmatpush.bf16.msrb.mxu0 %v5302_v21 }
 0xf63   :  { %v1858_v28 = vadd.f32 %v5446_v24, %v1857_v25  ;;  %v5310_v25 = vld [vmem:[%s6657_s3 + $0x18] sm:$0xff] }
 0xf65   :  { %v1868_v32 = vpack.c.bf16 %v1858_v28, %v1858_v28 }
 0xf66   :  { %2019 = vmatpush.bf16.msrb.mxu0 %v5301_v26 }
 0xf67   :  { %v1962_v35 = vsel %vm208_vm0, %v1868_v32, 0 }
 0xf68   :  { %1971 = vmatpush.bf16.msra.mxu2 %v1962_v35 }
 0xf6a   :  { %v1859_v41 = vpop.f32.mrf.mxu3 }
 0xf6b   :  { %v1860_v43 = vadd.f32 %v5446_v24, %v1859_v41 }
 0xf6c   :  { %2076 = vmatpush.bf16.msrb.mxu2 %v5310_v25 }
 0xf6d   :  { %v1869_v36 = vpack.c.bf16 %v1860_v43, %v1860_v43 }
 0xf6f   :  { %v1981_v47 = vsel %vm208_vm0, %v1869_v36, 0 }
 0xf70   :  { %1990 = vmatpush.bf16.msra.mxu3 %v1981_v47  ;;  %2077 = vmatpush.bf16.msrb.mxu2 %v5309_v27 }
 0xf71   :  { %4847 = vmatmul.msk.bf16.vlgmr.msra.gmra.mxu0 %vm361_vm3, %v1864_v46 }
 0xf72   :  { %2124 = vmatpush.bf16.xpose.msra.mxu0 %v2115_v49 }
 0xf73   :  { %4850 = vmatmul.msk.bf16.vlgmr.msra.gmra.mxu3 %vm204_vm1, %v1957_v50 }
 0xf74   :  { %2105 = vmatpush.bf16.xpose.msrb.mxu3 %v2096_v48 }
 0xf81   :  { %4859 = vmatmul.msk.bf16.vlgmr.msrb.gmra.mxu0 %vm277_vm2, %v5970_v16 }
 0xfde   :  { %v1675_v5 = vpop.f32.mrf.mxu0 }
 0xfdf   :  { %v1676_v9 = vadd.f32 %v5447_v54, %v1675_v5 }
 0xfe1   :  { %v1680_v21 = vadd.f32 %v1676_v9, %v6182_v1 }
 0xfe3   :  { %v1686_v23 = vsel %vm277_vm2, %v1680_v21, 0.0 }
 0xfe6   :  { %v6207_v51 = vpop.f32.mrf.mxu0 }
 0xfe7   :  { %v1678_v47 = vadd.f32 %v5447_v54, %v6207_v51 }
 0xfe9   :  { %v6234_v5 = vadd.f32 %v1678_v47, %v6184_v2 }
 0xfee   :  { %v1885_v52 = vpop.f32.mrf.mxu0 }
 0xfef   :  { %v1908_v53 = vsel %vm204_vm1, %v1885_v52, -inf }
 0xff0   :  { %1909 = vmax.xlane.f32.xlu0 %v1908_v53 }
 0xff6   :  { %v1887_v58 = vpop.f32.mrf.mxu0  ;;  %v6210_v59 = vpop.f32.mrf.mxu3 }
 0xff7   :  { %v5311_v58 = vld [vmem:[%s6659_s14] sm:$0xff] }
 0xff8   :  { %2258 = vmatpush.bf16.msrb.mxu0 %v5311_v58 }
 0xffe   :  { %v1994_v61 = vpop.f32.mrf.mxu3  ;;  %v2021_v62 = vpop.f32.mrf.mxu0 }
 0xfff   :  { %v2022_v56 = vadd.f32 %v5448_v60, %v2021_v62 }
0x1001   :  { %v2084_v63 = vmul.f32 0.25, %v2022_v56 }
0x1003   :  { %v2086_v0 = vpack.c.bf16 %v2084_v63, %v2084_v63 }
0x1005   :  { %4878 = vmatmul.msk.bf16.vlgmr.msrb.gmra.mxu3 %vm361_vm3, %v2086_v0 }
0x1006   :  { %v2023_v3 = vpop.f32.mrf.mxu0 }
0x1007   :  { %v2024_v4 = vadd.f32 %v5448_v60, %v2023_v3 }
0x1009   :  { %v2085_v7 = vmul.f32 0.25, %v2024_v4 }
0x100b   :  { %v2087_v8 = vpack.c.bf16 %v2085_v7, %v2085_v7 }
0x100d   :  { %4879 = vmatmul.msk.bf16.vlgmr.msra.gmra.mxu0 %vm361_vm3, %v2087_v8 }
0x1063   :  { %v1910_v10 = vpop.xlane.xlu0 %1909 }
0x1064   :  { %v1914_v11 = vsub.f32 %v1885_v52, %v1910_v10 }
0x1066   :  { %v1916_v12 = vmul.f32 1.442695, %v1914_v11 }
0x1068   :  { %5541 = vpow2.f32 %v1916_v12 }
0x106e   :  { %v5542_v13 = vpop.eup %5541 }
0x106f   :  { %v1920_v17 = vsel %vm204_vm1, %v5542_v13, 0.0 }
0x1070   :  { %1921 = vadd.xlane.f32.xlu1 %v1920_v17 }
0x1088   :  { %v2107_v18 = vpop.f32.mrf.mxu3 }
0x1089   :  { %v2130_v19 = vsel %vm204_vm1, %v2107_v18, -inf }
0x108a   :  { %v2126_v55 = vpop.f32.mrf.mxu0  ;;  %2131 = vmax.xlane.f32.xlu0 %v2130_v19 }
0x108b   :  { %v2133_v20 = vsel %vm204_vm1, %v2126_v55, -inf }
0x108c   :  { %2134 = vmax.xlane.f32.xlu2 %v2133_v20 }
0x1090   :  { %v2109_v22 = vpop.f32.mrf.mxu3 }
0x1092   :  { %v2128_v24 = vpop.f32.mrf.mxu0  ;;  %1687 = vadd.xlane.f32.xlu0 %v1686_v23 }
0x10e3   :  { %v1922_v26 = vpop.xlane.xlu1 %1921 }
0x10e4   :  { %5543 = vrcp.f32 %v1922_v26  ;;  %v1937_v31 = vand.u32 2147483648, %v1922_v26  ;;  %v1935_v33 = vand.u32 2147483647, %v1922_v26  ;;  %vm1931_vm4 = vweird.f32 %v1922_v26 }
0x10e6   :  { %v1938_v1 = vor.u32 1.1754944e-38, %v1937_v31  ;;  %vm1936_vm6 = vcmp.eq.f32.partialorder %v1935_v33, 8.507059e+37 }
0x10ea   :  { %v5544_v28 = vpop.eup %5543 }
0x10eb   :  { %v1927_v29 = vmul.f32 %v5544_v28, %v1922_v26  ;;  %vm1932_vm14 = vweird.f32 %v5544_v28 }
0x10ec   :  { %vm1933_vm5 = vmor %vm1931_vm4, %vm1932_vm14 }
0x10ed   :  { %v1928_v30 = vsub.f32 1.0, %v1927_v29 }
0x10ef   :  { %v1929_v32 = vmul.f32 %v5544_v28, %v1928_v30 }
0x10f1   :  { %v1930_v34 = vadd.f32 %v5544_v28, %v1929_v32 }
0x10f3   :  { %v1934_v35 = vsel %vm1933_vm5, %v5544_v28, %v1930_v34 }
0x10f4   :  { %v1939_v37 = vsel %vm1936_vm6, %v1938_v1, %v1934_v35  ;;  %v5312_v35 = vld [vmem:[%s6659_s14 + $0x8] sm:$0xff] }
0x10f5   :  { %v1940_v38 = vmul.f32 %v5542_v13, %v1939_v37  ;;  %v5449_v13 = vld [vmem:[%s6658_s8 + $0x1] ss:$0 sm:$0xff]  ;;  %2235 = vmatpush.bf16.msra.mxu3 %v5312_v35 }
0x10f7   :  { %v1956_v39 = vpack.c.bf16 %v1940_v38, %v1940_v38 }
0x10f9   :  { %4849 = vmatmul.msk.bf16.vlgmr.msra.gmra.mxu2 %vm204_vm1, %v1956_v39 }
0x10fd   :  { %v2132_v40 = vpop.xlane.xlu0 %2131 }
0x10fe   :  { %v2136_v41 = vsub.f32 %v2107_v18, %v2132_v40 }
0x10ff   :  { %v2135_v42 = vpop.xlane.xlu2 %2134 }
0x1100   :  { %v2138_v43 = vmul.f32 1.442695, %v2136_v41  ;;  %v2137_v44 = vsub.f32 %v2126_v55, %v2135_v42 }
0x1102   :  { %5545 = vpow2.f32 %v2138_v43  ;;  %v2140_v57 = vmul.f32 1.442695, %v2137_v44  ;;  %v5452_v43 = vld [vmem:[%s6660_s19] ss:$0 sm:$0xff] }
0x1104   :  { %5547 = vpow2.f32 %v2140_v57 }
0x1105   :  { %v1688_v49 = vpop.xlane.xlu0 %1687 }
0x1106   :  { %v1692_v50 = vmul.f32 %v1688_v49, %v6032_v6 }
0x1108   :  { %v5546_v45 = vpop.eup %5545  ;;  %v6236_v52 = vsub.f32 %v1680_v21, %v1692_v50 }
0x1109   :  { %4877 = vmatmul.msk.bf16.vlgmr.msrb.gmra.mxu2 %vm277_vm2, %v5970_v16  ;;  %v2142_v36 = vsel %vm204_vm1, %v5546_v45, 0.0  ;;  %v1689_v16 = vsel %vm277_vm2, %v6234_v5, 0.0 }
0x110a   :  { %v6227_v46 = vpop.eup %5547  ;;  %2143 = vadd.xlane.f32.xlu2 %v2142_v36  ;;  %v1696_v53 = vmul.f32 %v6236_v52, %v6236_v52 }
0x110b   :  { %v2145_v48 = vsel %vm204_vm1, %v6227_v46, 0.0 }
0x110c   :  { %2146 = vadd.xlane.f32.xlu1 %v2145_v48  ;;  %v1698_v51 = vsel %vm277_vm2, %v1696_v53, 0.0 }
0x1114   :  { %1690 = vadd.xlane.f32.xlu1 %v1689_v16 }
0x111c   :  { %1699 = vadd.xlane.f32.xlu1 %v1698_v51 }
0x117c   :  { %v1973_v60 = vpop.f32.mrf.mxu2 }
0x117d   :  { %v1996_v61 = vpack.c.bf16 %v6210_v59, %v1973_v60  ;;  %v2144_v62 = vpop.xlane.xlu2 %2143 }
0x117e   :  { %5549 = vrcp.f32 %v2144_v62  ;;  %v2157_v8 = vand.u32 2147483647, %v2144_v62  ;;  %v2159_v10 = vand.u32 2147483648, %v2144_v62  ;;  %vm2153_vm8 = vweird.f32 %v2144_v62 }
0x117f   :  { %4891 = vmatmul.msk.bf16.vlgmr.msrb.gmra.mxu0 %vm361_vm3, %v1996_v61  ;;  %v2147_v2 = vpop.xlane.xlu1 %2146 }
0x1180   :  { %5551 = vrcp.f32 %v2147_v2  ;;  %vm2158_vm10 = vcmp.eq.f32.partialorder %v2157_v8, 8.507059e+37  ;;  %v2160_v54 = vor.u32 1.1754944e-38, %v2159_v10  ;;  %v2174_v21 = vand.u32 2147483648, %v2147_v2  ;;  %v5321_v8 = vld [vmem:[%s6662_s30] sm:$0xff] }
0x1181   :  { %vm2168_vm12 = vweird.f32 %v2147_v2  ;;  %v2172_v23 = vand.u32 2147483647, %v2147_v2 }
0x1182   :  { %v2175_v27 = vor.u32 1.1754944e-38, %v2174_v21 }
0x1183   :  { %vm2173_vm14 = vcmp.eq.f32.partialorder %v2172_v23, 8.507059e+37 }
0x1184   :  { %v5550_v56 = vpop.eup %5549  ;;  %v1975_v63 = vpop.f32.mrf.mxu2 }
0x1185   :  { %v2149_v0 = vmul.f32 %v5550_v56, %v2144_v62  ;;  %vm2154_vm7 = vweird.f32 %v5550_v56  ;;  %v5322_v63 = vld [vmem:[%s6662_s30 + $0x8] sm:$0xff] }
0x1186   :  { %v5552_v3 = vpop.eup %5551  ;;  %vm2155_vm9 = vmor %vm2153_vm8, %vm2154_vm7  ;;  %2450 = vmatpush.bf16.msrb.mxu3 %v5322_v63  ;;  %v5454_v63 = vld [vmem:[%s6665_s26] ss:$0 sm:$0xff] }
0x1187   :  { %v2150_v4 = vsub.f32 1.0, %v2149_v0  ;;  %v2164_v7 = vmul.f32 %v5552_v3, %v2147_v2  ;;  %vm2169_vm11 = vweird.f32 %v5552_v3  ;;  %v1691_v44 = vpop.xlane.xlu1 %1690 }
0x1188   :  { %vm2170_vm13 = vmor %vm2168_vm12, %vm2169_vm11  ;;  %v1693_v36 = vmul.f32 %v1691_v44, %v6032_v6  ;;  %v5313_v44 = vld [vmem:[%s6663_s6] sm:$0xff] }
0x1189   :  { %v2151_v11 = vmul.f32 %v5550_v56, %v2150_v4  ;;  %v2165_v12 = vsub.f32 1.0, %v2164_v7  ;;  %v5317_v7 = vld [vmem:[%s6661_s24] sm:$0xff] }
0x118a   :  { %v6258_v48 = vsub.f32 %v6234_v5, %v1693_v36  ;;  %2451 = vmatpush.bf16.msrb.mxu3 %v5321_v8 }
0x118b   :  { %v2152_v59 = vadd.f32 %v5550_v56, %v2151_v11  ;;  %v2166_v17 = vmul.f32 %v5552_v3, %v2165_v12 }
0x118c   :  { %v2079_v18 = vpop.f32.mrf.mxu2  ;;  %v1697_v58 = vmul.f32 %v6258_v48, %v6258_v48 }
0x118d   :  { %v2156_v9 = vsel %vm2155_vm9, %v5550_v56, %v2152_v59  ;;  %v2167_v19 = vadd.f32 %v5552_v3, %v2166_v17  ;;  %v2080_v55 = vadd.f32 %v5449_v13, %v2079_v18  ;;  %v5318_v56 = vld [vmem:[%s6661_s24 + $0x8] sm:$0xff] }
0x118e   :  { %v2161_v20 = vsel %vm2158_vm10, %v2160_v54, %v2156_v9 }
0x118f   :  { %v2162_v22 = vmul.f32 %v5546_v45, %v2161_v20  ;;  %v2090_v24 = vpack.c.bf16 %v2080_v55, %v2080_v55  ;;  %v2171_v25 = vsel %vm2170_vm13, %v5552_v3, %v2167_v19  ;;  %v1700_v5 = vpop.xlane.xlu1 %1699 }
0x1190   :  { %v2176_v29 = vsel %vm2173_vm14, %v2175_v27, %v2171_v25  ;;  %v1704_v62 = vmul.f32 %v1700_v5, %v6032_v6  ;;  %v5453_v5 = vld [vmem:[%s6664_s23] ss:$0 sm:$0xff] }
0x1191   :  { %v2184_v26 = vsel %vm208_vm0, %v2090_v24, 0  ;;  %v2178_v28 = vpack.c.bf16 %v2162_v22, %v2162_v22  ;;  %v2177_v32 = vmul.f32 %v6227_v46, %v2176_v29 }
0x1192   :  { %2193 = vmatpush.bf16.msra.mxu1 %v2184_v26  ;;  %v1706_v2 = vadd.f32 1e-05, %v1704_v62 }
0x1193   :  { %v2179_v1 = vpack.c.bf16 %v2177_v32, %v2177_v32 }
0x1194   :  { %v2081_v30 = vpop.f32.mrf.mxu2  ;;  %5553 = vrsqrt.f32 %v1706_v2  ;;  %vm1714_vm5 = vweird.f32 %v1706_v2 }
0x1195   :  { %v2082_v31 = vadd.f32 %v5449_v13, %v2081_v30  ;;  %4880 = vmatmul.msk.bf16.vlgmr.msra.gmra.mxu1 %vm204_vm1, %v2178_v28  ;;  %v5450_v30 = vld [vmem:[%s6651_s13 + $0x1] ss:$0 sm:$0xff]  ;;  %s4514_s13 = sshll.u32 %s5950_s20, 4  ;;  %s4515_s13 = int_to_ptr.hbm [resolvable:$true] %s4514_s13 }
0x1197   :  { %v2091_v33 = vpack.c.bf16 %v2082_v31, %v2082_v31 }
0x1199   :  { %v2203_v34 = vsel %vm208_vm0, %v2091_v33, 0 }
0x119a   :  { %2212 = vmatpush.bf16.msra.mxu2 %v2203_v34  ;;  %v5554_v3 = vpop.eup %5553  ;;  %v5451_v34 = vld [vmem:[%s6652_s22 + $0x1] ss:$0 sm:$0xff]  ;;  %s5643_s22 = sshra.s32 %s4515_s13, 4  ;;  %s5644_s22 = int_to_ptr.hbm [resolvable:$true] %s5643_s22 }
0x119b   :  { %v1709_v10 = vmul.f32 %v5554_v3, %v1706_v2  ;;  %vm1715_vm4 = vweird.f32 %v5554_v3  ;;  %p5648_p1 = scmp.lt.s32.totalorder %s5644_s22, %s5950_s20 }
0x119c   :  { %vm1716_vm6 = vmor %vm1714_vm5, %vm1715_vm4 }
0x119d   :  { %4881 = vmatmul.msk.bf16.vlgmr.msra.gmra.mxu2 %vm204_vm1, %v2179_v1  ;;  %v1710_v13 = vmul.f32 %v5554_v3, %v1709_v10 }
0x119e   :  { %2421 = vmatpush.bf16.msrb.mxu2 %v5318_v56 }
0x119f   :  { %v1711_v55 = vmul.f32 0.5, %v1710_v13 }
0x11a1   :  { %v1712_v22 = vsub.f32 1.5, %v1711_v55 }
0x11a2   :  { %2422 = vmatpush.bf16.msrb.mxu2 %v5317_v7 }
0x11a3   :  { %v1713_v24 = vmul.f32 %v5554_v3, %v1712_v22 }
0x11a5   :  { %v1717_v27 = vsel %vm1716_vm6, %v5554_v3, %v1713_v24 }
0x11a6   :  { %v1728_v31 = vmul.f32 %v1717_v27, %v6236_v52  ;;  %v5314_v52 = vld [vmem:[%s6663_s6 + $0x8] sm:$0xff]  ;;  %v5316_v27 = vld [vmem:[%s6663_s6 + $0x18] sm:$0xff] }
0x11a7   :  { %2389 = vmatpush.bf16.msrb.mxu1 %v5314_v52 }
0x11a8   :  { %v1733_v1 = vmul.f32 %v5450_v30, %v1728_v31  ;;  %v5457_v31 = vld [vmem:[%s6668_s2] ss:$0 sm:$0xff] }
0x11ab   :  { %2390 = vmatpush.bf16.msrb.mxu1 %v5313_v44 }
0x11fc   :  { %v2260_v42 = vpop.f32.mrf.mxu0 }
0x1204   :  { %v2262_v50 = vpop.f32.mrf.mxu0 }
0x1212   :  { %v2195_v37 = vpop.f32.mrf.mxu1 }
0x121a   :  { %v2197_v38 = vpop.f32.mrf.mxu1 }
0x121b   :  { %v1738_v38 = vadd.f32 %v5451_v34, %v1733_v1 }
0x1220   :  { %v2214_v39 = vpop.f32.mrf.mxu2 }
0x1221   :  { %v2218_v40 = vpack.c.bf16 %v2214_v39, %v2195_v37 }
0x1223   :  { %4886 = vmatmul.msk.bf16.vlgmr.msra.gmra.mxu3 %vm361_vm3, %v2218_v40 }
0x1228   :  { %v2216_v41 = vpop.f32.mrf.mxu2 }
0x12a6   :  { %v2237_v57 = vpop.f32.mrf.mxu3 }
0x12a7   :  { %v2261_v45 = vadd.f32 %v2260_v42, %v2237_v57 }
0x12a9   :  { %v2268_v46 = vadd.f32 %v5452_v43, %v2261_v45 }
0x12ab   :  { %v2270_v47 = vadd.f32 %v2268_v46, %v5964_v14  ;;  %v1701_v14 = vsel %vm277_vm2, %v1697_v58, 0.0 }
0x12ad   :  { %v2274_v49 = vsel %vm277_vm2, %v2270_v47, 0.0 }
0x12ae   :  { %2275 = vadd.xlane.f32.xlu2 %v2274_v49  ;;  %v2239_v16 = vpop.f32.mrf.mxu3 }
0x12af   :  { %v2263_v53 = vadd.f32 %v2262_v50, %v2239_v16 }
0x12b1   :  { %v2269_v51 = vadd.f32 %v5452_v43, %v2263_v53 }
0x12b3   :  { %v2271_v60 = vadd.f32 %v2269_v51, %v5966_v15 }
0x12b5   :  { %v2277_v61 = vsel %vm277_vm2, %v2271_v60, 0.0 }
0x12b6   :  { %2278 = vadd.xlane.f32.xlu0 %v2277_v61  ;;  %1702 = vadd.xlane.f32.xlu2 %v1701_v14 }
0x1321   :  { %v2276_v0 = vpop.xlane.xlu2 %2275 }
0x1322   :  { %v2280_v4 = vmul.f32 %v2276_v0, %v6032_v6 }
0x1324   :  { %v6270_v15 = vsub.f32 %v2270_v47, %v2280_v4 }
0x1326   :  { %v2284_v11 = vmul.f32 %v6270_v15, %v6270_v15 }
0x1328   :  { %v2286_v12 = vsel %vm277_vm2, %v2284_v11, 0.0  ;;  %v5455_v11 = vld [vmem:[%s6666_s28] ss:$0 sm:$0xff] }
0x1329   :  { %2287 = vadd.xlane.f32.xlu0 %v2286_v12  ;;  %v2279_v59 = vpop.xlane.xlu0 %2278  ;;  %v1703_v17 = vpop.xlane.xlu2 %1702 }
0x132a   :  { %v2281_v54 = vmul.f32 %v2279_v59, %v6032_v6  ;;  %v1705_v18 = vmul.f32 %v1703_v17, %v6032_v6 }
0x132c   :  { %v6279_v9 = vsub.f32 %v2271_v60, %v2281_v54  ;;  %v1707_v19 = vadd.f32 1e-05, %v1705_v18 }
0x132e   :  { %5555 = vrsqrt.f32 %v1707_v19  ;;  %v2285_v20 = vmul.f32 %v6279_v9, %v6279_v9  ;;  %vm1724_vm8 = vweird.f32 %v1707_v19 }
0x1330   :  { %v2289_v21 = vsel %vm277_vm2, %v2285_v20, 0.0 }
0x1331   :  { %2290 = vadd.xlane.f32.xlu1 %v2289_v21 }
0x1334   :  { %v5556_v23 = vpop.eup %5555 }
0x1335   :  { %v1719_v25 = vmul.f32 %v5556_v23, %v1707_v19  ;;  %vm1725_vm7 = vweird.f32 %v5556_v23 }
0x1336   :  { %vm1726_vm9 = vmor %vm1724_vm8, %vm1725_vm7 }
0x1337   :  { %v1720_v26 = vmul.f32 %v5556_v23, %v1719_v25 }
0x1339   :  { %v1721_v28 = vmul.f32 0.5, %v1720_v26 }
0x133b   :  { %v1722_v29 = vsub.f32 1.5, %v1721_v28  ;;  %v5315_v28 = vld [vmem:[%s6663_s6 + $0x10] sm:$0xff] }
0x133d   :  { %v1723_v32 = vmul.f32 %v5556_v23, %v1722_v29  ;;  %v5320_v29 = vld [vmem:[%s6661_s24 + $0x18] sm:$0xff] }
0x133f   :  { %v1727_v33 = vsel %vm1726_vm9, %v5556_v23, %v1723_v32 }
0x1340   :  { %v1729_v35 = vmul.f32 %v1727_v33, %v6258_v48 }
0x1342   :  { %v1734_v37 = vmul.f32 %v5450_v30, %v1729_v35  ;;  %v5319_v30 = vld [vmem:[%s6661_s24 + $0x10] sm:$0xff] }
0x1344   :  { %v1739_v39 = vadd.f32 %v5451_v34, %v1734_v37 }
0x1346   :  { %v6288_v40 = vpack.c.bf16 %v1739_v39, %v1738_v38 }
0x1348   :  { %4909 = vmatmul.msk.bf16.vlgmr.msrb.gmra.mxu2 %vm277_vm2, %v6288_v40  ;;  %4918 = vmatmul.msk.bf16.vlgmr.msrb.gmra.mxu3 %vm277_vm2, %v6288_v40 }
0x139c   :  { %v2288_v41 = vpop.xlane.xlu0 %2287 }
0x139d   :  { %v2292_v42 = vmul.f32 %v2288_v41, %v6032_v6 }
0x139f   :  { %v2294_v43 = vadd.f32 1e-05, %v2292_v42 }
0x13a1   :  { %5557 = vrsqrt.f32 %v2294_v43  ;;  %vm2302_vm11 = vweird.f32 %v2294_v43 }
0x13a4   :  { %v2291_v57 = vpop.xlane.xlu1 %2290 }
0x13a5   :  { %v2293_v45 = vmul.f32 %v2291_v57, %v6032_v6  ;;  %v5458_v57 = vld [vmem:[%s6668_s2 + $0x1] ss:$0 sm:$0xff] }
0x13a7   :  { %v5558_v36 = vpop.eup %5557  ;;  %v2295_v46 = vadd.f32 1e-05, %v2293_v45 }
0x13a8   :  { %v2297_v47 = vmul.f32 %v5558_v36, %v2294_v43  ;;  %vm2303_vm10 = vweird.f32 %v5558_v36 }
0x13a9   :  { %5559 = vrsqrt.f32 %v2295_v46  ;;  %vm2304_vm12 = vmor %vm2302_vm11, %vm2303_vm10  ;;  %vm2312_vm14 = vweird.f32 %v2295_v46 }
0x13aa   :  { %v2298_v48 = vmul.f32 %v5558_v36, %v2297_v47  ;;  %v5459_v47 = vld [vmem:[%s6666_s28 + $0x1] ss:$0 sm:$0xff] }
0x13ac   :  { %v2299_v49 = vmul.f32 0.5, %v2298_v48 }
0x13ae   :  { %v2300_v50 = vsub.f32 1.5, %v2299_v49 }
0x13af   :  { %v5560_v16 = vpop.eup %5559 }
0x13b0   :  { %v2301_v53 = vmul.f32 %v5558_v36, %v2300_v50  ;;  %v2307_v51 = vmul.f32 %v5560_v16, %v2295_v46  ;;  %vm2313_vm13 = vweird.f32 %v5560_v16 }
0x13b1   :  { %vm2314_vm4 = vmor %vm2312_vm14, %vm2313_vm13 }
0x13b2   :  { %v2308_v58 = vmul.f32 %v5560_v16, %v2307_v51  ;;  %v2305_v60 = vsel %vm2304_vm12, %v5558_v36, %v2301_v53 }
0x13b3   :  { %v2316_v62 = vmul.f32 %v2305_v60, %v6270_v15  ;;  %v5456_v15 = vld [vmem:[%s6667_s1] ss:$0 sm:$0xff] }
0x13b4   :  { %v2309_v61 = vmul.f32 0.5, %v2308_v58 }
0x13b5   :  { %v2321_v0 = vmul.f32 %v5453_v5, %v2316_v62 }
0x13b6   :  { %v2310_v14 = vsub.f32 1.5, %v2309_v61 }
0x13b7   :  { %v6302_v7 = vadd.f32 %v5454_v63, %v2321_v0 }
0x13b8   :  { %v2311_v2 = vmul.f32 %v5560_v16, %v2310_v14 }
0x13ba   :  { %v2315_v56 = vsel %vm2314_vm4, %v5560_v16, %v2311_v2 }
0x13bb   :  { %v2317_v3 = vmul.f32 %v2315_v56, %v6279_v9 }
0x13bd   :  { %v2322_v4 = vmul.f32 %v5453_v5, %v2317_v3 }
0x13bf   :  { %v6304_v8 = vadd.f32 %v5454_v63, %v2322_v4 }
0x13c1   :  { %v2363_v10 = vpack.c.bf16 %v6304_v8, %v6302_v7 }
0x13c3   :  { %4900 = vmatmul.msk.bf16.vlgmr.msrb.gmra.mxu1 %vm277_vm2, %v2363_v10 }
0x13cb   :  { %v2424_v12 = vpop.f32.mrf.mxu2  ;;  %v2453_v13 = vpop.f32.mrf.mxu3 }
0x13cc   :  { %v2425_v59 = vadd.f32 %v5455_v11, %v2424_v12  ;;  %v2454_v17 = vadd.f32 %v5456_v15, %v2453_v13 }
0x13ce   :  { %v2462_v54 = vpack.c.bf16 %v2425_v59, %v2425_v59  ;;  %v2464_v18 = vpack.c.bf16 %v2454_v17, %v2454_v17 }
0x13d0   :  { %v2470_v9 = vsel %vm361_vm3, %v2462_v54, 0  ;;  %v2558_v19 = vsel %vm208_vm0, %v2464_v18, 0  ;;  %v5324_v54 = vld [vmem:[%s6662_s30 + $0x18] sm:$0xff] }
0x13d1   :  { %2479 = vmatpush.bf16.xpose.msra.mxu0 %v2470_v9  ;;  %2567 = vmatpush.bf16.msra.mxu2 %v2558_v19  ;;  %v5323_v9 = vld [vmem:[%s6662_s30 + $0x10] sm:$0xff] }
0x13d3   :  { %v2426_v55 = vpop.f32.mrf.mxu2  ;;  %v2455_v20 = vpop.f32.mrf.mxu3 }
0x13d4   :  { %v2427_v21 = vadd.f32 %v5455_v11, %v2426_v55  ;;  %v2456_v22 = vadd.f32 %v5456_v15, %v2455_v20 }
0x13d5   :  { %2672 = vmatpush.bf16.msrb.mxu2 %v5324_v54 }
0x13d6   :  { %v2463_v23 = vpack.c.bf16 %v2427_v21, %v2427_v21  ;;  %v2465_v24 = vpack.c.bf16 %v2456_v22, %v2456_v22 }
0x13d8   :  { %v2489_v25 = vsel %vm361_vm3, %v2463_v23, 0  ;;  %v2577_v26 = vsel %vm208_vm0, %v2465_v24, 0 }
0x13d9   :  { %2498 = vmatpush.bf16.xpose.msra.mxu1 %v2489_v25  ;;  %2586 = vmatpush.bf16.msra.mxu3 %v2577_v26 }
0x13da   :  { %2614 = vmatpush.bf16.msrb.mxu0 %v5316_v27  ;;  %2673 = vmatpush.bf16.msrb.mxu2 %v5323_v9 }
0x13de   :  { %2615 = vmatpush.bf16.msrb.mxu0 %v5315_v28 }
0x13e1   :  { %2643 = vmatpush.bf16.msrb.mxu1 %v5320_v29 }
0x13e5   :  { %2644 = vmatpush.bf16.msrb.mxu1 %v5319_v30 }
0x1440   :  { %v2392_v32 = vpop.f32.mrf.mxu1 }
0x1441   :  { %v2393_v33 = vadd.f32 %v5457_v31, %v2392_v32 }
0x1443   :  { %v2458_v34 = vmul.f32 0.25, %v2393_v33 }
0x1445   :  { %v2460_v1 = vpack.c.bf16 %v2458_v34, %v2458_v34 }
0x1447   :  { %4919 = vmatmul.msk.bf16.vlgmr.msra.gmra.mxu0 %vm361_vm3, %v2460_v1 }
0x1448   :  { %v2394_v35 = vpop.f32.mrf.mxu1 }
0x1449   :  { %v2395_v37 = vadd.f32 %v5457_v31, %v2394_v35 }
0x144b   :  { %v2459_v38 = vmul.f32 0.25, %v2395_v37 }
0x144d   :  { %v2461_v39 = vpack.c.bf16 %v2459_v38, %v2459_v38 }
0x144f   :  { %4920 = vmatmul.msk.bf16.vlgmr.msra.gmra.mxu1 %vm361_vm3, %v2461_v39 }
0x1457   :  { %4931 = vmatmul.msk.bf16.vlgmr.msrb.gmra.mxu0 %vm277_vm2, %v2363_v10 }
0x145f   :  { %4940 = vmatmul.msk.bf16.vlgmr.msrb.gmra.mxu1 %vm277_vm2, %v6288_v40 }
0x14c4   :  { %v2481_v52 = vpop.f32.mrf.mxu0 }
0x14c5   :  { %v2504_v41 = vsel %vm204_vm1, %v2481_v52, -inf }
0x14c6   :  { %2505 = vmax.xlane.f32.xlu1 %v2504_v41 }
0x14cc   :  { %v2483_v42 = vpop.f32.mrf.mxu0  ;;  %v2500_v43 = vpop.f32.mrf.mxu1 }
0x14cd   :  { %v2507_v44 = vsel %vm204_vm1, %v2500_v43, -inf }
0x14ce   :  { %2508 = vmax.xlane.f32.xlu2 %v2507_v44 }
0x14d4   :  { %v2502_v45 = vpop.f32.mrf.mxu1  ;;  %v2617_v36 = vpop.f32.mrf.mxu0 }
0x14d5   :  { %v6328_v46 = vadd.f32 %v5458_v57, %v2617_v36 }
0x14dc   :  { %v2646_v48 = vpop.f32.mrf.mxu1  ;;  %v2619_v53 = vpop.f32.mrf.mxu0 }
0x14dd   :  { %v2647_v49 = vadd.f32 %v5459_v47, %v2646_v48  ;;  %v2620_v60 = vadd.f32 %v5458_v57, %v2619_v53 }
0x14df   :  { %v2684_v50 = vpack.c.bf16 %v2647_v49, %v2647_v49  ;;  %v2681_v5 = vmul.f32 0.25, %v2620_v60  ;;  %v5325_v49 = vld [vmem:[%s6669_s7] sm:$0xff] }
0x14e1   :  { %v2692_v16 = vsel %vm361_vm3, %v2684_v50, 0  ;;  %v2683_v62 = vpack.c.bf16 %v2681_v5, %v2681_v5 }
0x14e2   :  { %2701 = vmatpush.bf16.xpose.msrb.mxu3 %v2692_v16 }
0x14e4   :  { %v2648_v51 = vpop.f32.mrf.mxu1 }
0x14e5   :  { %v2649_v58 = vadd.f32 %v5459_v47, %v2648_v51 }
0x14e7   :  { %v2685_v61 = vpack.c.bf16 %v2649_v58, %v2649_v58 }
0x14e9   :  { %v2711_v14 = vsel %vm361_vm3, %v2685_v61, 0 }
0x14ea   :  { %2720 = vmatpush.bf16.xpose.msra.mxu0 %v2711_v14 }
0x14f1   :  { %4951 = vmatmul.msk.bf16.vlgmr.msra.gmra.mxu0 %vm361_vm3, %v2683_v62 }
0x14f2   :  { %2854 = vmatpush.bf16.msrb.mxu0 %v5325_v49 }
0x1539   :  { %v2506_v2 = vpop.xlane.xlu1 %2505 }
0x153a   :  { %v2510_v56 = vsub.f32 %v2481_v52, %v2506_v2 }
0x153c   :  { %v2512_v63 = vmul.f32 1.442695, %v2510_v56 }
0x153e   :  { %5561 = vpow2.f32 %v2512_v63 }
0x1541   :  { %v2509_v0 = vpop.xlane.xlu2 %2508 }
0x1542   :  { %v2511_v3 = vsub.f32 %v2500_v43, %v2509_v0  ;;  %v2680_v43 = vmul.f32 0.25, %v6328_v46  ;;  %v5460_v46 = vld [vmem:[%s6667_s1 + $0x1] ss:$0 sm:$0xff] }
0x1544   :  { %v5562_v4 = vpop.eup %5561  ;;  %v2514_v10 = vmul.f32 1.442695, %v2511_v3  ;;  %v2682_v45 = vpack.c.bf16 %v2680_v43, %v2680_v43 }
0x1545   :  { %v2516_v11 = vsel %vm204_vm1, %v5562_v4, 0.0 }
0x1546   :  { %5563 = vpow2.f32 %v2514_v10  ;;  %2517 = vadd.xlane.f32.xlu2 %v2516_v11 }
0x154c   :  { %v5564_v15 = vpop.eup %5563 }
0x154d   :  { %v2519_v12 = vsel %vm204_vm1, %v5564_v15, 0.0 }
0x154e   :  { %2520 = vadd.xlane.f32.xlu0 %v2519_v12 }
0x156e   :  { %v2722_v13 = vpop.f32.mrf.mxu0 }
0x156f   :  { %v2729_v59 = vsel %vm204_vm1, %v2722_v13, -inf }
0x1570   :  { %2730 = vmax.xlane.f32.xlu0 %v2729_v59 }
0x1576   :  { %v2724_v17 = vpop.f32.mrf.mxu0 }
0x15b9   :  { %v2518_v18 = vpop.xlane.xlu2 %2517 }
0x15ba   :  { %5565 = vrcp.f32 %v2518_v18  ;;  %v2533_v22 = vand.u32 2147483648, %v2518_v18  ;;  %v2531_v24 = vand.u32 2147483647, %v2518_v18  ;;  %vm2527_vm6 = vweird.f32 %v2518_v18 }
0x15bc   :  { %v2534_v27 = vor.u32 1.1754944e-38, %v2533_v22  ;;  %vm2532_vm8 = vcmp.eq.f32.partialorder %v2531_v24, 8.507059e+37 }
0x15c0   :  { %v5566_v19 = vpop.eup %5565 }
0x15c1   :  { %v2523_v55 = vmul.f32 %v5566_v19, %v2518_v18  ;;  %v2521_v20 = vpop.xlane.xlu0 %2520  ;;  %vm2528_vm5 = vweird.f32 %v5566_v19 }
0x15c2   :  { %5567 = vrcp.f32 %v2521_v20  ;;  %vm2529_vm7 = vmor %vm2527_vm6, %vm2528_vm5  ;;  %v2548_v33 = vand.u32 2147483648, %v2521_v20  ;;  %v2546_v35 = vand.u32 2147483647, %v2521_v20  ;;  %vm2542_vm10 = vweird.f32 %v2521_v20 }
0x15c3   :  { %v2524_v21 = vsub.f32 1.0, %v2523_v55 }
0x15c4   :  { %v2549_v38 = vor.u32 1.1754944e-38, %v2548_v33  ;;  %vm2547_vm12 = vcmp.eq.f32.partialorder %v2546_v35, 8.507059e+37 }
0x15c5   :  { %v2525_v23 = vmul.f32 %v5566_v19, %v2524_v21 }
0x15c7   :  { %v2526_v25 = vadd.f32 %v5566_v19, %v2525_v23 }
0x15c8   :  { %v5568_v26 = vpop.eup %5567 }
0x15c9   :  { %v2530_v28 = vsel %vm2529_vm7, %v5566_v19, %v2526_v25  ;;  %v2538_v29 = vmul.f32 %v5568_v26, %v2521_v20  ;;  %vm2543_vm9 = vweird.f32 %v5568_v26 }
0x15ca   :  { %v2535_v30 = vsel %vm2532_vm8, %v2534_v27, %v2530_v28  ;;  %vm2544_vm11 = vmor %vm2542_vm10, %vm2543_vm9 }
0x15cb   :  { %v2536_v31 = vmul.f32 %v5562_v4, %v2535_v30  ;;  %v2539_v32 = vsub.f32 1.0, %v2538_v29 }
0x15cd   :  { %v2552_v34 = vpack.c.bf16 %v2536_v31, %v2536_v31  ;;  %v2540_v1 = vmul.f32 %v5568_v26, %v2539_v32 }
0x15cf   :  { %v2541_v37 = vadd.f32 %v5568_v26, %v2540_v1  ;;  %4921 = vmatmul.msk.bf16.vlgmr.msra.gmra.mxu2 %vm204_vm1, %v2552_v34 }
0x15d1   :  { %v2545_v39 = vsel %vm2544_vm11, %v5568_v26, %v2541_v37 }
0x15d2   :  { %v2550_v52 = vsel %vm2547_vm12, %v2549_v38, %v2545_v39 }
0x15d3   :  { %v2551_v41 = vmul.f32 %v5564_v15, %v2550_v52 }
0x15d5   :  { %v2553_v42 = vpack.c.bf16 %v2551_v41, %v2551_v41  ;;  %v5326_v41 = vld [vmem:[%s6669_s7 + $0x8] sm:$0xff] }
0x15d7   :  { %4922 = vmatmul.msk.bf16.vlgmr.msra.gmra.mxu3 %vm204_vm1, %v2553_v42 }
0x15d8   :  { %2831 = vmatpush.bf16.msra.mxu3 %v5326_v41 }
0x15df   :  { %4949 = vmatmul.msk.bf16.vlgmr.msrb.gmra.mxu2 %vm277_vm2, %v6288_v40 }
0x15e3   :  { %v2731_v44 = vpop.xlane.xlu0 %2730 }
0x15e4   :  { %v2733_v57 = vsub.f32 %v2722_v13, %v2731_v44 }
0x15e6   :  { %v2736_v36 = vmul.f32 1.442695, %v2733_v57 }
0x15e7   :  { %4950 = vmatmul.msk.bf16.vlgmr.msrb.gmra.mxu3 %vm361_vm3, %v2682_v45  ;;  %v5461_v45 = vld [vmem:[%s6670_s10] ss:$0 sm:$0xff] }
0x15e8   :  { %5569 = vpow2.f32 %v2736_v36 }
0x15ee   :  { %v5570_v47 = vpop.eup %5569 }
0x15ef   :  { %v2741_v48 = vsel %vm204_vm1, %v5570_v47, 0.0 }
0x15f0   :  { %2742 = vadd.xlane.f32.xlu2 %v2741_v48 }
0x1652   :  { %v2569_v50 = vpop.f32.mrf.mxu2 }
0x165a   :  { %v2571_v16 = vpop.f32.mrf.mxu2  ;;  %v2588_v53 = vpop.f32.mrf.mxu3 }
0x165b   :  { %v2592_v51 = vpack.c.bf16 %v2588_v53, %v2569_v50 }
0x165d   :  { %4963 = vmatmul.msk.bf16.vlgmr.msrb.gmra.mxu0 %vm361_vm3, %v2592_v51 }
0x1662   :  { %v2590_v58 = vpop.f32.mrf.mxu3  ;;  %v2675_v60 = vpop.f32.mrf.mxu2 }
0x1663   :  { %v2676_v61 = vadd.f32 %v5460_v46, %v2675_v60  ;;  %v2743_v14 = vpop.xlane.xlu2 %2742 }
0x1664   :  { %5571 = vrcp.f32 %v2743_v14  ;;  %v2770_v15 = vand.u32 2147483648, %v2743_v14  ;;  %v2768_v13 = vand.u32 2147483647, %v2743_v14  ;;  %vm2764_vm14 = vweird.f32 %v2743_v14 }
0x1665   :  { %v2686_v5 = vpack.c.bf16 %v2676_v61, %v2676_v61 }
0x1666   :  { %v2771_v54 = vor.u32 1.1754944e-38, %v2770_v15  ;;  %vm2769_vm5 = vcmp.eq.f32.partialorder %v2768_v13, 8.507059e+37  ;;  %v5327_v15 = vld [vmem:[%s6671_s11] sm:$0xff] }
0x1667   :  { %v2780_v62 = vsel %vm208_vm0, %v2686_v5, 0 }
0x1668   :  { %2789 = vmatpush.bf16.msra.mxu1 %v2780_v62 }
0x166a   :  { %v5572_v2 = vpop.eup %5571  ;;  %v2677_v56 = vpop.f32.mrf.mxu2 }
0x166b   :  { %v2703_v63 = vpop.f32.mrf.mxu3  ;;  %v2760_v0 = vmul.f32 %v5572_v2, %v2743_v14  ;;  %v2678_v3 = vadd.f32 %v5460_v46, %v2677_v56  ;;  %vm2765_vm13 = vweird.f32 %v5572_v2 }
0x166c   :  { %v2726_v4 = vsel %vm204_vm1, %v2703_v63, -inf  ;;  %vm2766_vm4 = vmor %vm2764_vm14, %vm2765_vm13 }
0x166d   :  { %2727 = vmax.xlane.f32.xlu1 %v2726_v4  ;;  %v2761_v10 = vsub.f32 1.0, %v2760_v0  ;;  %v2687_v11 = vpack.c.bf16 %v2678_v3, %v2678_v3 }
0x166f   :  { %v2762_v12 = vmul.f32 %v5572_v2, %v2761_v10  ;;  %v2799_v59 = vsel %vm208_vm0, %v2687_v11, 0 }
0x1670   :  { %2808 = vmatpush.bf16.msra.mxu2 %v2799_v59 }
0x1671   :  { %v2763_v17 = vadd.f32 %v5572_v2, %v2762_v12 }
0x1673   :  { %v2705_v18 = vpop.f32.mrf.mxu3  ;;  %v2767_v9 = vsel %vm2766_vm4, %v5572_v2, %v2763_v17 }
0x1674   :  { %v2772_v19 = vsel %vm2769_vm5, %v2771_v54, %v2767_v9 }
0x1675   :  { %v2773_v55 = vmul.f32 %v5570_v47, %v2772_v19 }
0x1677   :  { %v2775_v20 = vpack.c.bf16 %v2773_v55, %v2773_v55 }
0x1679   :  { %4953 = vmatmul.msk.bf16.vlgmr.msra.gmra.mxu2 %vm204_vm1, %v2775_v20 }
0x16da   :  { %v2856_v57 = vpop.f32.mrf.mxu0 }
0x16e0   :  { %v2728_v21 = vpop.xlane.xlu1 %2727 }
0x16e1   :  { %v2732_v22 = vsub.f32 %v2703_v63, %v2728_v21 }
0x16e2   :  { %v2858_v16 = vpop.f32.mrf.mxu0 }
0x16e3   :  { %v2734_v23 = vmul.f32 1.442695, %v2732_v22 }
0x16e5   :  { %5573 = vpow2.f32 %v2734_v23 }
0x16eb   :  { %v5574_v24 = vpop.eup %5573 }
0x16ec   :  { %v2738_v25 = vsel %vm204_vm1, %v5574_v24, 0.0 }
0x16ed   :  { %2739 = vadd.xlane.f32.xlu0 %v2738_v25 }
0x16fc   :  { %v2810_v26 = vpop.f32.mrf.mxu2 }
0x1704   :  { %v2812_v27 = vpop.f32.mrf.mxu2 }
0x1760   :  { %v2740_v28 = vpop.xlane.xlu0 %2739 }
0x1761   :  { %5575 = vrcp.f32 %v2740_v28  ;;  %v2755_v32 = vand.u32 2147483648, %v2740_v28  ;;  %v2753_v34 = vand.u32 2147483647, %v2740_v28  ;;  %vm2749_vm7 = vweird.f32 %v2740_v28 }
0x1763   :  { %v2756_v35 = vor.u32 1.1754944e-38, %v2755_v32  ;;  %vm2754_vm9 = vcmp.eq.f32.partialorder %v2753_v34, 8.507059e+37 }
0x1767   :  { %v5576_v29 = vpop.eup %5575 }
0x1768   :  { %v2745_v30 = vmul.f32 %v5576_v29, %v2740_v28  ;;  %vm2750_vm6 = vweird.f32 %v5576_v29 }
0x1769   :  { %vm2751_vm8 = vmor %vm2749_vm7, %vm2750_vm6 }
0x176a   :  { %v2746_v31 = vsub.f32 1.0, %v2745_v30  ;;  %v5463_v30 = vld [vmem:[%s6673_s16] ss:$0 sm:$0xff] }
0x176c   :  { %v2747_v33 = vmul.f32 %v5576_v29, %v2746_v31 }
0x176e   :  { %v2748_v1 = vadd.f32 %v5576_v29, %v2747_v33 }
0x1770   :  { %v2752_v37 = vsel %vm2751_vm8, %v5576_v29, %v2748_v1 }
0x1771   :  { %v2757_v38 = vsel %vm2754_vm9, %v2756_v35, %v2752_v37  ;;  %v5332_v37 = vld [vmem:[%s6674_s18 + $0x18] sm:$0xff] }
0x1772   :  { %v2758_v39 = vmul.f32 %v5574_v24, %v2757_v38  ;;  %3008 = vmatpush.bf16.msrb.mxu2 %v5332_v37  ;;  %v5331_v38 = vld [vmem:[%s6674_s18 + $0x10] sm:$0xff] }
0x1774   :  { %v2774_v52 = vpack.c.bf16 %v2758_v39, %v2758_v39  ;;  %v5330_v39 = vld [vmem:[%s6674_s18 + $0x8] sm:$0xff] }
0x1776   :  { %4952 = vmatmul.msk.bf16.vlgmr.msra.gmra.mxu1 %vm204_vm1, %v2774_v52  ;;  %3009 = vmatpush.bf16.msrb.mxu2 %v5331_v38  ;;  %v5329_v52 = vld [vmem:[%s6674_s18] sm:$0xff] }
0x177a   :  { %3010 = vmatpush.bf16.msrb.mxu2 %v5330_v39 }
0x177e   :  { %3011 = vmatpush.bf16.msrb.mxu2 %v5329_v52 }
0x17f3   :  { %v2791_v42 = vpop.f32.mrf.mxu1 }
0x17f4   :  { %v2814_v43 = vpack.c.bf16 %v2810_v26, %v2791_v42  ;;  %v5462_v26 = vld [vmem:[%s6672_s15] ss:$0 sm:$0xff] }
0x17f5   :  { %v5464_v42 = vld [vmem:[%s6675_s0] ss:$0 sm:$0xff] }
0x17f6   :  { %4958 = vmatmul.msk.bf16.vlgmr.msra.gmra.mxu3 %vm361_vm3, %v2814_v43 }
0x17fb   :  { %v2793_v44 = vpop.f32.mrf.mxu1 }
0x1879   :  { %v2833_v36 = vpop.f32.mrf.mxu3 }
0x187a   :  { %v2857_v47 = vadd.f32 %v2856_v57, %v2833_v36 }
0x187c   :  { %v2864_v48 = vadd.f32 %v5461_v45, %v2857_v47 }
0x187e   :  { %v2866_v49 = vadd.f32 %v2864_v48, %v6302_v7  ;;  %v5465_v48 = vld [vmem:[%s6676_s5] ss:$0 sm:$0xff] }
0x1880   :  { %v2870_v50 = vsel %vm277_vm2, %v2866_v49, 0.0 }
0x1881   :  { %2871 = vadd.xlane.f32.xlu1 %v2870_v50  ;;  %v2835_v53 = vpop.f32.mrf.mxu3 }
0x1882   :  { %v2859_v51 = vadd.f32 %v2858_v16, %v2835_v53 }
0x1884   :  { %v2865_v46 = vadd.f32 %v5461_v45, %v2859_v51 }
0x1886   :  { %v2867_v58 = vadd.f32 %v2865_v46, %v6304_v8  ;;  %v5328_v8 = vld [vmem:[%s6671_s11 + $0x8] sm:$0xff] }
0x1887   :  { %2963 = vmatpush.bf16.msrb.mxu1 %v5328_v8  ;;  %v5334_v8 = vld [vmem:[%s6655_s25 + $0x28] sm:$0xff] }
0x1888   :  { %v2873_v60 = vsel %vm277_vm2, %v2867_v58, 0.0  ;;  %3144 = vmatpush.bf16.msrb.mxu3 %v5334_v8 }
0x1889   :  { %2874 = vadd.xlane.f32.xlu2 %v2873_v60 }
0x188b   :  { %2964 = vmatpush.bf16.msrb.mxu1 %v5327_v15 }
0x18f4   :  { %v2872_v61 = vpop.xlane.xlu1 %2871 }
0x18f5   :  { %v2876_v14 = vmul.f32 %v2872_v61, %v6032_v6 }
0x18f7   :  { %v2878_v5 = vsub.f32 %v2866_v49, %v2876_v14 }
0x18f9   :  { %v2880_v62 = vmul.f32 %v2878_v5, %v2878_v5 }
0x18fb   :  { %v2882_v7 = vsel %vm277_vm2, %v2880_v62, 0.0 }
0x18fc   :  { %2883 = vadd.xlane.f32.xlu0 %v2882_v7  ;;  %v2875_v2 = vpop.xlane.xlu2 %2874 }
0x18fd   :  { %v2877_v56 = vmul.f32 %v2875_v2, %v6032_v6 }
0x18ff   :  { %v2879_v63 = vsub.f32 %v2867_v58, %v2877_v56 }
0x1901   :  { %v2881_v0 = vmul.f32 %v2879_v63, %v2879_v63 }
0x1903   :  { %v2885_v3 = vsel %vm277_vm2, %v2881_v0, 0.0 }
0x1904   :  { %2886 = vadd.xlane.f32.xlu1 %v2885_v3 }
0x196f   :  { %v2884_v4 = vpop.xlane.xlu0 %2883 }
0x1970   :  { %v2888_v10 = vmul.f32 %v2884_v4, %v6032_v6  ;;  %v5338_v4 = vld [vmem:[%s6653_s17 + $0x28] sm:$0xff] }
0x1971   :  { %3173 = vmatpush.bf16.msra.mxu0 %v5338_v4  ;;  %v5339_v4 = vld [vmem:[%s6653_s17 + $0x30] sm:$0xff] }
0x1972   :  { %v2890_v11 = vadd.f32 1e-05, %v2888_v10  ;;  %v5342_v10 = vld [vmem:[%s6657_s3 + $0x28] sm:$0xff] }
0x1973   :  { %3202 = vmatpush.bf16.msra.mxu1 %v5342_v10 }
0x1974   :  { %5577 = vrsqrt.f32 %v2890_v11  ;;  %vm2898_vm11 = vweird.f32 %v2890_v11 }
0x1977   :  { %v2887_v12 = vpop.xlane.xlu1 %2886 }
0x1978   :  { %v2889_v13 = vmul.f32 %v2887_v12, %v6032_v6 }
0x197a   :  { %v5578_v59 = vpop.eup %5577  ;;  %v2891_v17 = vadd.f32 1e-05, %v2889_v13  ;;  %v5333_v13 = vld [vmem:[%s6655_s25 + $0x20] sm:$0xff] }
0x197b   :  { %v2893_v54 = vmul.f32 %v5578_v59, %v2890_v11  ;;  %vm2899_vm10 = vweird.f32 %v5578_v59  ;;  %3145 = vmatpush.bf16.msrb.mxu3 %v5333_v13 }
0x197c   :  { %5579 = vrsqrt.f32 %v2891_v17  ;;  %vm2900_vm12 = vmor %vm2898_vm11, %vm2899_vm10  ;;  %vm2908_vm14 = vweird.f32 %v2891_v17 }
0x197d   :  { %v2894_v18 = vmul.f32 %v5578_v59, %v2893_v54 }
0x197f   :  { %v2895_v9 = vmul.f32 0.5, %v2894_v18 }
0x1981   :  { %v2896_v19 = vsub.f32 1.5, %v2895_v9 }
0x1982   :  { %v5580_v55 = vpop.eup %5579 }
0x1983   :  { %v2897_v20 = vmul.f32 %v5578_v59, %v2896_v19  ;;  %v2903_v21 = vmul.f32 %v5580_v55, %v2891_v17  ;;  %vm2909_vm13 = vweird.f32 %v5580_v55  ;;  %v5341_v17 = vld [vmem:[%s6657_s3 + $0x20] sm:$0xff] }
0x1984   :  { %vm2910_vm4 = vmor %vm2908_vm14, %vm2909_vm13  ;;  %3203 = vmatpush.bf16.msra.mxu1 %v5341_v17 }
0x1985   :  { %v2904_v22 = vmul.f32 %v5580_v55, %v2903_v21  ;;  %v2901_v23 = vsel %vm2900_vm12, %v5578_v59, %v2897_v20  ;;  %v5337_v59 = vld [vmem:[%s6653_s17 + $0x20] sm:$0xff] }
0x1986   :  { %v2912_v27 = vmul.f32 %v2901_v23, %v2878_v5  ;;  %3174 = vmatpush.bf16.msra.mxu0 %v5337_v59 }
0x1987   :  { %v2905_v24 = vmul.f32 0.5, %v2904_v22 }
0x1988   :  { %v2917_v31 = vmul.f32 %v5462_v26, %v2912_v27 }
0x1989   :  { %v2906_v25 = vsub.f32 1.5, %v2905_v24 }
0x198a   :  { %v2922_v34 = vadd.f32 %v5463_v30, %v2917_v31 }
0x198b   :  { %v2907_v28 = vmul.f32 %v5580_v55, %v2906_v25 }
0x198d   :  { %v2911_v29 = vsel %vm2910_vm4, %v5580_v55, %v2907_v28 }
0x198e   :  { %v2913_v32 = vmul.f32 %v2911_v29, %v2879_v63 }
0x1990   :  { %v2918_v33 = vmul.f32 %v5462_v26, %v2913_v32 }
0x1992   :  { %v2923_v1 = vadd.f32 %v5463_v30, %v2918_v33  ;;  %v5466_v30 = vld [vmem:[%s6677_s9] ss:$0 sm:$0xff] }
0x1994   :  { %v2938_v35 = vpack.c.bf16 %v2923_v1, %v2922_v34 }
0x1996   :  { %4972 = vmatmul.msk.bf16.vlgmr.msrb.gmra.mxu1 %vm277_vm2, %v2938_v35 }
0x1a13   :  { %v2966_v41 = vpop.f32.mrf.mxu1 }
0x1a14   :  { %v2967_v43 = vadd.f32 %v5464_v42, %v2966_v41  ;;  %v5468_v41 = vld [vmem:[%s6654_s21 + $0x2] ss:$0 sm:$0xff] }
0x1a16   :  { %v2971_v45 = vmax.f32 %v2967_v43, 0.0 }
0x1a1b   :  { %v2968_v44 = vpop.f32.mrf.mxu1 }
0x1a1c   :  { %v2969_v57 = vadd.f32 %v5464_v42, %v2968_v44  ;;  %v5469_v42 = vld [vmem:[%s6658_s8 + $0x2] ss:$0 sm:$0xff] }
0x1a1e   :  { %v2972_v36 = vmax.f32 %v2969_v57, 0.0 }
0x1a20   :  { %v2973_v47 = vpack.c.bf16 %v2972_v36, %v2971_v45 }
0x1a22   :  { %4989 = vmatmul.msk.bf16.vlgmr.msrb.gmra.mxu2 %vm904_vm15, %v2973_v47  ;;  %v5470_v47 = vld [vmem:[%s6656_s29 + $0x2] ss:$0 sm:$0xff] }
0x1aa5   :  { %v3013_v49 = vpop.f32.mrf.mxu2 }
0x1aa6   :  { %v3014_v50 = vadd.f32 %v5465_v48, %v3013_v49 }
0x1aa8   :  { %v3018_v16 = vadd.f32 %v3014_v50, %v2922_v34  ;;  %v5467_v34 = vld [vmem:[%s5935_s27] ss:$0 sm:$0xff] }
0x1aaa   :  { %v3022_v53 = vsel %vm277_vm2, %v3018_v16, 0.0 }
0x1aab   :  { %3023 = vadd.xlane.f32.xlu2 %v3022_v53 }
0x1aad   :  { %v3015_v51 = vpop.f32.mrf.mxu2 }
0x1aae   :  { %v3016_v46 = vadd.f32 %v5465_v48, %v3015_v51  ;;  %v5336_v48 = vld [vmem:[%s6655_s25 + $0x38] sm:$0xff] }
0x1ab0   :  { %v3019_v58 = vadd.f32 %v3016_v46, %v2923_v1  ;;  %v5335_v46 = vld [vmem:[%s6655_s25 + $0x30] sm:$0xff] }
0x1ab2   :  { %v3025_v60 = vsel %vm277_vm2, %v3019_v58, 0.0 }
0x1ab3   :  { %3026 = vadd.xlane.f32.xlu0 %v3025_v60 }
0x1b1e   :  { %v3024_v61 = vpop.xlane.xlu2 %3023 }
0x1b1f   :  { %v3028_v14 = vmul.f32 %v3024_v61, %v6032_v6 }
0x1b21   :  { %v3030_v5 = vsub.f32 %v3018_v16, %v3028_v14 }
0x1b23   :  { %v3032_v62 = vmul.f32 %v3030_v5, %v3030_v5 }
0x1b25   :  { %v3034_v7 = vsel %vm277_vm2, %v3032_v62, 0.0 }
0x1b26   :  { %v3027_v2 = vpop.xlane.xlu0 %3026  ;;  %3035 = vadd.xlane.f32.xlu1 %v3034_v7 }
0x1b27   :  { %v3029_v56 = vmul.f32 %v3027_v2, %v6032_v6  ;;  %v5340_v2 = vld [vmem:[%s6653_s17 + $0x38] sm:$0xff]  ;;  %s5645_s17 = scalar_lea.hbm %s5644_s22, 2 }
0x1b28   :  { %p5646_p0 = scmp.ne.s32.totalorder %s5644_s22, %s5645_s17 }
0x1b29   :  { %v3031_v63 = vsub.f32 %v3019_v58, %v3029_v56 }
0x1b2b   :  { %v3033_v0 = vmul.f32 %v3031_v63, %v3031_v63 }
0x1b2d   :  { %v3037_v3 = vsel %vm277_vm2, %v3033_v0, 0.0 }
0x1b2e   :  { %3038 = vadd.xlane.f32.xlu2 %v3037_v3 }
0x1b99   :  { %v3036_v11 = vpop.xlane.xlu1 %3035 }
0x1b9a   :  { %v3040_v15 = vmul.f32 %v3036_v11, %v6032_v6 }
0x1b9c   :  { %v3042_v12 = vadd.f32 1e-05, %v3040_v15 }
0x1b9e   :  { %5581 = vrsqrt.f32 %v3042_v12  ;;  %vm3050_vm6 = vweird.f32 %v3042_v12 }
0x1ba1   :  { %v3039_v54 = vpop.xlane.xlu2 %3038 }
0x1ba2   :  { %v3041_v18 = vmul.f32 %v3039_v54, %v6032_v6  ;;  %v5471_v54 = vld [vmem:[%s6656_s29 + $0x3] ss:$0 sm:$0xff] }
0x1ba4   :  { %v5582_v9 = vpop.eup %5581  ;;  %v3043_v19 = vadd.f32 1e-05, %v3041_v18 }
0x1ba5   :  { %v3045_v55 = vmul.f32 %v5582_v9, %v3042_v12  ;;  %vm3051_vm5 = vweird.f32 %v5582_v9 }
0x1ba6   :  { %5583 = vrsqrt.f32 %v3043_v19  ;;  %vm3052_vm7 = vmor %vm3050_vm6, %vm3051_vm5  ;;  %vm3060_vm9 = vweird.f32 %v3043_v19 }
0x1ba7   :  { %v3046_v20 = vmul.f32 %v5582_v9, %v3045_v55  ;;  %v5472_v55 = vld [vmem:[%s6654_s21 + $0x3] ss:$0 sm:$0xff]  ;;  %s5647_s21 = scalar_lea.hbm %s5950_s20, 2 }
0x1ba8   :  { %p5649_p2 = scmp.lt.s32.totalorder %s5647_s21, %s5645_s17 }
0x1ba9   :  { %v3047_v21 = vmul.f32 0.5, %v3046_v20 }
0x1baa   :  { %p5650_p3 = por %p5649_p2, %p5648_p1 }
0x1bab   :  { %v3048_v22 = vsub.f32 1.5, %v3047_v21 }
0x1bac   :  { %v5584_v23 = vpop.eup %5583  ;;  %p5651_p4 = pnand %p5650_p3, %p5646_p0 }
0x1bad   :  { %v3049_v24 = vmul.f32 %v5582_v9, %v3048_v22  ;;  %v3055_v25 = vmul.f32 %v5584_v23, %v3043_v19  ;;  %vm3061_vm8 = vweird.f32 %v5584_v23 }
0x1bae   :  { %vm3062_vm10 = vmor %vm3060_vm9, %vm3061_vm8 }
0x1baf   :  { %v3056_v26 = vmul.f32 %v5584_v23, %v3055_v25  ;;  %v3053_v27 = vsel %vm3052_vm7, %v5582_v9, %v3049_v24 }
0x1bb0   :  { %v3064_v31 = vmul.f32 %v3053_v27, %v3030_v5 }
0x1bb1   :  { %v3057_v28 = vmul.f32 0.5, %v3056_v26 }
0x1bb2   :  { %v3069_v1 = vmul.f32 %v5466_v30, %v3064_v31 }
0x1bb3   :  { %v3058_v29 = vsub.f32 1.5, %v3057_v28 }
0x1bb4   :  { %v6396_v38 = vadd.f32 %v5467_v34, %v3069_v1 }
0x1bb5   :  { %v3059_v32 = vmul.f32 %v5584_v23, %v3058_v29 }
0x1bb7   :  { %v3063_v33 = vsel %vm3062_vm10, %v5584_v23, %v3059_v32 }
0x1bb8   :  { %v3065_v35 = vmul.f32 %v3063_v33, %v3031_v63 }
0x1bba   :  { %v3070_v37 = vmul.f32 %v5466_v30, %v3065_v35 }
0x1bbc   :  { %v6398_v39 = vadd.f32 %v5467_v34, %v3070_v37 }
0x1bbe   :  { %v6402_v52 = vpack.c.bf16 %v6398_v39, %v6396_v38 }
0x1bc0   :  { %5033 = vmatmul.msk.bf16.vlgmr.msrb.gmra.mxu3 %vm277_vm2, %v6402_v52  ;;  %5042 = vmatmul.msk.bf16.vlgmr.msra.gmra.mxu0 %vm277_vm2, %v6402_v52 }
0x1bc1   :  { %5051 = vmatmul.msk.bf16.vlgmr.msra.gmra.mxu1 %vm277_vm2, %v6402_v52 }
0x1c3d   :  { %v3176_v43 = vpop.f32.mrf.mxu0 }
0x1c3e   :  { %v3177_v44 = vadd.f32 %v5468_v41, %v3176_v43  ;;  %v3205_v57 = vpop.f32.mrf.mxu1 }
0x1c3f   :  { %v3206_v45 = vadd.f32 %v5469_v42, %v3205_v57 }
0x1c40   :  { %v3214_v36 = vpack.c.bf16 %v3177_v44, %v3177_v44 }
0x1c41   :  { %v3216_v49 = vpack.c.bf16 %v3206_v45, %v3206_v45 }
0x1c42   :  { %v3222_v50 = vsel %vm361_vm3, %v3214_v36, 0 }
0x1c43   :  { %v3310_v16 = vsel %vm208_vm0, %v3216_v49, 0  ;;  %v3147_v53 = vpop.f32.mrf.mxu3  ;;  %3231 = vmatpush.bf16.xpose.msra.mxu2 %v3222_v50  ;;  %v5343_v49 = vld [vmem:[%s6657_s3 + $0x30] sm:$0xff] }
0x1c44   :  { %v3148_v51 = vadd.f32 %v5470_v47, %v3147_v53  ;;  %3319 = vmatpush.bf16.msrb.mxu0 %v3310_v16 }
0x1c45   :  { %v3178_v58 = vpop.f32.mrf.mxu0 }
0x1c46   :  { %v3210_v60 = vmul.f32 0.25, %v3148_v51  ;;  %v3179_v61 = vadd.f32 %v5468_v41, %v3178_v58  ;;  %v3207_v14 = vpop.f32.mrf.mxu1 }
0x1c47   :  { %v3208_v5 = vadd.f32 %v5469_v42, %v3207_v14 }
0x1c48   :  { %v3212_v62 = vpack.c.bf16 %v3210_v60, %v3210_v60  ;;  %v3215_v7 = vpack.c.bf16 %v3179_v61, %v3179_v61 }
0x1c49   :  { %v3217_v56 = vpack.c.bf16 %v3208_v5, %v3208_v5 }
0x1c4a   :  { %v3241_v63 = vsel %vm361_vm3, %v3215_v7, 0  ;;  %5052 = vmatmul.msk.bf16.vlgmr.msra.gmra.mxu2 %vm361_vm3, %v3212_v62 }
0x1c4b   :  { %3366 = vmatpush.bf16.msrb.mxu2 %v5336_v48  ;;  %v3329_v0 = vsel %vm208_vm0, %v3217_v56, 0  ;;  %v3149_v3 = vpop.f32.mrf.mxu3  ;;  %3250 = vmatpush.bf16.xpose.msra.mxu3 %v3241_v63 }
0x1c4c   :  { %v3150_v8 = vadd.f32 %v5470_v47, %v3149_v3  ;;  %3338 = vmatpush.bf16.msrb.mxu1 %v3329_v0  ;;  %v5344_v47 = vld [vmem:[%s6657_s3 + $0x38] sm:$0xff] }
0x1c4d   :  { %3424 = vmatpush.bf16.msra.mxu0 %v5344_v47 }
0x1c4e   :  { %v3211_v10 = vmul.f32 0.25, %v3150_v8 }
0x1c4f   :  { %3367 = vmatpush.bf16.msrb.mxu2 %v5335_v46 }
0x1c50   :  { %v3213_v11 = vpack.c.bf16 %v3211_v10, %v3211_v10 }
0x1c51   :  { %3425 = vmatpush.bf16.msra.mxu0 %v5343_v49 }
0x1c52   :  { %5053 = vmatmul.msk.bf16.vlgmr.msra.gmra.mxu3 %vm361_vm3, %v3213_v11 }
0x1c53   :  { %3395 = vmatpush.bf16.msrb.mxu3 %v5340_v2 }
0x1c57   :  { %3396 = vmatpush.bf16.msrb.mxu3 %v5339_v4 }
0x1c5a   :  { %5064 = vmatmul.msk.bf16.vlgmr.msrb.gmra.mxu2 %vm277_vm2, %v6402_v52 }
0x1c62   :  { %5073 = vmatmul.msk.bf16.vlgmr.msrb.gmra.mxu3 %vm277_vm2, %v6402_v52 }
0x1ccd   :  { %v3233_v15 = vpop.f32.mrf.mxu2 }
0x1cce   :  { %v3256_v12 = vsel %vm204_vm1, %v3233_v15, -inf }
0x1ccf   :  { %3257 = vmax.xlane.f32.xlu2 %v3256_v12 }
0x1cd5   :  { %v3235_v13 = vpop.f32.mrf.mxu2  ;;  %v3252_v59 = vpop.f32.mrf.mxu3 }
0x1cd6   :  { %v3259_v17 = vsel %vm204_vm1, %v3252_v59, -inf }
0x1cd7   :  { %3260 = vmax.xlane.f32.xlu0 %v3259_v17 }
0x1cdd   :  { %v3254_v18 = vpop.f32.mrf.mxu3  ;;  %v3369_v9 = vpop.f32.mrf.mxu2 }
0x1cde   :  { %v6430_v19 = vadd.f32 %v5471_v54, %v3369_v9  ;;  %v5345_v18 = vld [vmem:[%s6659_s14 + $0x10] sm:$0xff] }
0x1ce0   :  { %v3432_v17 = vmul.f32 0.25, %v6430_v19 }
0x1ce5   :  { %v3398_v20 = vpop.f32.mrf.mxu3  ;;  %v3371_v24 = vpop.f32.mrf.mxu2 }
0x1ce6   :  { %v3399_v21 = vadd.f32 %v5472_v55, %v3398_v20  ;;  %v3372_v27 = vadd.f32 %v5471_v54, %v3371_v24  ;;  %v3434_v54 = vpack.c.bf16 %v3432_v17, %v3432_v17 }
0x1ce8   :  { %v3436_v22 = vpack.c.bf16 %v3399_v21, %v3399_v21  ;;  %v3433_v30 = vmul.f32 0.25, %v3372_v27 }
0x1cea   :  { %v3444_v23 = vsel %vm361_vm3, %v3436_v22, 0  ;;  %v3435_v31 = vpack.c.bf16 %v3433_v30, %v3433_v30 }
0x1ceb   :  { %3453 = vmatpush.bf16.xpose.msra.mxu1 %v3444_v23  ;;  %v5473_v23 = vld [vmem:[%s6658_s8 + $0x3] ss:$0 sm:$0xff] }
0x1ced   :  { %v3400_v25 = vpop.f32.mrf.mxu3 }
0x1cee   :  { %v3401_v26 = vadd.f32 %v5472_v55, %v3400_v25 }
0x1cf0   :  { %v3437_v28 = vpack.c.bf16 %v3401_v26, %v3401_v26 }
0x1cf2   :  { %v3463_v29 = vsel %vm361_vm3, %v3437_v28, 0 }
0x1cf3   :  { %3472 = vmatpush.bf16.xpose.msra.mxu2 %v3463_v29 }
0x1cfa   :  { %5084 = vmatmul.msk.bf16.vlgmr.msra.gmra.mxu2 %vm361_vm3, %v3435_v31 }
0x1cfb   :  { %3606 = vmatpush.bf16.msrb.mxu2 %v5345_v18  ;;  %v5474_v18 = vld [vmem:[%s6666_s28 + $0x2] ss:$0 sm:$0xff] }
0x1d42   :  { %v3258_v32 = vpop.xlane.xlu2 %3257 }
0x1d43   :  { %v3262_v33 = vsub.f32 %v3233_v15, %v3258_v32 }
0x1d45   :  { %v3264_v34 = vmul.f32 1.442695, %v3262_v33 }
0x1d47   :  { %5585 = vpow2.f32 %v3264_v34 }
0x1d4a   :  { %v3261_v1 = vpop.xlane.xlu0 %3260 }
0x1d4b   :  { %v3263_v35 = vsub.f32 %v3252_v59, %v3261_v1 }
0x1d4d   :  { %v5586_v37 = vpop.eup %5585  ;;  %v3266_v41 = vmul.f32 1.442695, %v3263_v35 }
0x1d4e   :  { %v3268_v42 = vsel %vm204_vm1, %v5586_v37, 0.0 }
0x1d4f   :  { %5587 = vpow2.f32 %v3266_v41  ;;  %3269 = vadd.xlane.f32.xlu0 %v3268_v42  ;;  %v5352_v41 = vld [vmem:[%s6661_s24 + $0x28] sm:$0xff] }
0x1d55   :  { %v5588_v43 = vpop.eup %5587 }
0x1d56   :  { %v3271_v44 = vsel %vm204_vm1, %v5588_v43, 0.0 }
0x1d57   :  { %3272 = vadd.xlane.f32.xlu1 %v3271_v44 }
0x1d7d   :  { %v6438_v57 = vpop.f32.mrf.mxu2 }
0x1d7e   :  { %v3481_v45 = vsel %vm204_vm1, %v6438_v57, -inf }
0x1d7f   :  { %3482 = vmax.xlane.f32.xlu2 %v3481_v45 }
0x1d85   :  { %v3476_v36 = vpop.f32.mrf.mxu2 }
0x1dc2   :  { %v3270_v48 = vpop.xlane.xlu0 %3269 }
0x1dc3   :  { %5589 = vrcp.f32 %v3270_v48  ;;  %v3285_v46 = vand.u32 2147483648, %v3270_v48  ;;  %v3283_v60 = vand.u32 2147483647, %v3270_v48  ;;  %vm3279_vm12 = vweird.f32 %v3270_v48 }
0x1dc5   :  { %v3286_v5 = vor.u32 1.1754944e-38, %v3285_v46  ;;  %vm3284_vm14 = vcmp.eq.f32.partialorder %v3283_v60, 8.507059e+37 }
0x1dc9   :  { %v5590_v50 = vpop.eup %5589 }
0x1dca   :  { %v3275_v16 = vmul.f32 %v5590_v50, %v3270_v48  ;;  %v3273_v53 = vpop.xlane.xlu1 %3272  ;;  %vm3280_vm11 = vweird.f32 %v5590_v50 }
0x1dcb   :  { %5591 = vrcp.f32 %v3273_v53  ;;  %vm3281_vm13 = vmor %vm3279_vm12, %vm3280_vm11  ;;  %v3300_v0 = vand.u32 2147483648, %v3273_v53  ;;  %v3298_v4 = vand.u32 2147483647, %v3273_v53  ;;  %vm3294_vm5 = vweird.f32 %v3273_v53 }
0x1dcc   :  { %v3276_v51 = vsub.f32 1.0, %v3275_v16 }
0x1dcd   :  { %v3301_v11 = vor.u32 1.1754944e-38, %v3300_v0  ;;  %vm3299_vm7 = vcmp.eq.f32.partialorder %v3298_v4, 8.507059e+37 }
0x1dce   :  { %v3277_v58 = vmul.f32 %v5590_v50, %v3276_v51 }
0x1dd0   :  { %v3278_v61 = vadd.f32 %v5590_v50, %v3277_v58 }
0x1dd1   :  { %v5592_v14 = vpop.eup %5591 }
0x1dd2   :  { %v3282_v62 = vsel %vm3281_vm13, %v5590_v50, %v3278_v61  ;;  %v3290_v7 = vmul.f32 %v5592_v14, %v3273_v53  ;;  %vm3295_vm4 = vweird.f32 %v5592_v14 }
0x1dd3   :  { %v3287_v2 = vsel %vm3284_vm14, %v3286_v5, %v3282_v62  ;;  %vm3296_vm6 = vmor %vm3294_vm5, %vm3295_vm4 }
0x1dd4   :  { %v3288_v56 = vmul.f32 %v5586_v37, %v3287_v2  ;;  %v3291_v63 = vsub.f32 1.0, %v3290_v7 }
0x1dd6   :  { %v3304_v3 = vpack.c.bf16 %v3288_v56, %v3288_v56  ;;  %v3292_v8 = vmul.f32 %v5592_v14, %v3291_v63 }
0x1dd8   :  { %v3293_v10 = vadd.f32 %v5592_v14, %v3292_v8  ;;  %5054 = vmatmul.msk.bf16.vlgmr.msrb.gmra.mxu0 %vm204_vm1, %v3304_v3 }
0x1dda   :  { %v3297_v15 = vsel %vm3296_vm6, %v5592_v14, %v3293_v10 }
0x1ddb   :  { %v3302_v12 = vsel %vm3299_vm7, %v3301_v11, %v3297_v15 }
0x1ddc   :  { %v3303_v13 = vmul.f32 %v5588_v43, %v3302_v12  ;;  %v5351_v43 = vld [vmem:[%s6661_s24 + $0x20] sm:$0xff]  ;;  %v5348_v12 = vld [vmem:[%s6663_s6 + $0x28] sm:$0xff] }
0x1dde   :  { %v3305_v59 = vpack.c.bf16 %v3303_v13, %v3303_v13 }
0x1de0   :  { %5055 = vmatmul.msk.bf16.vlgmr.msrb.gmra.mxu1 %vm204_vm1, %v3305_v59  ;;  %v5347_v59 = vld [vmem:[%s6663_s6 + $0x20] sm:$0xff] }
0x1de8   :  { %5082 = vmatmul.msk.bf16.vlgmr.msra.gmra.mxu0 %vm277_vm2, %v6402_v52 }
0x1df0   :  { %5083 = vmatmul.msk.bf16.vlgmr.msra.gmra.mxu1 %vm361_vm3, %v3434_v54 }
0x1df2   :  { %v3483_v22 = vpop.xlane.xlu2 %3482 }
0x1df3   :  { %v3485_v24 = vsub.f32 %v6438_v57, %v3483_v22 }
0x1df5   :  { %v3488_v19 = vmul.f32 1.442695, %v3485_v24 }
0x1df7   :  { %5593 = vpow2.f32 %v3488_v19 }
0x1dfd   :  { %v5594_v1 = vpop.eup %5593 }
0x1dfe   :  { %v3493_v37 = vsel %vm204_vm1, %v5594_v1, 0.0 }
0x1e55   :  { %v3321_v9 = vpop.f32.mrf.mxu0 }
0x1e5d   :  { %v3323_v55 = vpop.f32.mrf.mxu0  ;;  %v3340_v20 = vpop.f32.mrf.mxu1 }
0x1e5e   :  { %v3344_v21 = vpack.c.bf16 %v3340_v20, %v3321_v9 }
0x1e60   :  { %5096 = vmatmul.msk.bf16.vlgmr.msrb.gmra.mxu2 %vm361_vm3, %v3344_v21 }
0x1e65   :  { %v3342_v25 = vpop.f32.mrf.mxu1  ;;  %v3427_v26 = vpop.f32.mrf.mxu0 }
0x1e66   :  { %v3428_v52 = vadd.f32 %v5473_v23, %v3427_v26  ;;  %v5346_v26 = vld [vmem:[%s6659_s14 + $0x18] sm:$0xff] }
0x1e67   :  { %3583 = vmatpush.bf16.msrb.mxu1 %v5346_v26 }
0x1e68   :  { %v3438_v27 = vpack.c.bf16 %v3428_v52, %v3428_v52  ;;  %v5356_v52 = vld [vmem:[%s6662_s30 + $0x28] sm:$0xff] }
0x1e6a   :  { %v3532_v28 = vsel %vm208_vm0, %v3438_v27, 0  ;;  %v5355_v27 = vld [vmem:[%s6662_s30 + $0x20] sm:$0xff] }
0x1e6b   :  { %3541 = vmatpush.bf16.msra.mxu3 %v3532_v28  ;;  %3804 = vmatpush.bf16.msra.mxu1 %v5356_v52 }
0x1e6d   :  { %v3429_v29 = vpop.f32.mrf.mxu0  ;;  %v3455_v30 = vpop.f32.mrf.mxu1 }
0x1e6e   :  { %v3430_v31 = vadd.f32 %v5473_v23, %v3429_v29  ;;  %v3478_v32 = vsel %vm204_vm1, %v3455_v30, -inf }
0x1e6f   :  { %3479 = vmax.xlane.f32.xlu1 %v3478_v32  ;;  %3746 = vmatpush.bf16.msrb.mxu3 %v5348_v12 }
0x1e70   :  { %v3439_v33 = vpack.c.bf16 %v3430_v31, %v3430_v31  ;;  %3805 = vmatpush.bf16.msra.mxu1 %v5355_v27  ;;  %v5475_v31 = vld [vmem:[%s6660_s19 + $0x1] ss:$0 sm:$0xff] }
0x1e72   :  { %v3551_v34 = vsel %vm208_vm0, %v3439_v33, 0 }
0x1e73   :  { %3560 = vmatpush.bf16.msrb.mxu0 %v3551_v34  ;;  %3747 = vmatpush.bf16.msrb.mxu3 %v5347_v59 }
0x1e75   :  { %v3457_v35 = vpop.f32.mrf.mxu1 }
0x1e77   :  { %3494 = vadd.xlane.f32.xlu1 %v3493_v37  ;;  %3775 = vmatpush.bf16.msra.mxu0 %v5352_v41 }
0x1e7b   :  { %3776 = vmatpush.bf16.msra.mxu0 %v5351_v43 }
0x1ee2   :  { %v3480_v42 = vpop.xlane.xlu1 %3479 }
0x1ee3   :  { %v3484_v44 = vsub.f32 %v3455_v30, %v3480_v42  ;;  %v3608_v30 = vpop.f32.mrf.mxu2 }
0x1ee5   :  { %v3486_v57 = vmul.f32 1.442695, %v3484_v44  ;;  %v5476_v44 = vld [vmem:[%s6667_s1 + $0x2] ss:$0 sm:$0xff] }
0x1ee7   :  { %5595 = vpow2.f32 %v3486_v57 }
0x1eea   :  { %v3495_v45 = vpop.xlane.xlu1 %3494 }
0x1eeb   :  { %5597 = vrcp.f32 %v3495_v45  ;;  %v3522_v16 = vand.u32 2147483648, %v3495_v45  ;;  %v3520_v51 = vand.u32 2147483647, %v3495_v45  ;;  %vm3516_vm9 = vweird.f32 %v3495_v45  ;;  %v3610_v37 = vpop.f32.mrf.mxu2 }
0x1eed   :  { %v5596_v36 = vpop.eup %5595  ;;  %v3523_v58 = vor.u32 1.1754944e-38, %v3522_v16  ;;  %vm3521_vm11 = vcmp.eq.f32.partialorder %v3520_v51, 8.507059e+37 }
0x1eee   :  { %v3490_v47 = vsel %vm204_vm1, %v5596_v36, 0.0 }
0x1eef   :  { %3491 = vadd.xlane.f32.xlu0 %v3490_v47 }
0x1ef1   :  { %v5598_v48 = vpop.eup %5597 }
0x1ef2   :  { %v3512_v49 = vmul.f32 %v5598_v48, %v3495_v45  ;;  %vm3517_vm8 = vweird.f32 %v5598_v48 }
0x1ef3   :  { %vm3518_vm10 = vmor %vm3516_vm9, %vm3517_vm8 }
0x1ef4   :  { %v3513_v50 = vsub.f32 1.0, %v3512_v49 }
0x1ef6   :  { %v3514_v53 = vmul.f32 %v5598_v48, %v3513_v50 }
0x1ef8   :  { %v3515_v46 = vadd.f32 %v5598_v48, %v3514_v53 }
0x1efa   :  { %v3519_v60 = vsel %vm3518_vm10, %v5598_v48, %v3515_v46 }
0x1efb   :  { %v3524_v61 = vsel %vm3521_vm11, %v3523_v58, %v3519_v60 }
0x1efc   :  { %v3525_v14 = vmul.f32 %v5594_v1, %v3524_v61 }
0x1efe   :  { %v3527_v5 = vpack.c.bf16 %v3525_v14, %v3525_v14 }
0x1f00   :  { %5086 = vmatmul.msk.bf16.vlgmr.msrb.gmra.mxu0 %vm204_vm1, %v3527_v5 }
0x1f10   :  { %5151 = vmatmul.msk.bf16.vlgmr.msra.gmra.mxu0 %vm277_vm2, %v6288_v40 }
0x1f62   :  { %v3492_v62 = vpop.xlane.xlu0 %3491 }
0x1f63   :  { %5599 = vrcp.f32 %v3492_v62  ;;  %v3507_v63 = vand.u32 2147483648, %v3492_v62  ;;  %v3505_v3 = vand.u32 2147483647, %v3492_v62  ;;  %vm3501_vm13 = vweird.f32 %v3492_v62 }
0x1f65   :  { %v3508_v4 = vor.u32 1.1754944e-38, %v3507_v63  ;;  %vm3506_vm4 = vcmp.eq.f32.partialorder %v3505_v3, 8.507059e+37 }
0x1f69   :  { %v5600_v7 = vpop.eup %5599 }
0x1f6a   :  { %v3497_v2 = vmul.f32 %v5600_v7, %v3492_v62  ;;  %vm3502_vm12 = vweird.f32 %v5600_v7 }
0x1f6b   :  { %vm3503_vm14 = vmor %vm3501_vm13, %vm3502_vm12 }
0x1f6c   :  { %v3498_v56 = vsub.f32 1.0, %v3497_v2 }
0x1f6e   :  { %v3499_v0 = vmul.f32 %v5600_v7, %v3498_v56 }
0x1f70   :  { %v3500_v8 = vadd.f32 %v5600_v7, %v3499_v0 }
0x1f72   :  { %v3504_v10 = vsel %vm3503_vm14, %v5600_v7, %v3500_v8 }
0x1f73   :  { %v3509_v11 = vsel %vm3506_vm4, %v3508_v4, %v3504_v10 }
0x1f74   :  { %v3510_v15 = vmul.f32 %v5596_v36, %v3509_v11 }
0x1f76   :  { %v3526_v13 = vpack.c.bf16 %v3510_v15, %v3510_v15 }
0x1f78   :  { %5085 = vmatmul.msk.bf16.vlgmr.msra.gmra.mxu3 %vm204_vm1, %v3526_v13 }
0x1f7d   :  { %v3562_v17 = vpop.f32.mrf.mxu0 }
0x1f85   :  { %v3564_v54 = vpop.f32.mrf.mxu0 }
0x1f8d   :  { %v3778_v9 = vpop.f32.mrf.mxu0 }
0x1f8e   :  { %v3779_v55 = vadd.f32 %v5474_v18, %v3778_v9 }
0x1f90   :  { %v3816_v20 = vpack.c.bf16 %v3779_v55, %v3779_v55 }
0x1f92   :  { %v3824_v21 = vsel %vm361_vm3, %v3816_v20, 0  ;;  %v5477_v20 = vld [vmem:[%s6664_s23 + $0x1] ss:$0 sm:$0xff] }
0x1f93   :  { %3833 = vmatpush.bf16.xpose.msra.mxu2 %v3824_v21 }
0x1f95   :  { %v3780_v22 = vpop.f32.mrf.mxu0 }
0x1f96   :  { %v3781_v23 = vadd.f32 %v5474_v18, %v3780_v22 }
0x1f98   :  { %v3817_v24 = vpack.c.bf16 %v3781_v23, %v3781_v23 }
0x1f9a   :  { %v3843_v25 = vsel %vm361_vm3, %v3817_v24, 0  ;;  %v5478_v24 = vld [vmem:[%s6665_s26 + $0x1] ss:$0 sm:$0xff] }
0x1f9b   :  { %3852 = vmatpush.bf16.xpose.msra.mxu3 %v3843_v25 }
0x1ffb   :  { %v3543_v19 = vpop.f32.mrf.mxu3 }
0x1ffc   :  { %v3566_v28 = vpack.c.bf16 %v3562_v17, %v3543_v19 }
0x1ffe   :  { %5091 = vmatmul.msk.bf16.vlgmr.msrb.gmra.mxu1 %vm361_vm3, %v3566_v28 }
0x2003   :  { %v3545_v29 = vpop.f32.mrf.mxu3 }
0x2004   :  { %v5350_v29 = vld [vmem:[%s6663_s6 + $0x38] sm:$0xff] }
0x2005   :  { %3968 = vmatpush.bf16.msrb.mxu2 %v5350_v29 }
0x200e   :  { %5160 = vmatmul.msk.bf16.vlgmr.msra.gmra.mxu1 %vm277_vm2, %v6288_v40 }
0x207b   :  { %v3585_v32 = vpop.f32.mrf.mxu1 }
0x207c   :  { %v3609_v33 = vadd.f32 %v3608_v30, %v3585_v32  ;;  %v5349_v30 = vld [vmem:[%s6663_s6 + $0x30] sm:$0xff] }
0x207d   :  { %3969 = vmatpush.bf16.msrb.mxu2 %v5349_v30  ;;  %v5353_v32 = vld [vmem:[%s6661_s24 + $0x30] sm:$0xff] }
0x207e   :  { %v3616_v34 = vadd.f32 %v5475_v31, %v3609_v33  ;;  %v5479_v33 = vld [vmem:[%s6668_s2 + $0x2] ss:$0 sm:$0xff] }
0x2080   :  { %v3618_v1 = vadd.f32 %v3616_v34, %v6396_v38 }
0x2082   :  { %v3624_v35 = vsel %vm277_vm2, %v3618_v1, 0.0 }
0x2083   :  { %3625 = vadd.xlane.f32.xlu2 %v3624_v35  ;;  %v3587_v41 = vpop.f32.mrf.mxu1 }
0x2084   :  { %v3611_v42 = vadd.f32 %v3610_v37, %v3587_v41 }
0x2086   :  { %v3617_v43 = vadd.f32 %v5475_v31, %v3611_v42  ;;  %v5354_v31 = vld [vmem:[%s6661_s24 + $0x38] sm:$0xff] }
0x2088   :  { %v3619_v57 = vadd.f32 %v3617_v43, %v6398_v39 }
0x208a   :  { %v3627_v45 = vsel %vm277_vm2, %v3619_v57, 0.0 }
0x208b   :  { %v3807_v36 = vpop.f32.mrf.mxu1  ;;  %3628 = vadd.xlane.f32.xlu0 %v3627_v45 }
0x208c   :  { %v3808_v47 = vadd.f32 %v5476_v44, %v3807_v36 }
0x208e   :  { %v3818_v48 = vpack.c.bf16 %v3808_v47, %v3808_v47 }
0x2090   :  { %v3912_v49 = vsel %vm208_vm0, %v3818_v48, 0 }
0x2091   :  { %3921 = vmatpush.bf16.msrb.mxu0 %v3912_v49  ;;  %v5480_v49 = vld [vmem:[%s6668_s2 + $0x3] ss:$0 sm:$0xff] }
0x2093   :  { %v3809_v38 = vpop.f32.mrf.mxu1 }
0x2094   :  { %v3810_v50 = vadd.f32 %v5476_v44, %v3809_v38 }
0x2096   :  { %v3819_v16 = vpack.c.bf16 %v3810_v50, %v3810_v50 }
0x2098   :  { %v3931_v53 = vsel %vm208_vm0, %v3819_v16, 0 }
0x2099   :  { %3940 = vmatpush.bf16.msrb.mxu1 %v3931_v53  ;;  %v5481_v53 = vld [vmem:[%s6666_s28 + $0x3] ss:$0 sm:$0xff] }
0x20f6   :  { %v3626_v51 = vpop.xlane.xlu2 %3625 }
0x20f7   :  { %v3630_v46 = vmul.f32 %v3626_v51, %v6032_v6 }
0x20f9   :  { %v3632_v58 = vsub.f32 %v3618_v1, %v3630_v46 }
0x20fb   :  { %v3634_v39 = vmul.f32 %v3632_v58, %v3632_v58 }
0x20fd   :  { %v3636_v60 = vsel %vm277_vm2, %v3634_v39, 0.0 }
0x20fe   :  { %3637 = vadd.xlane.f32.xlu1 %v3636_v60  ;;  %v3629_v61 = vpop.xlane.xlu0 %3628 }
0x20ff   :  { %v3631_v14 = vmul.f32 %v3629_v61, %v6032_v6 }
0x2101   :  { %v3633_v5 = vsub.f32 %v3619_v57, %v3631_v14 }
0x2103   :  { %v3635_v62 = vmul.f32 %v3633_v5, %v3633_v5 }
0x2105   :  { %v3639_v7 = vsel %vm277_vm2, %v3635_v62, 0.0 }
0x2106   :  { %3640 = vadd.xlane.f32.xlu2 %v3639_v7 }
0x2171   :  { %v3638_v2 = vpop.xlane.xlu1 %3637 }
0x2172   :  { %v3642_v56 = vmul.f32 %v3638_v2, %v6032_v6 }
0x2174   :  { %v3644_v63 = vadd.f32 1e-05, %v3642_v56 }
0x2176   :  { %5601 = vrsqrt.f32 %v3644_v63  ;;  %vm3652_vm6 = vweird.f32 %v3644_v63 }
0x2179   :  { %v3641_v0 = vpop.xlane.xlu2 %3640 }
0x217a   :  { %v3643_v3 = vmul.f32 %v3641_v0, %v6032_v6 }
0x217c   :  { %v5602_v8 = vpop.eup %5601  ;;  %v3645_v4 = vadd.f32 1e-05, %v3643_v3 }
0x217d   :  { %v3647_v10 = vmul.f32 %v5602_v8, %v3644_v63  ;;  %vm3653_vm5 = vweird.f32 %v5602_v8 }
0x217e   :  { %5603 = vrsqrt.f32 %v3645_v4  ;;  %vm3654_vm7 = vmor %vm3652_vm6, %vm3653_vm5  ;;  %vm3662_vm9 = vweird.f32 %v3645_v4 }
0x217f   :  { %v3648_v11 = vmul.f32 %v5602_v8, %v3647_v10 }
0x2181   :  { %v3649_v15 = vmul.f32 0.5, %v3648_v11 }
0x2183   :  { %v3650_v12 = vsub.f32 1.5, %v3649_v15 }
0x2184   :  { %v5604_v13 = vpop.eup %5603 }
0x2185   :  { %v3651_v59 = vmul.f32 %v5602_v8, %v3650_v12  ;;  %v3657_v17 = vmul.f32 %v5604_v13, %v3645_v4  ;;  %vm3663_vm8 = vweird.f32 %v5604_v13 }
0x2186   :  { %vm3664_vm10 = vmor %vm3662_vm9, %vm3663_vm8 }
0x2187   :  { %v3658_v54 = vmul.f32 %v5604_v13, %v3657_v17  ;;  %v3655_v18 = vsel %vm3654_vm7, %v5602_v8, %v3651_v59 }
0x2188   :  { %v3666_v21 = vmul.f32 %v3655_v18, %v3632_v58  ;;  %v5358_v18 = vld [vmem:[%s6662_s30 + $0x38] sm:$0xff] }
0x2189   :  { %v3659_v9 = vmul.f32 0.5, %v3658_v54  ;;  %4026 = vmatpush.bf16.msra.mxu0 %v5358_v18 }
0x218a   :  { %v3671_v25 = vmul.f32 %v5477_v20, %v3666_v21 }
0x218b   :  { %v3660_v55 = vsub.f32 1.5, %v3659_v9 }
0x218c   :  { %v6492_v27 = vadd.f32 %v5478_v24, %v3671_v25 }
0x218d   :  { %v3661_v22 = vmul.f32 %v5604_v13, %v3660_v55  ;;  %v5357_v55 = vld [vmem:[%s6662_s30 + $0x30] sm:$0xff] }
0x218e   :  { %4027 = vmatpush.bf16.msra.mxu0 %v5357_v55 }
0x218f   :  { %v3665_v23 = vsel %vm3664_vm10, %v5604_v13, %v3661_v22 }
0x2190   :  { %v3667_v26 = vmul.f32 %v3665_v23, %v3633_v5 }
0x2192   :  { %v3672_v52 = vmul.f32 %v5477_v20, %v3667_v26 }
0x2194   :  { %v6494_v19 = vadd.f32 %v5478_v24, %v3672_v52 }
0x2196   :  { %v3721_v28 = vpack.c.bf16 %v6494_v19, %v6492_v27 }
0x2198   :  { %5142 = vmatmul.msk.bf16.vlgmr.msrb.gmra.mxu3 %vm277_vm2, %v3721_v28 }
0x2199   :  { %3997 = vmatpush.bf16.msrb.mxu3 %v5354_v31 }
0x219d   :  { %3998 = vmatpush.bf16.msrb.mxu3 %v5353_v32 }
0x221b   :  { %v3749_v34 = vpop.f32.mrf.mxu3 }
0x221c   :  { %v3750_v1 = vadd.f32 %v5479_v33, %v3749_v34 }
0x221e   :  { %v3812_v35 = vmul.f32 0.25, %v3750_v1 }
0x2220   :  { %v3814_v37 = vpack.c.bf16 %v3812_v35, %v3812_v35 }
0x2222   :  { %5161 = vmatmul.msk.bf16.vlgmr.msra.gmra.mxu2 %vm361_vm3, %v3814_v37 }
0x2223   :  { %v3751_v41 = vpop.f32.mrf.mxu3 }
0x2224   :  { %v3752_v42 = vadd.f32 %v5479_v33, %v3751_v41 }
0x2226   :  { %v3813_v43 = vmul.f32 0.25, %v3752_v42 }
0x2228   :  { %v3815_v44 = vpack.c.bf16 %v3813_v43, %v3813_v43 }
0x222a   :  { %5162 = vmatmul.msk.bf16.vlgmr.msra.gmra.mxu3 %vm361_vm3, %v3815_v44 }
0x2232   :  { %5173 = vmatmul.msk.bf16.vlgmr.msrb.gmra.mxu2 %vm277_vm2, %v3721_v28 }
0x223a   :  { %5182 = vmatmul.msk.bf16.vlgmr.msrb.gmra.mxu3 %vm277_vm2, %v6288_v40 }
0x22a5   :  { %v3835_v57 = vpop.f32.mrf.mxu2 }
0x22a6   :  { %v3858_v45 = vsel %vm204_vm1, %v3835_v57, -inf }
0x22a7   :  { %3859 = vmax.xlane.f32.xlu2 %v3858_v45 }
0x22ad   :  { %v3837_v36 = vpop.f32.mrf.mxu2  ;;  %v3854_v47 = vpop.f32.mrf.mxu3 }
0x22ae   :  { %v3861_v48 = vsel %vm204_vm1, %v3854_v47, -inf }
0x22af   :  { %3862 = vmax.xlane.f32.xlu0 %v3861_v48 }
0x22b5   :  { %v3856_v38 = vpop.f32.mrf.mxu3  ;;  %v3971_v50 = vpop.f32.mrf.mxu2 }
0x22b6   :  { %v6512_v16 = vadd.f32 %v5480_v49, %v3971_v50 }
0x22bd   :  { %v4000_v51 = vpop.f32.mrf.mxu3  ;;  %v3973_v60 = vpop.f32.mrf.mxu2 }
0x22be   :  { %v4001_v46 = vadd.f32 %v5481_v53, %v4000_v51  ;;  %v3974_v5 = vadd.f32 %v5480_v49, %v3973_v60  ;;  %v5359_v49 = vld [vmem:[%s6669_s7 + $0x10] sm:$0xff] }
0x22c0   :  { %v4038_v58 = vpack.c.bf16 %v4001_v46, %v4001_v46  ;;  %v4035_v2 = vmul.f32 0.25, %v3974_v5 }
0x22c2   :  { %v4046_v39 = vsel %vm361_vm3, %v4038_v58, 0  ;;  %v4037_v56 = vpack.c.bf16 %v4035_v2, %v4035_v2  ;;  %v5482_v58 = vld [vmem:[%s6667_s1 + $0x3] ss:$0 sm:$0xff] }
0x22c3   :  { %4055 = vmatpush.bf16.xpose.msra.mxu1 %v4046_v39 }
0x22c5   :  { %v4002_v61 = vpop.f32.mrf.mxu3 }
0x22c6   :  { %v4003_v14 = vadd.f32 %v5481_v53, %v4002_v61 }
0x22c8   :  { %v4039_v62 = vpack.c.bf16 %v4003_v14, %v4003_v14 }
0x22ca   :  { %v4065_v7 = vsel %vm361_vm3, %v4039_v62, 0 }
0x22cb   :  { %4074 = vmatpush.bf16.xpose.msra.mxu2 %v4065_v7 }
0x22d2   :  { %5193 = vmatmul.msk.bf16.vlgmr.msra.gmra.mxu2 %vm361_vm3, %v4037_v56 }
0x22d3   :  { %4208 = vmatpush.bf16.msrb.mxu2 %v5359_v49  ;;  %v5483_v49 = vld [vmem:[%s6670_s10 + $0x1] ss:$0 sm:$0xff] }
0x231a   :  { %v3860_v63 = vpop.xlane.xlu2 %3859 }
0x231b   :  { %v3864_v0 = vsub.f32 %v3835_v57, %v3860_v63 }
0x231d   :  { %v3866_v3 = vmul.f32 1.442695, %v3864_v0 }
0x231f   :  { %5605 = vpow2.f32 %v3866_v3 }
0x2322   :  { %v3863_v8 = vpop.xlane.xlu0 %3862 }
0x2323   :  { %v3865_v4 = vsub.f32 %v3854_v47, %v3863_v8  ;;  %v4034_v47 = vmul.f32 0.25, %v6512_v16 }
0x2325   :  { %v5606_v10 = vpop.eup %5605  ;;  %v3868_v11 = vmul.f32 1.442695, %v3865_v4  ;;  %v4036_v48 = vpack.c.bf16 %v4034_v47, %v4034_v47 }
0x2326   :  { %v3870_v15 = vsel %vm204_vm1, %v5606_v10, 0.0 }
0x2327   :  { %5607 = vpow2.f32 %v3868_v11  ;;  %3871 = vadd.xlane.f32.xlu0 %v3870_v15 }
0x232d   :  { %v5608_v12 = vpop.eup %5607 }
0x232e   :  { %v3873_v13 = vsel %vm204_vm1, %v5608_v12, 0.0 }
0x232f   :  { %3874 = vadd.xlane.f32.xlu1 %v3873_v13 }
0x2355   :  { %v6520_v59 = vpop.f32.mrf.mxu2 }
0x2356   :  { %v4083_v17 = vsel %vm204_vm1, %v6520_v59, -inf }
0x2357   :  { %4084 = vmax.xlane.f32.xlu2 %v4083_v17 }
0x235d   :  { %v4078_v54 = vpop.f32.mrf.mxu2 }
0x239a   :  { %v3872_v9 = vpop.xlane.xlu0 %3871 }
0x239b   :  { %5609 = vrcp.f32 %v3872_v9  ;;  %v3887_v24 = vand.u32 2147483648, %v3872_v9  ;;  %v3885_v26 = vand.u32 2147483647, %v3872_v9  ;;  %vm3881_vm12 = vweird.f32 %v3872_v9 }
0x239d   :  { %v3888_v29 = vor.u32 1.1754944e-38, %v3887_v24  ;;  %vm3886_vm14 = vcmp.eq.f32.partialorder %v3885_v26, 8.507059e+37 }
0x23a1   :  { %v5610_v20 = vpop.eup %5609 }
0x23a2   :  { %v3877_v21 = vmul.f32 %v5610_v20, %v3872_v9  ;;  %v3875_v22 = vpop.xlane.xlu1 %3874  ;;  %vm3882_vm11 = vweird.f32 %v5610_v20 }
0x23a3   :  { %5611 = vrcp.f32 %v3875_v22  ;;  %vm3883_vm13 = vmor %vm3881_vm12, %vm3882_vm11  ;;  %v3902_v1 = vand.u32 2147483648, %v3875_v22  ;;  %v3900_v41 = vand.u32 2147483647, %v3875_v22  ;;  %vm3896_vm5 = vweird.f32 %v3875_v22 }
0x23a4   :  { %v3878_v23 = vsub.f32 1.0, %v3877_v21 }
0x23a5   :  { %v3903_v43 = vor.u32 1.1754944e-38, %v3902_v1  ;;  %vm3901_vm7 = vcmp.eq.f32.partialorder %v3900_v41, 8.507059e+37 }
0x23a6   :  { %v3879_v25 = vmul.f32 %v5610_v20, %v3878_v23 }
0x23a8   :  { %v3880_v52 = vadd.f32 %v5610_v20, %v3879_v25 }
0x23a9   :  { %v5612_v28 = vpop.eup %5611 }
0x23aa   :  { %v3884_v30 = vsel %vm3883_vm13, %v5610_v20, %v3880_v52  ;;  %v3892_v31 = vmul.f32 %v5612_v28, %v3875_v22  ;;  %vm3897_vm4 = vweird.f32 %v5612_v28 }
0x23ab   :  { %v3889_v32 = vsel %vm3886_vm14, %v3888_v29, %v3884_v30  ;;  %vm3898_vm6 = vmor %vm3896_vm5, %vm3897_vm4 }
0x23ac   :  { %v3890_v33 = vmul.f32 %v5606_v10, %v3889_v32  ;;  %v3893_v34 = vsub.f32 1.0, %v3892_v31 }
0x23ae   :  { %v3906_v35 = vpack.c.bf16 %v3890_v33, %v3890_v33  ;;  %v3894_v37 = vmul.f32 %v5612_v28, %v3893_v34 }
0x23b0   :  { %v3895_v42 = vadd.f32 %v5612_v28, %v3894_v37  ;;  %5163 = vmatmul.msk.bf16.vlgmr.msrb.gmra.mxu0 %vm204_vm1, %v3906_v35 }
0x23b2   :  { %v3899_v44 = vsel %vm3898_vm6, %v5612_v28, %v3895_v42 }
0x23b3   :  { %v3904_v57 = vsel %vm3901_vm7, %v3903_v43, %v3899_v44 }
0x23b4   :  { %v3905_v45 = vmul.f32 %v5608_v12, %v3904_v57  ;;  %v5360_v57 = vld [vmem:[%s6669_s7 + $0x18] sm:$0xff] }
0x23b6   :  { %v3907_v36 = vpack.c.bf16 %v3905_v45, %v3905_v45 }
0x23b8   :  { %5164 = vmatmul.msk.bf16.vlgmr.msrb.gmra.mxu1 %vm204_vm1, %v3907_v36 }
0x23b9   :  { %4185 = vmatpush.bf16.msrb.mxu1 %v5360_v57  ;;  %v5486_v57 = vld [vmem:[%s6675_s0 + $0x1] ss:$0 sm:$0xff] }
0x23c0   :  { %5191 = vmatmul.msk.bf16.vlgmr.msra.gmra.mxu0 %vm277_vm2, %v6288_v40 }
0x23c8   :  { %5192 = vmatmul.msk.bf16.vlgmr.msra.gmra.mxu1 %vm361_vm3, %v4036_v48 }
0x23ca   :  { %v4085_v46 = vpop.xlane.xlu2 %4084 }
0x23cb   :  { %v4087_v39 = vsub.f32 %v6520_v59, %v4085_v46 }
0x23cd   :  { %v4090_v16 = vmul.f32 1.442695, %v4087_v39 }
0x23cf   :  { %5613 = vpow2.f32 %v4090_v16 }
0x23d5   :  { %v5614_v3 = vpop.eup %5613 }
0x23d6   :  { %v4095_v4 = vsel %vm204_vm1, %v5614_v3, 0.0 }
0x242d   :  { %v3923_v38 = vpop.f32.mrf.mxu0 }
0x2435   :  { %v3925_v50 = vpop.f32.mrf.mxu0  ;;  %v3942_v53 = vpop.f32.mrf.mxu1 }
0x2436   :  { %v3946_v51 = vpack.c.bf16 %v3942_v53, %v3923_v38 }
0x2438   :  { %5205 = vmatmul.msk.bf16.vlgmr.msrb.gmra.mxu2 %vm361_vm3, %v3946_v51 }
0x243d   :  { %v3944_v60 = vpop.f32.mrf.mxu1  ;;  %v4029_v61 = vpop.f32.mrf.mxu0 }
0x243e   :  { %v4030_v40 = vadd.f32 %v5482_v58, %v4029_v61 }
0x2440   :  { %v4040_v14 = vpack.c.bf16 %v4030_v40, %v4030_v40 }
0x2442   :  { %v4134_v5 = vsel %vm208_vm0, %v4040_v14, 0 }
0x2443   :  { %4143 = vmatpush.bf16.msra.mxu3 %v4134_v5 }
0x2445   :  { %v4031_v62 = vpop.f32.mrf.mxu0  ;;  %v4057_v7 = vpop.f32.mrf.mxu1 }
0x2446   :  { %v4032_v2 = vadd.f32 %v5482_v58, %v4031_v62  ;;  %v4080_v56 = vsel %vm204_vm1, %v4057_v7, -inf }
0x2447   :  { %4081 = vmax.xlane.f32.xlu1 %v4080_v56 }
0x2448   :  { %v4041_v63 = vpack.c.bf16 %v4032_v2, %v4032_v2 }
0x244a   :  { %v4153_v0 = vsel %vm208_vm0, %v4041_v63, 0 }
0x244b   :  { %4162 = vmatpush.bf16.msrb.mxu0 %v4153_v0 }
0x244d   :  { %v4059_v8 = vpop.f32.mrf.mxu1 }
0x244f   :  { %4096 = vadd.xlane.f32.xlu1 %v4095_v4 }
0x24ba   :  { %v4082_v10 = vpop.xlane.xlu1 %4081 }
0x24bb   :  { %v4086_v11 = vsub.f32 %v4057_v7, %v4082_v10  ;;  %v4210_v48 = vpop.f32.mrf.mxu2 }
0x24bd   :  { %v4088_v15 = vmul.f32 1.442695, %v4086_v11  ;;  %v5361_v11 = vld [vmem:[%s6671_s11 + $0x10] sm:$0xff] }
0x24bf   :  { %5615 = vpow2.f32 %v4088_v15 }
0x24c2   :  { %v4097_v12 = vpop.xlane.xlu1 %4096 }
0x24c3   :  { %5617 = vrcp.f32 %v4097_v12  ;;  %v4124_v9 = vand.u32 2147483648, %v4097_v12  ;;  %v4122_v20 = vand.u32 2147483647, %v4097_v12  ;;  %vm4118_vm8 = vweird.f32 %v4097_v12  ;;  %v4212_v58 = vpop.f32.mrf.mxu2 }
0x24c5   :  { %v5616_v13 = vpop.eup %5615  ;;  %v4125_v22 = vor.u32 1.1754944e-38, %v4124_v9  ;;  %vm4123_vm10 = vcmp.eq.f32.partialorder %v4122_v20, 8.507059e+37 }
0x24c6   :  { %v4092_v59 = vsel %vm204_vm1, %v5616_v13, 0.0 }
0x24c7   :  { %4093 = vadd.xlane.f32.xlu0 %v4092_v59 }
0x24c9   :  { %v5618_v17 = vpop.eup %5617 }
0x24ca   :  { %v4114_v54 = vmul.f32 %v5618_v17, %v4097_v12  ;;  %vm4119_vm0 = vweird.f32 %v5618_v17 }
0x24cb   :  { %vm4120_vm9 = vmor %vm4118_vm8, %vm4119_vm0 }
0x24cc   :  { %v4115_v18 = vsub.f32 1.0, %v4114_v54 }
0x24ce   :  { %v4116_v55 = vmul.f32 %v5618_v17, %v4115_v18 }
0x24d0   :  { %v4117_v21 = vadd.f32 %v5618_v17, %v4116_v55 }
0x24d2   :  { %v4121_v23 = vsel %vm4120_vm9, %v5618_v17, %v4117_v21 }
0x24d3   :  { %v4126_v24 = vsel %vm4123_vm10, %v4125_v22, %v4121_v23 }
0x24d4   :  { %v4127_v25 = vmul.f32 %v5614_v3, %v4126_v24 }
0x24d6   :  { %v4129_v26 = vpack.c.bf16 %v4127_v25, %v4127_v25 }
0x24d8   :  { %5195 = vmatmul.msk.bf16.vlgmr.msrb.gmra.mxu0 %vm204_vm1, %v4129_v26  ;;  %v5484_v26 = vld [vmem:[%s6672_s15 + $0x1] ss:$0 sm:$0xff] }
0x253a   :  { %v4094_v52 = vpop.xlane.xlu0 %4093 }
0x253b   :  { %5619 = vrcp.f32 %v4094_v52  ;;  %v4109_v31 = vand.u32 2147483648, %v4094_v52  ;;  %v4107_v33 = vand.u32 2147483647, %v4094_v52  ;;  %vm4103_vm12 = vweird.f32 %v4094_v52 }
0x253d   :  { %v4110_v1 = vor.u32 1.1754944e-38, %v4109_v31  ;;  %vm4108_vm14 = vcmp.eq.f32.partialorder %v4107_v33, 8.507059e+37 }
0x2541   :  { %v5620_v28 = vpop.eup %5619 }
0x2542   :  { %v4099_v29 = vmul.f32 %v5620_v28, %v4094_v52  ;;  %vm4104_vm11 = vweird.f32 %v5620_v28 }
0x2543   :  { %vm4105_vm13 = vmor %vm4103_vm12, %vm4104_vm11 }
0x2544   :  { %v4100_v30 = vsub.f32 1.0, %v4099_v29 }
0x2546   :  { %v4101_v32 = vmul.f32 %v5620_v28, %v4100_v30  ;;  %v5485_v30 = vld [vmem:[%s6673_s16 + $0x1] ss:$0 sm:$0xff] }
0x2548   :  { %v4102_v34 = vadd.f32 %v5620_v28, %v4101_v32 }
0x254a   :  { %v4106_v35 = vsel %vm4105_vm13, %v5620_v28, %v4102_v34  ;;  %vm4475_vm13 = vcmask 1041409  }
0x254b   :  { %v4111_v37 = vsel %vm4108_vm14, %v4110_v1, %v4106_v35 }
0x254c   :  { %v4112_v41 = vmul.f32 %v5616_v13, %v4111_v37  ;;  %v5366_v37 = vld [vmem:[%s6674_s18 + $0x38] sm:$0xff] }
0x254d   :  { %4368 = vmatpush.bf16.msra.mxu0 %v5366_v37 }
0x254e   :  { %v4128_v42 = vpack.c.bf16 %v4112_v41, %v4112_v41  ;;  %v5365_v41 = vld [vmem:[%s6674_s18 + $0x30] sm:$0xff] }
0x2550   :  { %5194 = vmatmul.msk.bf16.vlgmr.msra.gmra.mxu3 %vm204_vm1, %v4128_v42  ;;  %v5364_v42 = vld [vmem:[%s6674_s18 + $0x28] sm:$0xff] }
0x2551   :  { %4369 = vmatpush.bf16.msra.mxu0 %v5365_v41 }
0x2555   :  { %v4164_v43 = vpop.f32.mrf.mxu0  ;;  %4370 = vmatpush.bf16.msra.mxu0 %v5364_v42 }
0x255d   :  { %v4166_v44 = vpop.f32.mrf.mxu0 }
0x25d3   :  { %v4145_v45 = vpop.f32.mrf.mxu3 }
0x25d4   :  { %v4168_v36 = vpack.c.bf16 %v4164_v43, %v4145_v45  ;;  %v5363_v43 = vld [vmem:[%s6674_s18 + $0x20] sm:$0xff] }
0x25d5   :  { %4371 = vmatpush.bf16.msra.mxu0 %v5363_v43 }
0x25d6   :  { %5200 = vmatmul.msk.bf16.vlgmr.msrb.gmra.mxu1 %vm361_vm3, %v4168_v36 }
0x25db   :  { %v4147_v47 = vpop.f32.mrf.mxu3 }
0x2653   :  { %v4187_v38 = vpop.f32.mrf.mxu1 }
0x2654   :  { %v4211_v50 = vadd.f32 %v4210_v48, %v4187_v38 }
0x2656   :  { %v4218_v53 = vadd.f32 %v5483_v49, %v4211_v50  ;;  %v5487_v50 = vld [vmem:[%s6676_s5 + $0x1] ss:$0 sm:$0xff] }
0x2658   :  { %v4220_v51 = vadd.f32 %v4218_v53, %v6492_v27 }
0x265a   :  { %v4226_v46 = vsel %vm277_vm2, %v4220_v51, 0.0 }
0x265b   :  { %4227 = vadd.xlane.f32.xlu2 %v4226_v46  ;;  %v4189_v39 = vpop.f32.mrf.mxu1 }
0x265c   :  { %v4213_v60 = vadd.f32 %v4212_v58, %v4189_v39 }
0x265e   :  { %v4219_v61 = vadd.f32 %v5483_v49, %v4213_v60 }
0x2660   :  { %v4221_v40 = vadd.f32 %v4219_v61, %v6494_v19  ;;  %v5362_v19 = vld [vmem:[%s6671_s11 + $0x18] sm:$0xff] }
0x2661   :  { %4323 = vmatpush.bf16.msrb.mxu3 %v5362_v19 }
0x2662   :  { %v4229_v14 = vsel %vm277_vm2, %v4221_v40, 0.0 }
0x2663   :  { %4230 = vadd.xlane.f32.xlu0 %v4229_v14 }
0x2665   :  { %4324 = vmatpush.bf16.msrb.mxu3 %v5361_v11 }
0x26ce   :  { %v4228_v16 = vpop.xlane.xlu2 %4227 }
0x26cf   :  { %v4232_v5 = vmul.f32 %v4228_v16, %v6032_v6 }
0x26d1   :  { %v4234_v62 = vsub.f32 %v4220_v51, %v4232_v5 }
0x26d3   :  { %v4236_v7 = vmul.f32 %v4234_v62, %v4234_v62 }
0x26d5   :  { %v4238_v27 = vsel %vm277_vm2, %v4236_v7, 0.0 }
0x26d6   :  { %4239 = vadd.xlane.f32.xlu1 %v4238_v27  ;;  %v4231_v2 = vpop.xlane.xlu0 %4230 }
0x26d7   :  { %v4233_v56 = vmul.f32 %v4231_v2, %v6032_v6 }
0x26d9   :  { %v4235_v63 = vsub.f32 %v4221_v40, %v4233_v56 }
0x26db   :  { %v4237_v0 = vmul.f32 %v4235_v63, %v4235_v63 }
0x26dd   :  { %v4241_v3 = vsel %vm277_vm2, %v4237_v0, 0.0 }
0x26de   :  { %4242 = vadd.xlane.f32.xlu2 %v4241_v3 }
0x2749   :  { %v4240_v8 = vpop.xlane.xlu1 %4239 }
0x274a   :  { %v4244_v4 = vmul.f32 %v4240_v8, %v6032_v6 }
0x274c   :  { %v4246_v10 = vadd.f32 1e-05, %v4244_v4 }
0x274e   :  { %5621 = vrsqrt.f32 %v4246_v10  ;;  %vm4254_vm3 = vweird.f32 %v4246_v10 }
0x2751   :  { %v4243_v15 = vpop.xlane.xlu2 %4242 }
0x2752   :  { %v4245_v12 = vmul.f32 %v4243_v15, %v6032_v6 }
0x2754   :  { %v5622_v13 = vpop.eup %5621  ;;  %v4247_v59 = vadd.f32 1e-05, %v4245_v12 }
0x2755   :  { %v4249_v17 = vmul.f32 %v5622_v13, %v4246_v10  ;;  %vm4255_vm1 = vweird.f32 %v5622_v13 }
0x2756   :  { %5623 = vrsqrt.f32 %v4247_v59  ;;  %vm4256_vm4 = vmor %vm4254_vm3, %vm4255_vm1  ;;  %vm4264_vm6 = vweird.f32 %v4247_v59 }
0x2757   :  { %v4250_v54 = vmul.f32 %v5622_v13, %v4249_v17  ;;  %v5705_v17 = vmov 8.0  }
0x2759   :  { %v4251_v18 = vmul.f32 0.5, %v4250_v54 }
0x275b   :  { %v4252_v9 = vsub.f32 1.5, %v4251_v18  ;;  %v5368_v18 = vld [vmem:[%s5940_s4 + $0x8] sm:$0xff] }
0x275c   :  { %v5624_v55 = vpop.eup %5623  ;;  %4499 = vmatpush.bf16.msra.mxu1 %v5368_v18 }
0x275d   :  { %v4253_v20 = vmul.f32 %v5622_v13, %v4252_v9  ;;  %v4259_v21 = vmul.f32 %v5624_v55, %v4247_v59  ;;  %vm4265_vm5 = vweird.f32 %v5624_v55 }
0x275e   :  { %vm4266_vm7 = vmor %vm4264_vm6, %vm4265_vm5 }
0x275f   :  { %v4260_v22 = vmul.f32 %v5624_v55, %v4259_v21  ;;  %v4257_v23 = vsel %vm4256_vm4, %v5622_v13, %v4253_v20  ;;  %v5488_v21 = vld [vmem:[%s6677_s9 + $0x1] ss:$0 sm:$0xff] }
0x2760   :  { %v4268_v52 = vmul.f32 %v4257_v23, %v4234_v62 }
0x2761   :  { %v4261_v24 = vmul.f32 0.5, %v4260_v22 }
0x2762   :  { %v4273_v31 = vmul.f32 %v5484_v26, %v4268_v52 }
0x2763   :  { %v4262_v25 = vsub.f32 1.5, %v4261_v24  ;;  %v5489_v24 = vld [vmem:[%s5935_s27 + $0x1] ss:$0 sm:$0xff]  ;;  %s5706_s27 = smov [#allocation2]  }
0x2764   :  { %v4278_v34 = vadd.f32 %v5485_v30, %v4273_v31 }
0x2765   :  { %v4263_v28 = vmul.f32 %v5624_v55, %v4262_v25 }
0x2767   :  { %v4267_v29 = vsel %vm4266_vm7, %v5624_v55, %v4263_v28 }
0x2768   :  { %v4269_v32 = vmul.f32 %v4267_v29, %v4235_v63 }
0x276a   :  { %v4274_v33 = vmul.f32 %v5484_v26, %v4269_v32 }
0x276c   :  { %v4279_v1 = vadd.f32 %v5485_v30, %v4274_v33 }
0x276e   :  { %v4298_v35 = vpack.c.bf16 %v4279_v1, %v4278_v34 }
0x2770   :  { %5230 = vmatmul.msk.bf16.vlgmr.msrb.gmra.mxu3 %vm277_vm2, %v4298_v35 }
0x27f3   :  { %v4326_v44 = vpop.f32.mrf.mxu3 }
0x27f4   :  { %v4327_v45 = vadd.f32 %v5486_v57, %v4326_v44 }
0x27f6   :  { %v4331_v48 = vmax.f32 %v4327_v45, 0.0 }
0x27fb   :  { %v4328_v36 = vpop.f32.mrf.mxu3 }
0x27fc   :  { %v4329_v47 = vadd.f32 %v5486_v57, %v4328_v36 }
0x27fe   :  { %v4332_v49 = vmax.f32 %v4329_v47, 0.0 }
0x2800   :  { %v4333_v38 = vpack.c.bf16 %v4332_v49, %v4331_v48 }
0x2802   :  { %5247 = vmatmul.msk.bf16.vlgmr.msra.gmra.mxu0 %vm904_vm15, %v4333_v38 }
0x287f   :  { %v4373_v53 = vpop.f32.mrf.mxu0 }
0x2880   :  { %v4374_v51 = vadd.f32 %v5487_v50, %v4373_v53 }
0x2882   :  { %v4378_v46 = vadd.f32 %v4374_v51, %v4278_v34 }
0x2884   :  { %v4384_v58 = vsel %vm277_vm2, %v4378_v46, 0.0 }
0x2885   :  { %4385 = vadd.xlane.f32.xlu0 %v4384_v58 }
0x2887   :  { %v4375_v39 = vpop.f32.mrf.mxu0 }
0x2888   :  { %v4376_v60 = vadd.f32 %v5487_v50, %v4375_v39 }
0x288a   :  { %v4379_v61 = vadd.f32 %v4376_v60, %v4279_v1 }
0x288c   :  { %v4387_v40 = vsel %vm277_vm2, %v4379_v61, 0.0 }
0x288d   :  { %4388 = vadd.xlane.f32.xlu1 %v4387_v40 }
0x28f8   :  { %v4386_v14 = vpop.xlane.xlu0 %4385 }
0x28f9   :  { %v4390_v16 = vmul.f32 %v4386_v14, %v6032_v6 }
0x28fb   :  { %v4392_v5 = vsub.f32 %v4378_v46, %v4390_v16 }
0x28fd   :  { %v4394_v62 = vmul.f32 %v4392_v5, %v4392_v5 }
0x28ff   :  { %v4396_v7 = vsel %vm277_vm2, %v4394_v62, 0.0 }
0x2900   :  { %v4389_v27 = vpop.xlane.xlu1 %4388  ;;  %4397 = vadd.xlane.f32.xlu2 %v4396_v7 }
0x2901   :  { %v4391_v2 = vmul.f32 %v4389_v27, %v6032_v6  ;;  %v5490_v27 = vld [vmem:[%s5945_s12] ss:$0 sm:$0xff] }
0x2903   :  { %v4393_v56 = vsub.f32 %v4379_v61, %v4391_v2 }
0x2905   :  { %v4395_v63 = vmul.f32 %v4393_v56, %v4393_v56 }
0x2907   :  { %v4399_v0 = vsel %vm277_vm2, %v4395_v63, 0.0 }
0x2908   :  { %4400 = vadd.xlane.f32.xlu0 %v4399_v0 }
0x2973   :  { %v4398_v3 = vpop.xlane.xlu2 %4397 }
0x2974   :  { %v4402_v19 = vmul.f32 %v4398_v3, %v6032_v6 }
0x2976   :  { %v4404_v8 = vadd.f32 1e-05, %v4402_v19 }
0x2978   :  { %5625 = vrsqrt.f32 %v4404_v8  ;;  %vm4412_vm0 = vweird.f32 %v4404_v8 }
0x297b   :  { %v4401_v4 = vpop.xlane.xlu0 %4400 }
0x297c   :  { %v4403_v10 = vmul.f32 %v4401_v4, %v6032_v6  ;;  %v5367_v6 = vld [vmem:[%s5940_s4] sm:$0xff]  ;;  %s4512_s4 = sshll.u32 %s5706_s27, 4  ;;  %s4513_s4 = int_to_ptr.vmem [resolvable:$true] %s4512_s4 }
0x297d   :  { %4500 = vmatpush.bf16.msra.mxu1 %v5367_v6 }
0x297e   :  { %v5626_v11 = vpop.eup %5625  ;;  %v4405_v15 = vadd.f32 1e-05, %v4403_v10 }
0x297f   :  { %v4407_v12 = vmul.f32 %v5626_v11, %v4404_v8  ;;  %vm4413_vm15 = vweird.f32 %v5626_v11 }
0x2980   :  { %5627 = vrsqrt.f32 %v4405_v15  ;;  %vm4414_vm8 = vmor %vm4412_vm0, %vm4413_vm15  ;;  %vm4422_vm10 = vweird.f32 %v4405_v15 }
0x2981   :  { %v4408_v13 = vmul.f32 %v5626_v11, %v4407_v12  ;;  %5629 = vrcp.f32 %v5705_v17 }
0x2983   :  { %v4409_v59 = vmul.f32 0.5, %v4408_v13 }
0x2985   :  { %v4410_v54 = vsub.f32 1.5, %v4409_v59 }
0x2986   :  { %v5628_v9 = vpop.eup %5627 }
0x2987   :  { %v4411_v55 = vmul.f32 %v5626_v11, %v4410_v54  ;;  %v4417_v20 = vmul.f32 %v5628_v9, %v4405_v15  ;;  %v5630_v26 = vpop.eup %5629  ;;  %vm4423_vm9 = vweird.f32 %v5628_v9 }
0x2988   :  { %v4453_v30 = vmul.f32 8.0, %v5630_v26  ;;  %vm4424_vm11 = vmor %vm4422_vm10, %vm4423_vm9  ;;  %vm4457_vm12 = vweird.f32 %v5630_v26 }
0x2989   :  { %v4415_v22 = vsel %vm4414_vm8, %v5626_v11, %v4411_v55  ;;  %v4418_v23 = vmul.f32 %v5628_v9, %v4417_v20 }
0x298a   :  { %v4426_v25 = vmul.f32 %v4415_v22, %v4392_v5  ;;  %v4454_v35 = vsub.f32 1.0, %v4453_v30 }
0x298b   :  { %v4419_v52 = vmul.f32 0.5, %v4418_v23 }
0x298c   :  { %v4431_v28 = vmul.f32 %v5488_v21, %v4426_v25  ;;  %v4455_v44 = vmul.f32 %v5630_v26, %v4454_v35 }
0x298d   :  { %v4420_v29 = vsub.f32 1.5, %v4419_v52 }
0x298e   :  { %v4436_v31 = vadd.f32 %v5489_v24, %v4431_v28  ;;  %v4456_v49 = vadd.f32 %v5630_v26, %v4455_v44 }
0x298f   :  { %v4421_v32 = vmul.f32 %v5628_v9, %v4420_v29 }
0x2990   :  { %v4438_v33 = vsel %vm277_vm2, %v4436_v31, 0.0  ;;  %v4458_v51 = vsel %vm4457_vm12, %v5630_v26, %v4456_v49 }
0x2991   :  { %v4439_v34 = vrot.slane %v4438_v33, 4  ;;  %v4425_v1 = vsel %vm4424_vm11, %v5628_v9, %v4421_v32 }
0x2992   :  { %v4427_v37 = vmul.f32 %v4425_v1, %v4393_v56 }
0x2993   :  { %v4440_v41 = vadd.f32 %v4439_v34, %v4438_v33 }
0x2994   :  { %v4432_v42 = vmul.f32 %v5488_v21, %v4427_v37 }
0x2995   :  { %v4441_v43 = vrot.slane %v4440_v41, 2 }
0x2996   :  { %v4437_v57 = vadd.f32 %v5489_v24, %v4432_v42 }
0x2997   :  { %v4442_v45 = vadd.f32 %v4441_v43, %v4440_v41 }
0x2998   :  { %v4445_v36 = vsel %vm277_vm2, %v4437_v57, 0.0 }
0x2999   :  { %v4443_v47 = vrot.slane %v4442_v45, 1  ;;  %v4446_v48 = vrot.slane %v4445_v36, 4 }
0x299b   :  { %v4447_v38 = vadd.f32 %v4446_v48, %v4445_v36  ;;  %v4444_v50 = vadd.f32 %v4443_v47, %v4442_v45 }
0x299d   :  { %v4448_v53 = vrot.slane %v4447_v38, 2  ;;  %v4459_v58 = vmul.f32 %v4458_v51, %v4444_v50 }
0x299f   :  { %v4449_v46 = vadd.f32 %v4448_v53, %v4447_v38  ;;  %v4461_v40 = vpack.c.bf16 %v4459_v58, %v4459_v58 }
0x29a1   :  { %v4450_v39 = vrot.slane %v4449_v46, 1  ;;  %v4473_v16 = vunpack.c.l.b16 %v4461_v40 }
0x29a3   :  { %v4451_v60 = vadd.f32 %v4450_v39, %v4449_v46 }
0x29a5   :  { %v4460_v61 = vmul.f32 %v4458_v51, %v4451_v60 }
0x29a7   :  { %v4462_v14 = vpack.c.bf16 %v4460_v61, %v4460_v61 }
0x29a9   :  { %v4474_v5 = vunpack.c.l.b16 %v4462_v14 }
0x29ab   :  { %v4476_v62 = vsel %vm4475_vm13, %v4474_v5, %v4473_v16 }
0x29ac   :  { %v4477_v7 = vpack.c.b16 %v4476_v62, %v4476_v62 }
0x29ae   :  { %5258 = vmatmul.msk.bf16.vlgmr.msra.gmra.mxu1 %vm277_vm2, %v4477_v7 }
0x2a2b   :  { %v4502_v2 = vpop.f32.mrf.mxu1 }
0x2a2c   :  { %v4503_v56 = vadd.f32 %v5490_v27, %v4502_v2 }
0x2a2e   :  { %4506 = vst [vmem:[#allocation2] sm:$0x3] %v4503_v56 }
0x2a2f   :  { %5654 = shalt.err (!%p5651_p4)
}
0x2a30   :  { %4517 = dma.vmem_to_hbm [thread:$0]  %s4513_s4, 32, %s4515_s13, [#allocation3]  }
0x2a33   :  { %v4504_v63 = vpop.f32.mrf.mxu1 }
0x2a34   :  { %5655 = dma.done.wait [#allocation3], 32  }
0x2a35   :  { %5656 = vsyncadd [#allocation3], 4294967264 }
0x2a36   :  { %4522 = vsyncpa [#allocation3], 1 }

</bundles_post_ra>
